<compile_context>
chip_gen: v6e
topology: v6e:2x2x1
jax: 0.10.0
libtpu: 0.0.40
codegen_flags: <defaults>
</compile_context>

<pallas_src>
import functools

import jax
import jax.numpy as jnp
from jax.experimental import pallas as pl
from jax.experimental.pallas import tpu as pltpu

EPS = 1e-3

# fixed InceptionA channel plan
_C1X1 = 64 + 48 + 64          # fused 1x1 columns that get BN+ReLU immediately
_OFF_B1 = 64                  # output channel offsets
_OFF_B2 = 128
_OFF_B3 = 224                 # 64 + 64 + 96


# ------------------------------- Pallas kernel ------------------------------ #

def _inception_a_kernel(x_ref, wA_ref, sbA_ref, w5_ref, sb5_ref,
                        w3a_ref, sb3a_ref, w3b_ref, sb3b_ref, sbp_ref,
                        o_ref, tpad, t1pad, t2pad, ppad,
                        *, H, W, Cin, CT, row_tile):
    f32 = jnp.float32

    # Zero the padded VMEM scratches (borders must be zero; scratch persists
    # across grid steps, so re-zero every step).
    tpad[...] = jnp.zeros_like(tpad)
    t1pad[...] = jnp.zeros_like(t1pad)
    t2pad[...] = jnp.zeros_like(t2pad)
    ppad[...] = jnp.zeros_like(ppad)

    # ---------------- stage 1: fused 1x1 convolutions of x ------------------
    # columns of wA: [conv 64 | tower.conv 48 | tower_1.conv 64 | tower_2.conv CT]
    for r0 in range(0, H, row_tile):
        rh = min(row_tile, H - r0)
        xf = x_ref[0, r0:r0 + rh, :, :].reshape(rh * W, Cin)
        z = jnp.dot(xf, wA_ref[0], preferred_element_type=f32)   # (rh*W, 176+CT)
        y = jnp.maximum(z[:, :_C1X1] * sbA_ref[0:1, :] + sbA_ref[1:2, :], 0.0)
        # branch 0 output (64 ch)
        o_ref[0, r0:r0 + rh, :, 0:64] = y[:, 0:64].reshape(rh, W, 64)
        # branch 1 intermediate (48 ch) -> padded scratch (pad 2 for the 5x5)
        tpad[2 + r0:2 + r0 + rh, 2:2 + W, :] = y[:, 64:112].reshape(rh, W, 48)
        # branch 2 intermediate (64 ch) -> padded scratch (pad 1 for the 3x3)
        t1pad[1 + r0:1 + r0 + rh, 1:1 + W, :] = y[:, 112:176].reshape(rh, W, 64)
        # branch 3: conv1x1(pool(x)) == pool(conv1x1(x)); store the raw
        # (pre-BN/ReLU) 1x1 result, pool + BN + ReLU happen below.
        ppad[1 + r0:1 + r0 + rh, 1:1 + W, :] = \
            z[:, _C1X1:_C1X1 + CT].reshape(rh, W, CT)

    # -------- generic KxK conv + BN + ReLU from a padded VMEM scratch -------
    def conv_bn_relu(src, w_ref, sb_ref, KH, KW, Cout, write):
        Ci = src.shape[-1]
        for r0 in range(0, H, row_tile):
            rh = min(row_tile, H - r0)
            acc = jnp.zeros((rh * W, Cout), f32)
            for kh in range(KH):
                for kw in range(KW):
                    patch = src[r0 + kh:r0 + kh + rh, kw:kw + W, :]
                    acc = acc + jnp.dot(patch.reshape(rh * W, Ci),
                                        w_ref[kh * KW + kw],
                                        preferred_element_type=f32)
            yv = jnp.maximum(acc * sb_ref[0:1, :] + sb_ref[1:2, :], 0.0)
            write(r0, rh, yv)

    # ---------------- branch 1: 5x5 conv (48 -> 64), pad 2 ------------------
    def write_b1(r0, rh, yv):
        o_ref[0, r0:r0 + rh, :, _OFF_B1:_OFF_B1 + 64] = yv.reshape(rh, W, 64)

    conv_bn_relu(tpad, w5_ref, sb5_ref, 5, 5, 64, write_b1)

    # ---------------- branch 2: 3x3 -> 96, then 3x3 -> 96 -------------------
    def write_t2(r0, rh, yv):
        t2pad[1 + r0:1 + r0 + rh, 1:1 + W, :] = yv.reshape(rh, W, 96)

    conv_bn_relu(t1pad, w3a_ref, sb3a_ref, 3, 3, 96, write_t2)

    def write_b2(r0, rh, yv):
        o_ref[0, r0:r0 + rh, :, _OFF_B2:_OFF_B2 + 96] = yv.reshape(rh, W, 96)

    conv_bn_relu(t2pad, w3b_ref, sb3b_ref, 3, 3, 96, write_b2)

    # ------ branch 3: 3x3 avg-pool (count_include_pad=False) + BN + ReLU ----
    for r0 in range(0, H, row_tile):
        rh = min(row_tile, H - r0)
        psum = jnp.zeros((rh, W, CT), f32)
        for kh in range(3):
            for kw in range(3):
                psum = psum + ppad[r0 + kh:r0 + kh + rh, kw:kw + W, :]
        # valid-tap count per position, computed in-kernel (no HBM input).
        ri = jax.lax.broadcasted_iota(jnp.int32, (rh, W, CT), 0) + r0
        ci = jax.lax.broadcasted_iota(jnp.int32, (rh, W, CT), 1)
        rcnt = jnp.minimum(ri, 1) + 1 + jnp.minimum(H - 1 - ri, 1)
        ccnt = jnp.minimum(ci, 1) + 1 + jnp.minimum(W - 1 - ci, 1)
        pooled = (psum / (rcnt * ccnt).astype(f32)).reshape(rh * W, CT)
        yp = jnp.maximum(pooled * sbp_ref[0:1, :] + sbp_ref[1:2, :], 0.0)
        o_ref[0, r0:r0 + rh, :, _OFF_B3:_OFF_B3 + CT] = yp.reshape(rh, W, CT)


# --------------------------------- wrapper ---------------------------------- #

def _fold_bn(p):
    """Fold inference batch_norm(gamma=1, eps=1e-3) into (scale, bias)."""
    w, beta, mean, var = p
    scale = 1.0 / jnp.sqrt(var + EPS)
    return w, jnp.stack([scale, beta - mean * scale], axis=0)   # (2, Cout)


def _w_1x1(w):      # (Cout, Cin, 1, 1) -> (Cin, Cout)
    return jnp.transpose(w[:, :, 0, 0], (1, 0))


def _w_taps(w):     # (Cout, Cin, KH, KW) -> (KH*KW, Cin, Cout)
    cout, cin, kh, kw = w.shape
    return jnp.transpose(w, (2, 3, 1, 0)).reshape(kh * kw, cin, cout)


@jax.jit
def inception_a(x_nchw, params):
    """InceptionA.forward (NCHW in / NCHW out) as one fused Pallas kernel."""
    x = jnp.transpose(x_nchw, (0, 2, 3, 1)).astype(jnp.float32)   # -> NHWC
    N, H, W, Cin = x.shape

    w0, sb0 = _fold_bn(params["conv"])              # 1x1 -> 64
    wt, sbt = _fold_bn(params["tower.conv"])        # 1x1 -> 48
    w5, sb5 = _fold_bn(params["tower.conv_1"])      # 5x5 -> 64
    wt1, sbt1 = _fold_bn(params["tower_1.conv"])    # 1x1 -> 64
    w3a, sb3a = _fold_bn(params["tower_1.conv_1"])  # 3x3 -> 96
    w3b, sb3b = _fold_bn(params["tower_1.conv_2"])  # 3x3 -> 96
    wp, sbp = _fold_bn(params["tower_2.conv"])      # 1x1 -> tmp

    CT = wp.shape[0]
    CTOT = 64 + 64 + 96 + CT

    # Fused 1x1 weight: [conv | tower.conv | tower_1.conv | tower_2.conv].
    wA = jnp.concatenate([_w_1x1(w0), _w_1x1(wt), _w_1x1(wt1), _w_1x1(wp)],
                         axis=1)[None]                              # (1,Cin,176+CT)
    sbA = jnp.concatenate([sb0, sbt, sbt1], axis=1)                 # (2, 176)
    w5r, w3ar, w3br = _w_taps(w5), _w_taps(w3a), _w_taps(w3b)

    row_tile = min(H, max(1, 256 // W))   # keep the f32 accumulator resident

    kernel = functools.partial(_inception_a_kernel,
                               H=H, W=W, Cin=Cin, CT=CT, row_tile=row_tile)

    out = pl.pallas_call(
        kernel,
        out_shape=jax.ShapeDtypeStruct((N, H, W, CTOT), jnp.float32),
        grid=(N,),
        in_specs=[
            pl.BlockSpec((1, H, W, Cin), lambda b: (b, 0, 0, 0)),
            pl.BlockSpec(wA.shape, lambda b: (0, 0, 0)),
            pl.BlockSpec(sbA.shape, lambda b: (0, 0)),
            pl.BlockSpec(w5r.shape, lambda b: (0, 0, 0)),
            pl.BlockSpec(sb5.shape, lambda b: (0, 0)),
            pl.BlockSpec(w3ar.shape, lambda b: (0, 0, 0)),
            pl.BlockSpec(sb3a.shape, lambda b: (0, 0)),
            pl.BlockSpec(w3br.shape, lambda b: (0, 0, 0)),
            pl.BlockSpec(sb3b.shape, lambda b: (0, 0)),
            pl.BlockSpec(sbp.shape, lambda b: (0, 0)),
        ],
        out_specs=pl.BlockSpec((1, H, W, CTOT), lambda b: (b, 0, 0, 0)),
        scratch_shapes=[
            pltpu.VMEM((H + 4, W + 4, 48), jnp.float32),   # tower.conv out (pad 2)
            pltpu.VMEM((H + 2, W + 2, 64), jnp.float32),   # tower_1.conv out (pad 1)
            pltpu.VMEM((H + 2, W + 2, 96), jnp.float32),   # tower_1.conv_1 out (pad 1)
            pltpu.VMEM((H + 2, W + 2, CT), jnp.float32),   # tower_2 1x1(x) (pad 1)
        ],
        compiler_params=pltpu.CompilerParams(
            dimension_semantics=("parallel",)),
    )(x, wA, sbA, w5r, sb5, w3ar, sb3a, w3br, sb3b, sbp)

    return jnp.transpose(out, (0, 3, 1, 2))   # -> NCHW


# ------------------------------ pure-JAX reference -------------------------- #

def _conv_bn_relu_ref(x_nhwc, params, pad):
    w, beta, mean, var = params
    y = jax.lax.conv_general_dilated(
        x_nhwc, jnp.transpose(w, (2, 3, 1, 0)),
        window_strides=(1, 1), padding=[(pad, pad), (pad, pad)],
        dimension_numbers=("NHWC", "HWIO", "NHWC"),
        precision=jax.lax.Precision.HIGHEST)
    scale = 1.0 / jnp.sqrt(var + EPS)
    return jnp.maximum(y * scale + (beta - mean * scale), 0.0)


def _avgpool3x3_ref(x_nhwc):
    dims, strides = (1, 3, 3, 1), (1, 1, 1, 1)
    pads = [(0, 0), (1, 1), (1, 1), (0, 0)]
    s = jax.lax.reduce_window(x_nhwc, 0.0, jax.lax.add, dims, strides, pads)
    c = jax.lax.reduce_window(jnp.ones_like(x_nhwc), 0.0, jax.lax.add,
                              dims, strides, pads)
    return s / c


def _inception_a_ref(x_nchw, params):
    x = jnp.transpose(x_nchw, (0, 2, 3, 1))
    b0 = _conv_bn_relu_ref(x, params["conv"], 0)
    b1 = _conv_bn_relu_ref(_conv_bn_relu_ref(x, params["tower.conv"], 0),
                           params["tower.conv_1"], 2)
    t1 = _conv_bn_relu_ref(x, params["tower_1.conv"], 0)
    t1 = _conv_bn_relu_ref(t1, params["tower_1.conv_1"], 1)
    b2 = _conv_bn_relu_ref(t1, params["tower_1.conv_2"], 1)
    b3 = _conv_bn_relu_ref(_avgpool3x3_ref(x), params["tower_2.conv"], 0)
    out = jnp.concatenate([b0, b1, b2, b3], axis=-1)
    return jnp.transpose(out, (0, 3, 1, 2))


# ----------------------------------- params ---------------------------------- #

def _make_conv_params(key, cin, cout, kh, kw):
    k1, k2, k3, k4 = jax.random.split(key, 4)
    w = 0.1 * jax.random.normal(k1, (cout, cin, kh, kw), jnp.float32)
    beta = 0.1 * jax.random.normal(k2, (cout,), jnp.float32)
    mean = 0.1 * jax.random.normal(k3, (cout,), jnp.float32)
    var = jax.random.uniform(k4, (cout,), jnp.float32, minval=0.5, maxval=1.5)
    return (w, beta, mean, var)


def make_inception_a_params(key, in_channels, tmp_channels):
    ks = jax.random.split(key, 7)
    return {
        "conv":           _make_conv_params(ks[0], in_channels, 64, 1, 1),
        "tower.conv":     _make_conv_params(ks[1], in_channels, 48, 1, 1),
        "tower.conv_1":   _make_conv_params(ks[2], 48, 64, 5, 5),
        "tower_1.conv":   _make_conv_params(ks[3], in_channels, 64, 1, 1),
        "tower_1.conv_1": _make_conv_params(ks[4], 64, 96, 3, 3),
        "tower_1.conv_2": _make_conv_params(ks[5], 96, 96, 3, 3),
        "tower_2.conv":   _make_conv_params(ks[6], in_channels, tmp_channels, 1, 1),
    }


# ------------------------------------ main ------------------------------------ #

if __name__ == "__main__":
    N, Cin, H, W = 2, 8, 8, 8
    tmp_channels = 32

    key = jax.random.PRNGKey(0)
    kx, kp = jax.random.split(key)
    x = jax.random.normal(kx, (N, Cin, H, W), jnp.float32)  # NCHW, like PyTorch
    params = make_inception_a_params(kp, Cin, tmp_channels)

    out = jax.block_until_ready(inception_a(x, params))

    expected_c = 64 + 64 + 96 + tmp_channels
    assert out.shape == (N, expected_c, H, W), out.shape

    ref = jax.block_until_ready(_inception_a_ref(x, params))
    max_err = float(jnp.abs(out - ref).max())
    assert jnp.allclose(out, ref, atol=2e-3, rtol=2e-3), max_err

    print("KERNEL_OK")
</pallas_src>

<mosaic_0001>
module attributes {stable_mosaic.version = 11 : i64} {
  func.func @_inception_a_kernel(%arg0: i32, %arg1: memref<1x8x8x8xf32, #tpu.memory_space<vmem>>, %arg2: memref<1x8x208xf32, #tpu.memory_space<vmem>>, %arg3: memref<2x176xf32, #tpu.memory_space<vmem>>, %arg4: memref<25x48x64xf32, #tpu.memory_space<vmem>>, %arg5: memref<2x64xf32, #tpu.memory_space<vmem>>, %arg6: memref<9x64x96xf32, #tpu.memory_space<vmem>>, %arg7: memref<2x96xf32, #tpu.memory_space<vmem>>, %arg8: memref<9x96x96xf32, #tpu.memory_space<vmem>>, %arg9: memref<2x96xf32, #tpu.memory_space<vmem>>, %arg10: memref<2x32xf32, #tpu.memory_space<vmem>>, %arg11: memref<1x8x8x256xf32, #tpu.memory_space<vmem>>, %arg12: memref<12x12x48xf32, #tpu.memory_space<vmem>>, %arg13: memref<10x10x64xf32, #tpu.memory_space<vmem>>, %arg14: memref<10x10x96xf32, #tpu.memory_space<vmem>>, %arg15: memref<10x10x32xf32, #tpu.memory_space<vmem>>) attributes {dimension_semantics = [#tpu.dimension_semantics<parallel>], iteration_bounds = array<i64: 2>, scalar_prefetch = 0 : i64, scratch_operands = 4 : i64, tpu.core_type = #tpu.core_type<tc>, window_params = [{transform_indices = @transform_0, window_bounds = array<i64: 1, 8, 8, 8>}, {pipeline_mode = #tpu.pipeline_mode<synchronous>, transform_indices = @transform_1, window_bounds = array<i64: 1, 8, 208>}, {pipeline_mode = #tpu.pipeline_mode<synchronous>, transform_indices = @transform_2, window_bounds = array<i64: 2, 176>}, {pipeline_mode = #tpu.pipeline_mode<synchronous>, transform_indices = @transform_3, window_bounds = array<i64: 25, 48, 64>}, {pipeline_mode = #tpu.pipeline_mode<synchronous>, transform_indices = @transform_4, window_bounds = array<i64: 2, 64>}, {pipeline_mode = #tpu.pipeline_mode<synchronous>, transform_indices = @transform_5, window_bounds = array<i64: 9, 64, 96>}, {pipeline_mode = #tpu.pipeline_mode<synchronous>, transform_indices = @transform_6, window_bounds = array<i64: 2, 96>}, {pipeline_mode = #tpu.pipeline_mode<synchronous>, transform_indices = @transform_7, window_bounds = array<i64: 9, 96, 96>}, {pipeline_mode = #tpu.pipeline_mode<synchronous>, transform_indices = @transform_8, window_bounds = array<i64: 2, 96>}, {pipeline_mode = #tpu.pipeline_mode<synchronous>, transform_indices = @transform_9, window_bounds = array<i64: 2, 32>}, {transform_indices = @transform_10, window_bounds = array<i64: 1, 8, 8, 256>}]} {
    %cst = arith.constant 0.000000e+00 : f32
    %0 = vector.broadcast %cst : f32 to vector<12x12x48xf32>
    %c0 = arith.constant 0 : index
    %c0_0 = arith.constant 0 : index
    %c0_1 = arith.constant 0 : index
    %1 = vector.load %arg12[%c0, %c0_0, %c0_1] : memref<12x12x48xf32, #tpu.memory_space<vmem>>, vector<12x12x48xf32>
    tpu.vector_store %arg12[%c0, %c0_0, %c0_1], %0 {strides = array<i32>} : memref<12x12x48xf32, #tpu.memory_space<vmem>>, vector<12x12x48xf32>,
    %cst_2 = arith.constant 0.000000e+00 : f32
    %2 = vector.broadcast %cst_2 : f32 to vector<10x10x64xf32>
    %c0_3 = arith.constant 0 : index
    %c0_4 = arith.constant 0 : index
    %c0_5 = arith.constant 0 : index
    %3 = vector.load %arg13[%c0_3, %c0_4, %c0_5] : memref<10x10x64xf32, #tpu.memory_space<vmem>>, vector<10x10x64xf32>
    tpu.vector_store %arg13[%c0_3, %c0_4, %c0_5], %2 {strides = array<i32>} : memref<10x10x64xf32, #tpu.memory_space<vmem>>, vector<10x10x64xf32>,
    %cst_6 = arith.constant 0.000000e+00 : f32
    %4 = vector.broadcast %cst_6 : f32 to vector<10x10x96xf32>
    %c0_7 = arith.constant 0 : index
    %c0_8 = arith.constant 0 : index
    %c0_9 = arith.constant 0 : index
    %5 = vector.load %arg14[%c0_7, %c0_8, %c0_9] : memref<10x10x96xf32, #tpu.memory_space<vmem>>, vector<10x10x96xf32>
    tpu.vector_store %arg14[%c0_7, %c0_8, %c0_9], %4 {strides = array<i32>} : memref<10x10x96xf32, #tpu.memory_space<vmem>>, vector<10x10x96xf32>,
    %cst_10 = arith.constant 0.000000e+00 : f32
    %6 = vector.broadcast %cst_10 : f32 to vector<10x10x32xf32>
    %c0_11 = arith.constant 0 : index
    %c0_12 = arith.constant 0 : index
    %c0_13 = arith.constant 0 : index
    %7 = vector.load %arg15[%c0_11, %c0_12, %c0_13] : memref<10x10x32xf32, #tpu.memory_space<vmem>>, vector<10x10x32xf32>
    tpu.vector_store %arg15[%c0_11, %c0_12, %c0_13], %6 {strides = array<i32>} : memref<10x10x32xf32, #tpu.memory_space<vmem>>, vector<10x10x32xf32>,
    %c0_14 = arith.constant 0 : index
    %c0_15 = arith.constant 0 : index
    %c0_16 = arith.constant 0 : index
    %c0_17 = arith.constant 0 : index
    %8 = vector.load %arg1[%c0_14, %c0_15, %c0_16, %c0_17] : memref<1x8x8x8xf32, #tpu.memory_space<vmem>>, vector<1x8x8x8xf32>
    %9 = vector.shape_cast %8 : vector<1x8x8x8xf32> to vector<8x8x8xf32>
    %10 = vector.shape_cast %9 : vector<8x8x8xf32> to vector<64x8xf32>
    %c0_18 = arith.constant 0 : index
    %c0_19 = arith.constant 0 : index
    %c0_20 = arith.constant 0 : index
    %11 = vector.load %arg2[%c0_18, %c0_19, %c0_20] : memref<1x8x208xf32, #tpu.memory_space<vmem>>, vector<1x8x208xf32>
    %12 = vector.shape_cast %11 : vector<1x8x208xf32> to vector<8x208xf32>
    %cst_21 = arith.constant dense<0.000000e+00> : vector<64x208xf32>
    %13 = tpu.matmul %10, %12, %cst_21 {dimension_numbers = #tpu.dot_dimension_numbers<[1], [0], [0], [1], [0, 0, 1, 1], [], []>} : vector<64x8xf32>, vector<8x208xf32>, vector<64x208xf32> -> vector<64x208xf32>
    %14 = vector.extract_strided_slice %13 {offsets = [0, 0], sizes = [64, 176], strides = [1, 1]} : vector<64x208xf32> to vector<64x176xf32>
    %c0_22 = arith.constant 0 : index
    %c0_23 = arith.constant 0 : index
    %15 = vector.load %arg3[%c0_22, %c0_23] : memref<2x176xf32, #tpu.memory_space<vmem>>, vector<1x176xf32>
    %16 = vector.broadcast %15 : vector<1x176xf32> to vector<64x176xf32>
    %17 = arith.mulf %14, %16 : vector<64x176xf32>
    %c1 = arith.constant 1 : index
    %c0_24 = arith.constant 0 : index
    %18 = vector.load %arg3[%c1, %c0_24] : memref<2x176xf32, #tpu.memory_space<vmem>>, vector<1x176xf32>
    %19 = vector.broadcast %18 : vector<1x176xf32> to vector<64x176xf32>
    %20 = arith.addf %17, %19 : vector<64x176xf32>
    %cst_25 = arith.constant 0.000000e+00 : f32
    %21 = vector.broadcast %cst_25 : f32 to vector<64x176xf32>
    %22 = arith.maximumf %20, %21 : vector<64x176xf32>
    %23 = vector.extract_strided_slice %22 {offsets = [0, 0], sizes = [64, 64], strides = [1, 1]} : vector<64x176xf32> to vector<64x64xf32>
    %24 = vector.shape_cast %23 : vector<64x64xf32> to vector<8x8x64xf32>
    %c0_26 = arith.constant 0 : index
    %c0_27 = arith.constant 0 : index
    %c0_28 = arith.constant 0 : index
    %c0_29 = arith.constant 0 : index
    %25 = vector.load %arg11[%c0_26, %c0_27, %c0_28, %c0_29] : memref<1x8x8x256xf32, #tpu.memory_space<vmem>>, vector<1x8x8x64xf32>
    %26 = vector.shape_cast %25 : vector<1x8x8x64xf32> to vector<8x8x64xf32>
    %27 = vector.shape_cast %24 : vector<8x8x64xf32> to vector<1x8x8x64xf32>
    tpu.vector_store %arg11[%c0_26, %c0_27, %c0_28, %c0_29], %27 {strides = array<i32>} : memref<1x8x8x256xf32, #tpu.memory_space<vmem>>, vector<1x8x8x64xf32>,
    %28 = vector.extract_strided_slice %22 {offsets = [0, 64], sizes = [64, 48], strides = [1, 1]} : vector<64x176xf32> to vector<64x48xf32>
    %29 = vector.shape_cast %28 : vector<64x48xf32> to vector<8x8x48xf32>
    %c2 = arith.constant 2 : index
    %c2_30 = arith.constant 2 : index
    %c0_31 = arith.constant 0 : index
    %30 = vector.load %arg12[%c2, %c2_30, %c0_31] : memref<12x12x48xf32, #tpu.memory_space<vmem>>, vector<8x8x48xf32>
    tpu.vector_store %arg12[%c2, %c2_30, %c0_31], %29 {strides = array<i32>} : memref<12x12x48xf32, #tpu.memory_space<vmem>>, vector<8x8x48xf32>,
    %31 = vector.extract_strided_slice %22 {offsets = [0, 112], sizes = [64, 64], strides = [1, 1]} : vector<64x176xf32> to vector<64x64xf32>
    %32 = vector.shape_cast %31 : vector<64x64xf32> to vector<8x8x64xf32>
    %c1_32 = arith.constant 1 : index
    %c1_33 = arith.constant 1 : index
    %c0_34 = arith.constant 0 : index
    %33 = vector.load %arg13[%c1_32, %c1_33, %c0_34] : memref<10x10x64xf32, #tpu.memory_space<vmem>>, vector<8x8x64xf32>
    tpu.vector_store %arg13[%c1_32, %c1_33, %c0_34], %32 {strides = array<i32>} : memref<10x10x64xf32, #tpu.memory_space<vmem>>, vector<8x8x64xf32>,
    %34 = vector.extract_strided_slice %13 {offsets = [0, 176], sizes = [64, 32], strides = [1, 1]} : vector<64x208xf32> to vector<64x32xf32>
    %35 = vector.shape_cast %34 : vector<64x32xf32> to vector<8x8x32xf32>
    %c1_35 = arith.constant 1 : index
    %c1_36 = arith.constant 1 : index
    %c0_37 = arith.constant 0 : index
    %36 = vector.load %arg15[%c1_35, %c1_36, %c0_37] : memref<10x10x32xf32, #tpu.memory_space<vmem>>, vector<8x8x32xf32>
    tpu.vector_store %arg15[%c1_35, %c1_36, %c0_37], %35 {strides = array<i32>} : memref<10x10x32xf32, #tpu.memory_space<vmem>>, vector<8x8x32xf32>,
    %cst_38 = arith.constant 0.000000e+00 : f32
    %37 = vector.broadcast %cst_38 : f32 to vector<64x64xf32>
    %c0_39 = arith.constant 0 : index
    %c0_40 = arith.constant 0 : index
    %c0_41 = arith.constant 0 : index
    %38 = vector.load %arg12[%c0_39, %c0_40, %c0_41] : memref<12x12x48xf32, #tpu.memory_space<vmem>>, vector<8x8x48xf32>
    %39 = vector.shape_cast %38 : vector<8x8x48xf32> to vector<64x48xf32>
    %c0_42 = arith.constant 0 : index
    %c0_43 = arith.constant 0 : index
    %c0_44 = arith.constant 0 : index
    %40 = vector.load %arg4[%c0_42, %c0_43, %c0_44] : memref<25x48x64xf32, #tpu.memory_space<vmem>>, vector<1x48x64xf32>
    %41 = vector.shape_cast %40 : vector<1x48x64xf32> to vector<48x64xf32>
    %cst_45 = arith.constant dense<0.000000e+00> : vector<64x64xf32>
    %42 = tpu.matmul %39, %41, %cst_45 {dimension_numbers = #tpu.dot_dimension_numbers<[1], [0], [0], [1], [0, 0, 1, 1], [], []>} : vector<64x48xf32>, vector<48x64xf32>, vector<64x64xf32> -> vector<64x64xf32>
    %43 = arith.addf %37, %42 : vector<64x64xf32>
    %c0_46 = arith.constant 0 : index
    %c1_47 = arith.constant 1 : index
    %c0_48 = arith.constant 0 : index
    %44 = vector.load %arg12[%c0_46, %c1_47, %c0_48] : memref<12x12x48xf32, #tpu.memory_space<vmem>>, vector<8x8x48xf32>
    %45 = vector.shape_cast %44 : vector<8x8x48xf32> to vector<64x48xf32>
    %c1_49 = arith.constant 1 : index
    %c0_50 = arith.constant 0 : index
    %c0_51 = arith.constant 0 : index
    %46 = vector.load %arg4[%c1_49, %c0_50, %c0_51] : memref<25x48x64xf32, #tpu.memory_space<vmem>>, vector<1x48x64xf32>
    %47 = vector.shape_cast %46 : vector<1x48x64xf32> to vector<48x64xf32>
    %cst_52 = arith.constant dense<0.000000e+00> : vector<64x64xf32>
    %48 = tpu.matmul %45, %47, %cst_52 {dimension_numbers = #tpu.dot_dimension_numbers<[1], [0], [0], [1], [0, 0, 1, 1], [], []>} : vector<64x48xf32>, vector<48x64xf32>, vector<64x64xf32> -> vector<64x64xf32>
    %49 = arith.addf %43, %48 : vector<64x64xf32>
    %c0_53 = arith.constant 0 : index
    %c2_54 = arith.constant 2 : index
    %c0_55 = arith.constant 0 : index
    %50 = vector.load %arg12[%c0_53, %c2_54, %c0_55] : memref<12x12x48xf32, #tpu.memory_space<vmem>>, vector<8x8x48xf32>
    %51 = vector.shape_cast %50 : vector<8x8x48xf32> to vector<64x48xf32>
    %c2_56 = arith.constant 2 : index
    %c0_57 = arith.constant 0 : index
    %c0_58 = arith.constant 0 : index
    %52 = vector.load %arg4[%c2_56, %c0_57, %c0_58] : memref<25x48x64xf32, #tpu.memory_space<vmem>>, vector<1x48x64xf32>
    %53 = vector.shape_cast %52 : vector<1x48x64xf32> to vector<48x64xf32>
    %cst_59 = arith.constant dense<0.000000e+00> : vector<64x64xf32>
    %54 = tpu.matmul %51, %53, %cst_59 {dimension_numbers = #tpu.dot_dimension_numbers<[1], [0], [0], [1], [0, 0, 1, 1], [], []>} : vector<64x48xf32>, vector<48x64xf32>, vector<64x64xf32> -> vector<64x64xf32>
    %55 = arith.addf %49, %54 : vector<64x64xf32>
    %c0_60 = arith.constant 0 : index
    %c3 = arith.constant 3 : index
    %c0_61 = arith.constant 0 : index
    %56 = vector.load %arg12[%c0_60, %c3, %c0_61] : memref<12x12x48xf32, #tpu.memory_space<vmem>>, vector<8x8x48xf32>
    %57 = vector.shape_cast %56 : vector<8x8x48xf32> to vector<64x48xf32>
    %c3_62 = arith.constant 3 : index
    %c0_63 = arith.constant 0 : index
    %c0_64 = arith.constant 0 : index
    %58 = vector.load %arg4[%c3_62, %c0_63, %c0_64] : memref<25x48x64xf32, #tpu.memory_space<vmem>>, vector<1x48x64xf32>
    %59 = vector.shape_cast %58 : vector<1x48x64xf32> to vector<48x64xf32>
    %cst_65 = arith.constant dense<0.000000e+00> : vector<64x64xf32>
    %60 = tpu.matmul %57, %59, %cst_65 {dimension_numbers = #tpu.dot_dimension_numbers<[1], [0], [0], [1], [0, 0, 1, 1], [], []>} : vector<64x48xf32>, vector<48x64xf32>, vector<64x64xf32> -> vector<64x64xf32>
    %61 = arith.addf %55, %60 : vector<64x64xf32>
    %c0_66 = arith.constant 0 : index
    %c4 = arith.constant 4 : index
    %c0_67 = arith.constant 0 : index
    %62 = vector.load %arg12[%c0_66, %c4, %c0_67] : memref<12x12x48xf32, #tpu.memory_space<vmem>>, vector<8x8x48xf32>
    %63 = vector.shape_cast %62 : vector<8x8x48xf32> to vector<64x48xf32>
    %c4_68 = arith.constant 4 : index
    %c0_69 = arith.constant 0 : index
    %c0_70 = arith.constant 0 : index
    %64 = vector.load %arg4[%c4_68, %c0_69, %c0_70] : memref<25x48x64xf32, #tpu.memory_space<vmem>>, vector<1x48x64xf32>
    %65 = vector.shape_cast %64 : vector<1x48x64xf32> to vector<48x64xf32>
    %cst_71 = arith.constant dense<0.000000e+00> : vector<64x64xf32>
    %66 = tpu.matmul %63, %65, %cst_71 {dimension_numbers = #tpu.dot_dimension_numbers<[1], [0], [0], [1], [0, 0, 1, 1], [], []>} : vector<64x48xf32>, vector<48x64xf32>, vector<64x64xf32> -> vector<64x64xf32>
    %67 = arith.addf %61, %66 : vector<64x64xf32>
    %c1_72 = arith.constant 1 : index
    %c0_73 = arith.constant 0 : index
    %c0_74 = arith.constant 0 : index
    %68 = vector.load %arg12[%c1_72, %c0_73, %c0_74] : memref<12x12x48xf32, #tpu.memory_space<vmem>>, vector<8x8x48xf32>
    %69 = vector.shape_cast %68 : vector<8x8x48xf32> to vector<64x48xf32>
    %c5 = arith.constant 5 : index
    %c0_75 = arith.constant 0 : index
    %c0_76 = arith.constant 0 : index
    %70 = vector.load %arg4[%c5, %c0_75, %c0_76] : memref<25x48x64xf32, #tpu.memory_space<vmem>>, vector<1x48x64xf32>
    %71 = vector.shape_cast %70 : vector<1x48x64xf32> to vector<48x64xf32>
    %cst_77 = arith.constant dense<0.000000e+00> : vector<64x64xf32>
    %72 = tpu.matmul %69, %71, %cst_77 {dimension_numbers = #tpu.dot_dimension_numbers<[1], [0], [0], [1], [0, 0, 1, 1], [], []>} : vector<64x48xf32>, vector<48x64xf32>, vector<64x64xf32> -> vector<64x64xf32>
    %73 = arith.addf %67, %72 : vector<64x64xf32>
    %c1_78 = arith.constant 1 : index
    %c1_79 = arith.constant 1 : index
    %c0_80 = arith.constant 0 : index
    %74 = vector.load %arg12[%c1_78, %c1_79, %c0_80] : memref<12x12x48xf32, #tpu.memory_space<vmem>>, vector<8x8x48xf32>
    %75 = vector.shape_cast %74 : vector<8x8x48xf32> to vector<64x48xf32>
    %c6 = arith.constant 6 : index
    %c0_81 = arith.constant 0 : index
    %c0_82 = arith.constant 0 : index
    %76 = vector.load %arg4[%c6, %c0_81, %c0_82] : memref<25x48x64xf32, #tpu.memory_space<vmem>>, vector<1x48x64xf32>
    %77 = vector.shape_cast %76 : vector<1x48x64xf32> to vector<48x64xf32>
    %cst_83 = arith.constant dense<0.000000e+00> : vector<64x64xf32>
    %78 = tpu.matmul %75, %77, %cst_83 {dimension_numbers = #tpu.dot_dimension_numbers<[1], [0], [0], [1], [0, 0, 1, 1], [], []>} : vector<64x48xf32>, vector<48x64xf32>, vector<64x64xf32> -> vector<64x64xf32>
    %79 = arith.addf %73, %78 : vector<64x64xf32>
    %c1_84 = arith.constant 1 : index
    %c2_85 = arith.constant 2 : index
    %c0_86 = arith.constant 0 : index
    %80 = vector.load %arg12[%c1_84, %c2_85, %c0_86] : memref<12x12x48xf32, #tpu.memory_space<vmem>>, vector<8x8x48xf32>
    %81 = vector.shape_cast %80 : vector<8x8x48xf32> to vector<64x48xf32>
    %c7 = arith.constant 7 : index
    %c0_87 = arith.constant 0 : index
    %c0_88 = arith.constant 0 : index
    %82 = vector.load %arg4[%c7, %c0_87, %c0_88] : memref<25x48x64xf32, #tpu.memory_space<vmem>>, vector<1x48x64xf32>
    %83 = vector.shape_cast %82 : vector<1x48x64xf32> to vector<48x64xf32>
    %cst_89 = arith.constant dense<0.000000e+00> : vector<64x64xf32>
    %84 = tpu.matmul %81, %83, %cst_89 {dimension_numbers = #tpu.dot_dimension_numbers<[1], [0], [0], [1], [0, 0, 1, 1], [], []>} : vector<64x48xf32>, vector<48x64xf32>, vector<64x64xf32> -> vector<64x64xf32>
    %85 = arith.addf %79, %84 : vector<64x64xf32>
    %c1_90 = arith.constant 1 : index
    %c3_91 = arith.constant 3 : index
    %c0_92 = arith.constant 0 : index
    %86 = vector.load %arg12[%c1_90, %c3_91, %c0_92] : memref<12x12x48xf32, #tpu.memory_space<vmem>>, vector<8x8x48xf32>
    %87 = vector.shape_cast %86 : vector<8x8x48xf32> to vector<64x48xf32>
    %c8 = arith.constant 8 : index
    %c0_93 = arith.constant 0 : index
    %c0_94 = arith.constant 0 : index
    %88 = vector.load %arg4[%c8, %c0_93, %c0_94] : memref<25x48x64xf32, #tpu.memory_space<vmem>>, vector<1x48x64xf32>
    %89 = vector.shape_cast %88 : vector<1x48x64xf32> to vector<48x64xf32>
    %cst_95 = arith.constant dense<0.000000e+00> : vector<64x64xf32>
    %90 = tpu.matmul %87, %89, %cst_95 {dimension_numbers = #tpu.dot_dimension_numbers<[1], [0], [0], [1], [0, 0, 1, 1], [], []>} : vector<64x48xf32>, vector<48x64xf32>, vector<64x64xf32> -> vector<64x64xf32>
    %91 = arith.addf %85, %90 : vector<64x64xf32>
    %c1_96 = arith.constant 1 : index
    %c4_97 = arith.constant 4 : index
    %c0_98 = arith.constant 0 : index
    %92 = vector.load %arg12[%c1_96, %c4_97, %c0_98] : memref<12x12x48xf32, #tpu.memory_space<vmem>>, vector<8x8x48xf32>
    %93 = vector.shape_cast %92 : vector<8x8x48xf32> to vector<64x48xf32>
    %c9 = arith.constant 9 : index
    %c0_99 = arith.constant 0 : index
    %c0_100 = arith.constant 0 : index
    %94 = vector.load %arg4[%c9, %c0_99, %c0_100] : memref<25x48x64xf32, #tpu.memory_space<vmem>>, vector<1x48x64xf32>
    %95 = vector.shape_cast %94 : vector<1x48x64xf32> to vector<48x64xf32>
    %cst_101 = arith.constant dense<0.000000e+00> : vector<64x64xf32>
    %96 = tpu.matmul %93, %95, %cst_101 {dimension_numbers = #tpu.dot_dimension_numbers<[1], [0], [0], [1], [0, 0, 1, 1], [], []>} : vector<64x48xf32>, vector<48x64xf32>, vector<64x64xf32> -> vector<64x64xf32>
    %97 = arith.addf %91, %96 : vector<64x64xf32>
    %c2_102 = arith.constant 2 : index
    %c0_103 = arith.constant 0 : index
    %c0_104 = arith.constant 0 : index
    %98 = vector.load %arg12[%c2_102, %c0_103, %c0_104] : memref<12x12x48xf32, #tpu.memory_space<vmem>>, vector<8x8x48xf32>
    %99 = vector.shape_cast %98 : vector<8x8x48xf32> to vector<64x48xf32>
    %c10 = arith.constant 10 : index
    %c0_105 = arith.constant 0 : index
    %c0_106 = arith.constant 0 : index
    %100 = vector.load %arg4[%c10, %c0_105, %c0_106] : memref<25x48x64xf32, #tpu.memory_space<vmem>>, vector<1x48x64xf32>
    %101 = vector.shape_cast %100 : vector<1x48x64xf32> to vector<48x64xf32>
    %cst_107 = arith.constant dense<0.000000e+00> : vector<64x64xf32>
    %102 = tpu.matmul %99, %101, %cst_107 {dimension_numbers = #tpu.dot_dimension_numbers<[1], [0], [0], [1], [0, 0, 1, 1], [], []>} : vector<64x48xf32>, vector<48x64xf32>, vector<64x64xf32> -> vector<64x64xf32>
    %103 = arith.addf %97, %102 : vector<64x64xf32>
    %c2_108 = arith.constant 2 : index
    %c1_109 = arith.constant 1 : index
    %c0_110 = arith.constant 0 : index
    %104 = vector.load %arg12[%c2_108, %c1_109, %c0_110] : memref<12x12x48xf32, #tpu.memory_space<vmem>>, vector<8x8x48xf32>
    %105 = vector.shape_cast %104 : vector<8x8x48xf32> to vector<64x48xf32>
    %c11 = arith.constant 11 : index
    %c0_111 = arith.constant 0 : index
    %c0_112 = arith.constant 0 : index
    %106 = vector.load %arg4[%c11, %c0_111, %c0_112] : memref<25x48x64xf32, #tpu.memory_space<vmem>>, vector<1x48x64xf32>
    %107 = vector.shape_cast %106 : vector<1x48x64xf32> to vector<48x64xf32>
    %cst_113 = arith.constant dense<0.000000e+00> : vector<64x64xf32>
    %108 = tpu.matmul %105, %107, %cst_113 {dimension_numbers = #tpu.dot_dimension_numbers<[1], [0], [0], [1], [0, 0, 1, 1], [], []>} : vector<64x48xf32>, vector<48x64xf32>, vector<64x64xf32> -> vector<64x64xf32>
    %109 = arith.addf %103, %108 : vector<64x64xf32>
    %c2_114 = arith.constant 2 : index
    %c2_115 = arith.constant 2 : index
    %c0_116 = arith.constant 0 : index
    %110 = vector.load %arg12[%c2_114, %c2_115, %c0_116] : memref<12x12x48xf32, #tpu.memory_space<vmem>>, vector<8x8x48xf32>
    %111 = vector.shape_cast %110 : vector<8x8x48xf32> to vector<64x48xf32>
    %c12 = arith.constant 12 : index
    %c0_117 = arith.constant 0 : index
    %c0_118 = arith.constant 0 : index
    %112 = vector.load %arg4[%c12, %c0_117, %c0_118] : memref<25x48x64xf32, #tpu.memory_space<vmem>>, vector<1x48x64xf32>
    %113 = vector.shape_cast %112 : vector<1x48x64xf32> to vector<48x64xf32>
    %cst_119 = arith.constant dense<0.000000e+00> : vector<64x64xf32>
    %114 = tpu.matmul %111, %113, %cst_119 {dimension_numbers = #tpu.dot_dimension_numbers<[1], [0], [0], [1], [0, 0, 1, 1], [], []>} : vector<64x48xf32>, vector<48x64xf32>, vector<64x64xf32> -> vector<64x64xf32>
    %115 = arith.addf %109, %114 : vector<64x64xf32>
    %c2_120 = arith.constant 2 : index
    %c3_121 = arith.constant 3 : index
    %c0_122 = arith.constant 0 : index
    %116 = vector.load %arg12[%c2_120, %c3_121, %c0_122] : memref<12x12x48xf32, #tpu.memory_space<vmem>>, vector<8x8x48xf32>
    %117 = vector.shape_cast %116 : vector<8x8x48xf32> to vector<64x48xf32>
    %c13 = arith.constant 13 : index
    %c0_123 = arith.constant 0 : index
    %c0_124 = arith.constant 0 : index
    %118 = vector.load %arg4[%c13, %c0_123, %c0_124] : memref<25x48x64xf32, #tpu.memory_space<vmem>>, vector<1x48x64xf32>
    %119 = vector.shape_cast %118 : vector<1x48x64xf32> to vector<48x64xf32>
    %cst_125 = arith.constant dense<0.000000e+00> : vector<64x64xf32>
    %120 = tpu.matmul %117, %119, %cst_125 {dimension_numbers = #tpu.dot_dimension_numbers<[1], [0], [0], [1], [0, 0, 1, 1], [], []>} : vector<64x48xf32>, vector<48x64xf32>, vector<64x64xf32> -> vector<64x64xf32>
    %121 = arith.addf %115, %120 : vector<64x64xf32>
    %c2_126 = arith.constant 2 : index
    %c4_127 = arith.constant 4 : index
    %c0_128 = arith.constant 0 : index
    %122 = vector.load %arg12[%c2_126, %c4_127, %c0_128] : memref<12x12x48xf32, #tpu.memory_space<vmem>>, vector<8x8x48xf32>
    %123 = vector.shape_cast %122 : vector<8x8x48xf32> to vector<64x48xf32>
    %c14 = arith.constant 14 : index
    %c0_129 = arith.constant 0 : index
    %c0_130 = arith.constant 0 : index
    %124 = vector.load %arg4[%c14, %c0_129, %c0_130] : memref<25x48x64xf32, #tpu.memory_space<vmem>>, vector<1x48x64xf32>
    %125 = vector.shape_cast %124 : vector<1x48x64xf32> to vector<48x64xf32>
    %cst_131 = arith.constant dense<0.000000e+00> : vector<64x64xf32>
    %126 = tpu.matmul %123, %125, %cst_131 {dimension_numbers = #tpu.dot_dimension_numbers<[1], [0], [0], [1], [0, 0, 1, 1], [], []>} : vector<64x48xf32>, vector<48x64xf32>, vector<64x64xf32> -> vector<64x64xf32>
    %127 = arith.addf %121, %126 : vector<64x64xf32>
    %c3_132 = arith.constant 3 : index
    %c0_133 = arith.constant 0 : index
    %c0_134 = arith.constant 0 : index
    %128 = vector.load %arg12[%c3_132, %c0_133, %c0_134] : memref<12x12x48xf32, #tpu.memory_space<vmem>>, vector<8x8x48xf32>
    %129 = vector.shape_cast %128 : vector<8x8x48xf32> to vector<64x48xf32>
    %c15 = arith.constant 15 : index
    %c0_135 = arith.constant 0 : index
    %c0_136 = arith.constant 0 : index
    %130 = vector.load %arg4[%c15, %c0_135, %c0_136] : memref<25x48x64xf32, #tpu.memory_space<vmem>>, vector<1x48x64xf32>
    %131 = vector.shape_cast %130 : vector<1x48x64xf32> to vector<48x64xf32>
    %cst_137 = arith.constant dense<0.000000e+00> : vector<64x64xf32>
    %132 = tpu.matmul %129, %131, %cst_137 {dimension_numbers = #tpu.dot_dimension_numbers<[1], [0], [0], [1], [0, 0, 1, 1], [], []>} : vector<64x48xf32>, vector<48x64xf32>, vector<64x64xf32> -> vector<64x64xf32>
    %133 = arith.addf %127, %132 : vector<64x64xf32>
    %c3_138 = arith.constant 3 : index
    %c1_139 = arith.constant 1 : index
    %c0_140 = arith.constant 0 : index
    %134 = vector.load %arg12[%c3_138, %c1_139, %c0_140] : memref<12x12x48xf32, #tpu.memory_space<vmem>>, vector<8x8x48xf32>
    %135 = vector.shape_cast %134 : vector<8x8x48xf32> to vector<64x48xf32>
    %c16 = arith.constant 16 : index
    %c0_141 = arith.constant 0 : index
    %c0_142 = arith.constant 0 : index
    %136 = vector.load %arg4[%c16, %c0_141, %c0_142] : memref<25x48x64xf32, #tpu.memory_space<vmem>>, vector<1x48x64xf32>
    %137 = vector.shape_cast %136 : vector<1x48x64xf32> to vector<48x64xf32>
    %cst_143 = arith.constant dense<0.000000e+00> : vector<64x64xf32>
    %138 = tpu.matmul %135, %137, %cst_143 {dimension_numbers = #tpu.dot_dimension_numbers<[1], [0], [0], [1], [0, 0, 1, 1], [], []>} : vector<64x48xf32>, vector<48x64xf32>, vector<64x64xf32> -> vector<64x64xf32>
    %139 = arith.addf %133, %138 : vector<64x64xf32>
    %c3_144 = arith.constant 3 : index
    %c2_145 = arith.constant 2 : index
    %c0_146 = arith.constant 0 : index
    %140 = vector.load %arg12[%c3_144, %c2_145, %c0_146] : memref<12x12x48xf32, #tpu.memory_space<vmem>>, vector<8x8x48xf32>
    %141 = vector.shape_cast %140 : vector<8x8x48xf32> to vector<64x48xf32>
    %c17 = arith.constant 17 : index
    %c0_147 = arith.constant 0 : index
    %c0_148 = arith.constant 0 : index
    %142 = vector.load %arg4[%c17, %c0_147, %c0_148] : memref<25x48x64xf32, #tpu.memory_space<vmem>>, vector<1x48x64xf32>
    %143 = vector.shape_cast %142 : vector<1x48x64xf32> to vector<48x64xf32>
    %cst_149 = arith.constant dense<0.000000e+00> : vector<64x64xf32>
    %144 = tpu.matmul %141, %143, %cst_149 {dimension_numbers = #tpu.dot_dimension_numbers<[1], [0], [0], [1], [0, 0, 1, 1], [], []>} : vector<64x48xf32>, vector<48x64xf32>, vector<64x64xf32> -> vector<64x64xf32>
    %145 = arith.addf %139, %144 : vector<64x64xf32>
    %c3_150 = arith.constant 3 : index
    %c3_151 = arith.constant 3 : index
    %c0_152 = arith.constant 0 : index
    %146 = vector.load %arg12[%c3_150, %c3_151, %c0_152] : memref<12x12x48xf32, #tpu.memory_space<vmem>>, vector<8x8x48xf32>
    %147 = vector.shape_cast %146 : vector<8x8x48xf32> to vector<64x48xf32>
    %c18 = arith.constant 18 : index
    %c0_153 = arith.constant 0 : index
    %c0_154 = arith.constant 0 : index
    %148 = vector.load %arg4[%c18, %c0_153, %c0_154] : memref<25x48x64xf32, #tpu.memory_space<vmem>>, vector<1x48x64xf32>
    %149 = vector.shape_cast %148 : vector<1x48x64xf32> to vector<48x64xf32>
    %cst_155 = arith.constant dense<0.000000e+00> : vector<64x64xf32>
    %150 = tpu.matmul %147, %149, %cst_155 {dimension_numbers = #tpu.dot_dimension_numbers<[1], [0], [0], [1], [0, 0, 1, 1], [], []>} : vector<64x48xf32>, vector<48x64xf32>, vector<64x64xf32> -> vector<64x64xf32>
    %151 = arith.addf %145, %150 : vector<64x64xf32>
    %c3_156 = arith.constant 3 : index
    %c4_157 = arith.constant 4 : index
    %c0_158 = arith.constant 0 : index
    %152 = vector.load %arg12[%c3_156, %c4_157, %c0_158] : memref<12x12x48xf32, #tpu.memory_space<vmem>>, vector<8x8x48xf32>
    %153 = vector.shape_cast %152 : vector<8x8x48xf32> to vector<64x48xf32>
    %c19 = arith.constant 19 : index
    %c0_159 = arith.constant 0 : index
    %c0_160 = arith.constant 0 : index
    %154 = vector.load %arg4[%c19, %c0_159, %c0_160] : memref<25x48x64xf32, #tpu.memory_space<vmem>>, vector<1x48x64xf32>
    %155 = vector.shape_cast %154 : vector<1x48x64xf32> to vector<48x64xf32>
    %cst_161 = arith.constant dense<0.000000e+00> : vector<64x64xf32>
    %156 = tpu.matmul %153, %155, %cst_161 {dimension_numbers = #tpu.dot_dimension_numbers<[1], [0], [0], [1], [0, 0, 1, 1], [], []>} : vector<64x48xf32>, vector<48x64xf32>, vector<64x64xf32> -> vector<64x64xf32>
    %157 = arith.addf %151, %156 : vector<64x64xf32>
    %c4_162 = arith.constant 4 : index
    %c0_163 = arith.constant 0 : index
    %c0_164 = arith.constant 0 : index
    %158 = vector.load %arg12[%c4_162, %c0_163, %c0_164] : memref<12x12x48xf32, #tpu.memory_space<vmem>>, vector<8x8x48xf32>
    %159 = vector.shape_cast %158 : vector<8x8x48xf32> to vector<64x48xf32>
    %c20 = arith.constant 20 : index
    %c0_165 = arith.constant 0 : index
    %c0_166 = arith.constant 0 : index
    %160 = vector.load %arg4[%c20, %c0_165, %c0_166] : memref<25x48x64xf32, #tpu.memory_space<vmem>>, vector<1x48x64xf32>
    %161 = vector.shape_cast %160 : vector<1x48x64xf32> to vector<48x64xf32>
    %cst_167 = arith.constant dense<0.000000e+00> : vector<64x64xf32>
    %162 = tpu.matmul %159, %161, %cst_167 {dimension_numbers = #tpu.dot_dimension_numbers<[1], [0], [0], [1], [0, 0, 1, 1], [], []>} : vector<64x48xf32>, vector<48x64xf32>, vector<64x64xf32> -> vector<64x64xf32>
    %163 = arith.addf %157, %162 : vector<64x64xf32>
    %c4_168 = arith.constant 4 : index
    %c1_169 = arith.constant 1 : index
    %c0_170 = arith.constant 0 : index
    %164 = vector.load %arg12[%c4_168, %c1_169, %c0_170] : memref<12x12x48xf32, #tpu.memory_space<vmem>>, vector<8x8x48xf32>
    %165 = vector.shape_cast %164 : vector<8x8x48xf32> to vector<64x48xf32>
    %c21 = arith.constant 21 : index
    %c0_171 = arith.constant 0 : index
    %c0_172 = arith.constant 0 : index
    %166 = vector.load %arg4[%c21, %c0_171, %c0_172] : memref<25x48x64xf32, #tpu.memory_space<vmem>>, vector<1x48x64xf32>
    %167 = vector.shape_cast %166 : vector<1x48x64xf32> to vector<48x64xf32>
    %cst_173 = arith.constant dense<0.000000e+00> : vector<64x64xf32>
    %168 = tpu.matmul %165, %167, %cst_173 {dimension_numbers = #tpu.dot_dimension_numbers<[1], [0], [0], [1], [0, 0, 1, 1], [], []>} : vector<64x48xf32>, vector<48x64xf32>, vector<64x64xf32> -> vector<64x64xf32>
    %169 = arith.addf %163, %168 : vector<64x64xf32>
    %c4_174 = arith.constant 4 : index
    %c2_175 = arith.constant 2 : index
    %c0_176 = arith.constant 0 : index
    %170 = vector.load %arg12[%c4_174, %c2_175, %c0_176] : memref<12x12x48xf32, #tpu.memory_space<vmem>>, vector<8x8x48xf32>
    %171 = vector.shape_cast %170 : vector<8x8x48xf32> to vector<64x48xf32>
    %c22 = arith.constant 22 : index
    %c0_177 = arith.constant 0 : index
    %c0_178 = arith.constant 0 : index
    %172 = vector.load %arg4[%c22, %c0_177, %c0_178] : memref<25x48x64xf32, #tpu.memory_space<vmem>>, vector<1x48x64xf32>
    %173 = vector.shape_cast %172 : vector<1x48x64xf32> to vector<48x64xf32>
    %cst_179 = arith.constant dense<0.000000e+00> : vector<64x64xf32>
    %174 = tpu.matmul %171, %173, %cst_179 {dimension_numbers = #tpu.dot_dimension_numbers<[1], [0], [0], [1], [0, 0, 1, 1], [], []>} : vector<64x48xf32>, vector<48x64xf32>, vector<64x64xf32> -> vector<64x64xf32>
    %175 = arith.addf %169, %174 : vector<64x64xf32>
    %c4_180 = arith.constant 4 : index
    %c3_181 = arith.constant 3 : index
    %c0_182 = arith.constant 0 : index
    %176 = vector.load %arg12[%c4_180, %c3_181, %c0_182] : memref<12x12x48xf32, #tpu.memory_space<vmem>>, vector<8x8x48xf32>
    %177 = vector.shape_cast %176 : vector<8x8x48xf32> to vector<64x48xf32>
    %c23 = arith.constant 23 : index
    %c0_183 = arith.constant 0 : index
    %c0_184 = arith.constant 0 : index
    %178 = vector.load %arg4[%c23, %c0_183, %c0_184] : memref<25x48x64xf32, #tpu.memory_space<vmem>>, vector<1x48x64xf32>
    %179 = vector.shape_cast %178 : vector<1x48x64xf32> to vector<48x64xf32>
    %cst_185 = arith.constant dense<0.000000e+00> : vector<64x64xf32>
    %180 = tpu.matmul %177, %179, %cst_185 {dimension_numbers = #tpu.dot_dimension_numbers<[1], [0], [0], [1], [0, 0, 1, 1], [], []>} : vector<64x48xf32>, vector<48x64xf32>, vector<64x64xf32> -> vector<64x64xf32>
    %181 = arith.addf %175, %180 : vector<64x64xf32>
    %c4_186 = arith.constant 4 : index
    %c4_187 = arith.constant 4 : index
    %c0_188 = arith.constant 0 : index
    %182 = vector.load %arg12[%c4_186, %c4_187, %c0_188] : memref<12x12x48xf32, #tpu.memory_space<vmem>>, vector<8x8x48xf32>
    %183 = vector.shape_cast %182 : vector<8x8x48xf32> to vector<64x48xf32>
    %c24 = arith.constant 24 : index
    %c0_189 = arith.constant 0 : index
    %c0_190 = arith.constant 0 : index
    %184 = vector.load %arg4[%c24, %c0_189, %c0_190] : memref<25x48x64xf32, #tpu.memory_space<vmem>>, vector<1x48x64xf32>
    %185 = vector.shape_cast %184 : vector<1x48x64xf32> to vector<48x64xf32>
    %cst_191 = arith.constant dense<0.000000e+00> : vector<64x64xf32>
    %186 = tpu.matmul %183, %185, %cst_191 {dimension_numbers = #tpu.dot_dimension_numbers<[1], [0], [0], [1], [0, 0, 1, 1], [], []>} : vector<64x48xf32>, vector<48x64xf32>, vector<64x64xf32> -> vector<64x64xf32>
    %187 = arith.addf %181, %186 : vector<64x64xf32>
    %c0_192 = arith.constant 0 : index
    %c0_193 = arith.constant 0 : index
    %188 = vector.load %arg5[%c0_192, %c0_193] : memref<2x64xf32, #tpu.memory_space<vmem>>, vector<1x64xf32>
    %189 = vector.broadcast %188 : vector<1x64xf32> to vector<64x64xf32>
    %190 = arith.mulf %187, %189 : vector<64x64xf32>
    %c1_194 = arith.constant 1 : index
    %c0_195 = arith.constant 0 : index
    %191 = vector.load %arg5[%c1_194, %c0_195] : memref<2x64xf32, #tpu.memory_space<vmem>>, vector<1x64xf32>
    %192 = vector.broadcast %191 : vector<1x64xf32> to vector<64x64xf32>
    %193 = arith.addf %190, %192 : vector<64x64xf32>
    %cst_196 = arith.constant 0.000000e+00 : f32
    %194 = vector.broadcast %cst_196 : f32 to vector<64x64xf32>
    %195 = arith.maximumf %193, %194 : vector<64x64xf32>
    %196 = vector.shape_cast %195 : vector<64x64xf32> to vector<8x8x64xf32>
    %c0_197 = arith.constant 0 : index
    %c0_198 = arith.constant 0 : index
    %c0_199 = arith.constant 0 : index
    %c64 = arith.constant 64 : index
    %197 = vector.load %arg11[%c0_197, %c0_198, %c0_199, %c64] : memref<1x8x8x256xf32, #tpu.memory_space<vmem>>, vector<1x8x8x64xf32>
    %198 = vector.shape_cast %197 : vector<1x8x8x64xf32> to vector<8x8x64xf32>
    %199 = vector.shape_cast %196 : vector<8x8x64xf32> to vector<1x8x8x64xf32>
    tpu.vector_store %arg11[%c0_197, %c0_198, %c0_199, %c64], %199 {strides = array<i32>} : memref<1x8x8x256xf32, #tpu.memory_space<vmem>>, vector<1x8x8x64xf32>,
    %cst_200 = arith.constant 0.000000e+00 : f32
    %200 = vector.broadcast %cst_200 : f32 to vector<64x96xf32>
    %c0_201 = arith.constant 0 : index
    %c0_202 = arith.constant 0 : index
    %c0_203 = arith.constant 0 : index
    %201 = vector.load %arg13[%c0_201, %c0_202, %c0_203] : memref<10x10x64xf32, #tpu.memory_space<vmem>>, vector<8x8x64xf32>
    %202 = vector.shape_cast %201 : vector<8x8x64xf32> to vector<64x64xf32>
    %c0_204 = arith.constant 0 : index
    %c0_205 = arith.constant 0 : index
    %c0_206 = arith.constant 0 : index
    %203 = vector.load %arg6[%c0_204, %c0_205, %c0_206] : memref<9x64x96xf32, #tpu.memory_space<vmem>>, vector<1x64x96xf32>
    %204 = vector.shape_cast %203 : vector<1x64x96xf32> to vector<64x96xf32>
    %cst_207 = arith.constant dense<0.000000e+00> : vector<64x96xf32>
    %205 = tpu.matmul %202, %204, %cst_207 {dimension_numbers = #tpu.dot_dimension_numbers<[1], [0], [0], [1], [0, 0, 1, 1], [], []>} : vector<64x64xf32>, vector<64x96xf32>, vector<64x96xf32> -> vector<64x96xf32>
    %206 = arith.addf %200, %205 : vector<64x96xf32>
    %c0_208 = arith.constant 0 : index
    %c1_209 = arith.constant 1 : index
    %c0_210 = arith.constant 0 : index
    %207 = vector.load %arg13[%c0_208, %c1_209, %c0_210] : memref<10x10x64xf32, #tpu.memory_space<vmem>>, vector<8x8x64xf32>
    %208 = vector.shape_cast %207 : vector<8x8x64xf32> to vector<64x64xf32>
    %c1_211 = arith.constant 1 : index
    %c0_212 = arith.constant 0 : index
    %c0_213 = arith.constant 0 : index
    %209 = vector.load %arg6[%c1_211, %c0_212, %c0_213] : memref<9x64x96xf32, #tpu.memory_space<vmem>>, vector<1x64x96xf32>
    %210 = vector.shape_cast %209 : vector<1x64x96xf32> to vector<64x96xf32>
    %cst_214 = arith.constant dense<0.000000e+00> : vector<64x96xf32>
    %211 = tpu.matmul %208, %210, %cst_214 {dimension_numbers = #tpu.dot_dimension_numbers<[1], [0], [0], [1], [0, 0, 1, 1], [], []>} : vector<64x64xf32>, vector<64x96xf32>, vector<64x96xf32> -> vector<64x96xf32>
    %212 = arith.addf %206, %211 : vector<64x96xf32>
    %c0_215 = arith.constant 0 : index
    %c2_216 = arith.constant 2 : index
    %c0_217 = arith.constant 0 : index
    %213 = vector.load %arg13[%c0_215, %c2_216, %c0_217] : memref<10x10x64xf32, #tpu.memory_space<vmem>>, vector<8x8x64xf32>
    %214 = vector.shape_cast %213 : vector<8x8x64xf32> to vector<64x64xf32>
    %c2_218 = arith.constant 2 : index
    %c0_219 = arith.constant 0 : index
    %c0_220 = arith.constant 0 : index
    %215 = vector.load %arg6[%c2_218, %c0_219, %c0_220] : memref<9x64x96xf32, #tpu.memory_space<vmem>>, vector<1x64x96xf32>
    %216 = vector.shape_cast %215 : vector<1x64x96xf32> to vector<64x96xf32>
    %cst_221 = arith.constant dense<0.000000e+00> : vector<64x96xf32>
    %217 = tpu.matmul %214, %216, %cst_221 {dimension_numbers = #tpu.dot_dimension_numbers<[1], [0], [0], [1], [0, 0, 1, 1], [], []>} : vector<64x64xf32>, vector<64x96xf32>, vector<64x96xf32> -> vector<64x96xf32>
    %218 = arith.addf %212, %217 : vector<64x96xf32>
    %c1_222 = arith.constant 1 : index
    %c0_223 = arith.constant 0 : index
    %c0_224 = arith.constant 0 : index
    %219 = vector.load %arg13[%c1_222, %c0_223, %c0_224] : memref<10x10x64xf32, #tpu.memory_space<vmem>>, vector<8x8x64xf32>
    %220 = vector.shape_cast %219 : vector<8x8x64xf32> to vector<64x64xf32>
    %c3_225 = arith.constant 3 : index
    %c0_226 = arith.constant 0 : index
    %c0_227 = arith.constant 0 : index
    %221 = vector.load %arg6[%c3_225, %c0_226, %c0_227] : memref<9x64x96xf32, #tpu.memory_space<vmem>>, vector<1x64x96xf32>
    %222 = vector.shape_cast %221 : vector<1x64x96xf32> to vector<64x96xf32>
    %cst_228 = arith.constant dense<0.000000e+00> : vector<64x96xf32>
    %223 = tpu.matmul %220, %222, %cst_228 {dimension_numbers = #tpu.dot_dimension_numbers<[1], [0], [0], [1], [0, 0, 1, 1], [], []>} : vector<64x64xf32>, vector<64x96xf32>, vector<64x96xf32> -> vector<64x96xf32>
    %224 = arith.addf %218, %223 : vector<64x96xf32>
    %c1_229 = arith.constant 1 : index
    %c1_230 = arith.constant 1 : index
    %c0_231 = arith.constant 0 : index
    %225 = vector.load %arg13[%c1_229, %c1_230, %c0_231] : memref<10x10x64xf32, #tpu.memory_space<vmem>>, vector<8x8x64xf32>
    %226 = vector.shape_cast %225 : vector<8x8x64xf32> to vector<64x64xf32>
    %c4_232 = arith.constant 4 : index
    %c0_233 = arith.constant 0 : index
    %c0_234 = arith.constant 0 : index
    %227 = vector.load %arg6[%c4_232, %c0_233, %c0_234] : memref<9x64x96xf32, #tpu.memory_space<vmem>>, vector<1x64x96xf32>
    %228 = vector.shape_cast %227 : vector<1x64x96xf32> to vector<64x96xf32>
    %cst_235 = arith.constant dense<0.000000e+00> : vector<64x96xf32>
    %229 = tpu.matmul %226, %228, %cst_235 {dimension_numbers = #tpu.dot_dimension_numbers<[1], [0], [0], [1], [0, 0, 1, 1], [], []>} : vector<64x64xf32>, vector<64x96xf32>, vector<64x96xf32> -> vector<64x96xf32>
    %230 = arith.addf %224, %229 : vector<64x96xf32>
    %c1_236 = arith.constant 1 : index
    %c2_237 = arith.constant 2 : index
    %c0_238 = arith.constant 0 : index
    %231 = vector.load %arg13[%c1_236, %c2_237, %c0_238] : memref<10x10x64xf32, #tpu.memory_space<vmem>>, vector<8x8x64xf32>
    %232 = vector.shape_cast %231 : vector<8x8x64xf32> to vector<64x64xf32>
    %c5_239 = arith.constant 5 : index
    %c0_240 = arith.constant 0 : index
    %c0_241 = arith.constant 0 : index
    %233 = vector.load %arg6[%c5_239, %c0_240, %c0_241] : memref<9x64x96xf32, #tpu.memory_space<vmem>>, vector<1x64x96xf32>
    %234 = vector.shape_cast %233 : vector<1x64x96xf32> to vector<64x96xf32>
    %cst_242 = arith.constant dense<0.000000e+00> : vector<64x96xf32>
    %235 = tpu.matmul %232, %234, %cst_242 {dimension_numbers = #tpu.dot_dimension_numbers<[1], [0], [0], [1], [0, 0, 1, 1], [], []>} : vector<64x64xf32>, vector<64x96xf32>, vector<64x96xf32> -> vector<64x96xf32>
    %236 = arith.addf %230, %235 : vector<64x96xf32>
    %c2_243 = arith.constant 2 : index
    %c0_244 = arith.constant 0 : index
    %c0_245 = arith.constant 0 : index
    %237 = vector.load %arg13[%c2_243, %c0_244, %c0_245] : memref<10x10x64xf32, #tpu.memory_space<vmem>>, vector<8x8x64xf32>
    %238 = vector.shape_cast %237 : vector<8x8x64xf32> to vector<64x64xf32>
    %c6_246 = arith.constant 6 : index
    %c0_247 = arith.constant 0 : index
    %c0_248 = arith.constant 0 : index
    %239 = vector.load %arg6[%c6_246, %c0_247, %c0_248] : memref<9x64x96xf32, #tpu.memory_space<vmem>>, vector<1x64x96xf32>
    %240 = vector.shape_cast %239 : vector<1x64x96xf32> to vector<64x96xf32>
    %cst_249 = arith.constant dense<0.000000e+00> : vector<64x96xf32>
    %241 = tpu.matmul %238, %240, %cst_249 {dimension_numbers = #tpu.dot_dimension_numbers<[1], [0], [0], [1], [0, 0, 1, 1], [], []>} : vector<64x64xf32>, vector<64x96xf32>, vector<64x96xf32> -> vector<64x96xf32>
    %242 = arith.addf %236, %241 : vector<64x96xf32>
    %c2_250 = arith.constant 2 : index
    %c1_251 = arith.constant 1 : index
    %c0_252 = arith.constant 0 : index
    %243 = vector.load %arg13[%c2_250, %c1_251, %c0_252] : memref<10x10x64xf32, #tpu.memory_space<vmem>>, vector<8x8x64xf32>
    %244 = vector.shape_cast %243 : vector<8x8x64xf32> to vector<64x64xf32>
    %c7_253 = arith.constant 7 : index
    %c0_254 = arith.constant 0 : index
    %c0_255 = arith.constant 0 : index
    %245 = vector.load %arg6[%c7_253, %c0_254, %c0_255] : memref<9x64x96xf32, #tpu.memory_space<vmem>>, vector<1x64x96xf32>
    %246 = vector.shape_cast %245 : vector<1x64x96xf32> to vector<64x96xf32>
    %cst_256 = arith.constant dense<0.000000e+00> : vector<64x96xf32>
    %247 = tpu.matmul %244, %246, %cst_256 {dimension_numbers = #tpu.dot_dimension_numbers<[1], [0], [0], [1], [0, 0, 1, 1], [], []>} : vector<64x64xf32>, vector<64x96xf32>, vector<64x96xf32> -> vector<64x96xf32>
    %248 = arith.addf %242, %247 : vector<64x96xf32>
    %c2_257 = arith.constant 2 : index
    %c2_258 = arith.constant 2 : index
    %c0_259 = arith.constant 0 : index
    %249 = vector.load %arg13[%c2_257, %c2_258, %c0_259] : memref<10x10x64xf32, #tpu.memory_space<vmem>>, vector<8x8x64xf32>
    %250 = vector.shape_cast %249 : vector<8x8x64xf32> to vector<64x64xf32>
    %c8_260 = arith.constant 8 : index
    %c0_261 = arith.constant 0 : index
    %c0_262 = arith.constant 0 : index
    %251 = vector.load %arg6[%c8_260, %c0_261, %c0_262] : memref<9x64x96xf32, #tpu.memory_space<vmem>>, vector<1x64x96xf32>
    %252 = vector.shape_cast %251 : vector<1x64x96xf32> to vector<64x96xf32>
    %cst_263 = arith.constant dense<0.000000e+00> : vector<64x96xf32>
    %253 = tpu.matmul %250, %252, %cst_263 {dimension_numbers = #tpu.dot_dimension_numbers<[1], [0], [0], [1], [0, 0, 1, 1], [], []>} : vector<64x64xf32>, vector<64x96xf32>, vector<64x96xf32> -> vector<64x96xf32>
    %254 = arith.addf %248, %253 : vector<64x96xf32>
    %c0_264 = arith.constant 0 : index
    %c0_265 = arith.constant 0 : index
    %255 = vector.load %arg7[%c0_264, %c0_265] : memref<2x96xf32, #tpu.memory_space<vmem>>, vector<1x96xf32>
    %256 = vector.broadcast %255 : vector<1x96xf32> to vector<64x96xf32>
    %257 = arith.mulf %254, %256 : vector<64x96xf32>
    %c1_266 = arith.constant 1 : index
    %c0_267 = arith.constant 0 : index
    %258 = vector.load %arg7[%c1_266, %c0_267] : memref<2x96xf32, #tpu.memory_space<vmem>>, vector<1x96xf32>
    %259 = vector.broadcast %258 : vector<1x96xf32> to vector<64x96xf32>
    %260 = arith.addf %257, %259 : vector<64x96xf32>
    %cst_268 = arith.constant 0.000000e+00 : f32
    %261 = vector.broadcast %cst_268 : f32 to vector<64x96xf32>
    %262 = arith.maximumf %260, %261 : vector<64x96xf32>
    %263 = vector.shape_cast %262 : vector<64x96xf32> to vector<8x8x96xf32>
    %c1_269 = arith.constant 1 : index
    %c1_270 = arith.constant 1 : index
    %c0_271 = arith.constant 0 : index
    %264 = vector.load %arg14[%c1_269, %c1_270, %c0_271] : memref<10x10x96xf32, #tpu.memory_space<vmem>>, vector<8x8x96xf32>
    tpu.vector_store %arg14[%c1_269, %c1_270, %c0_271], %263 {strides = array<i32>} : memref<10x10x96xf32, #tpu.memory_space<vmem>>, vector<8x8x96xf32>,
    %cst_272 = arith.constant 0.000000e+00 : f32
    %265 = vector.broadcast %cst_272 : f32 to vector<64x96xf32>
    %c0_273 = arith.constant 0 : index
    %c0_274 = arith.constant 0 : index
    %c0_275 = arith.constant 0 : index
    %266 = vector.load %arg14[%c0_273, %c0_274, %c0_275] : memref<10x10x96xf32, #tpu.memory_space<vmem>>, vector<8x8x96xf32>
    %267 = vector.shape_cast %266 : vector<8x8x96xf32> to vector<64x96xf32>
    %c0_276 = arith.constant 0 : index
    %c0_277 = arith.constant 0 : index
    %c0_278 = arith.constant 0 : index
    %268 = vector.load %arg8[%c0_276, %c0_277, %c0_278] : memref<9x96x96xf32, #tpu.memory_space<vmem>>, vector<1x96x96xf32>
    %269 = vector.shape_cast %268 : vector<1x96x96xf32> to vector<96x96xf32>
    %cst_279 = arith.constant dense<0.000000e+00> : vector<64x96xf32>
    %270 = tpu.matmul %267, %269, %cst_279 {dimension_numbers = #tpu.dot_dimension_numbers<[1], [0], [0], [1], [0, 0, 1, 1], [], []>} : vector<64x96xf32>, vector<96x96xf32>, vector<64x96xf32> -> vector<64x96xf32>
    %271 = arith.addf %265, %270 : vector<64x96xf32>
    %c0_280 = arith.constant 0 : index
    %c1_281 = arith.constant 1 : index
    %c0_282 = arith.constant 0 : index
    %272 = vector.load %arg14[%c0_280, %c1_281, %c0_282] : memref<10x10x96xf32, #tpu.memory_space<vmem>>, vector<8x8x96xf32>
    %273 = vector.shape_cast %272 : vector<8x8x96xf32> to vector<64x96xf32>
    %c1_283 = arith.constant 1 : index
    %c0_284 = arith.constant 0 : index
    %c0_285 = arith.constant 0 : index
    %274 = vector.load %arg8[%c1_283, %c0_284, %c0_285] : memref<9x96x96xf32, #tpu.memory_space<vmem>>, vector<1x96x96xf32>
    %275 = vector.shape_cast %274 : vector<1x96x96xf32> to vector<96x96xf32>
    %cst_286 = arith.constant dense<0.000000e+00> : vector<64x96xf32>
    %276 = tpu.matmul %273, %275, %cst_286 {dimension_numbers = #tpu.dot_dimension_numbers<[1], [0], [0], [1], [0, 0, 1, 1], [], []>} : vector<64x96xf32>, vector<96x96xf32>, vector<64x96xf32> -> vector<64x96xf32>
    %277 = arith.addf %271, %276 : vector<64x96xf32>
    %c0_287 = arith.constant 0 : index
    %c2_288 = arith.constant 2 : index
    %c0_289 = arith.constant 0 : index
    %278 = vector.load %arg14[%c0_287, %c2_288, %c0_289] : memref<10x10x96xf32, #tpu.memory_space<vmem>>, vector<8x8x96xf32>
    %279 = vector.shape_cast %278 : vector<8x8x96xf32> to vector<64x96xf32>
    %c2_290 = arith.constant 2 : index
    %c0_291 = arith.constant 0 : index
    %c0_292 = arith.constant 0 : index
    %280 = vector.load %arg8[%c2_290, %c0_291, %c0_292] : memref<9x96x96xf32, #tpu.memory_space<vmem>>, vector<1x96x96xf32>
    %281 = vector.shape_cast %280 : vector<1x96x96xf32> to vector<96x96xf32>
    %cst_293 = arith.constant dense<0.000000e+00> : vector<64x96xf32>
    %282 = tpu.matmul %279, %281, %cst_293 {dimension_numbers = #tpu.dot_dimension_numbers<[1], [0], [0], [1], [0, 0, 1, 1], [], []>} : vector<64x96xf32>, vector<96x96xf32>, vector<64x96xf32> -> vector<64x96xf32>
    %283 = arith.addf %277, %282 : vector<64x96xf32>
    %c1_294 = arith.constant 1 : index
    %c0_295 = arith.constant 0 : index
    %c0_296 = arith.constant 0 : index
    %284 = vector.load %arg14[%c1_294, %c0_295, %c0_296] : memref<10x10x96xf32, #tpu.memory_space<vmem>>, vector<8x8x96xf32>
    %285 = vector.shape_cast %284 : vector<8x8x96xf32> to vector<64x96xf32>
    %c3_297 = arith.constant 3 : index
    %c0_298 = arith.constant 0 : index
    %c0_299 = arith.constant 0 : index
    %286 = vector.load %arg8[%c3_297, %c0_298, %c0_299] : memref<9x96x96xf32, #tpu.memory_space<vmem>>, vector<1x96x96xf32>
    %287 = vector.shape_cast %286 : vector<1x96x96xf32> to vector<96x96xf32>
    %cst_300 = arith.constant dense<0.000000e+00> : vector<64x96xf32>
    %288 = tpu.matmul %285, %287, %cst_300 {dimension_numbers = #tpu.dot_dimension_numbers<[1], [0], [0], [1], [0, 0, 1, 1], [], []>} : vector<64x96xf32>, vector<96x96xf32>, vector<64x96xf32> -> vector<64x96xf32>
    %289 = arith.addf %283, %288 : vector<64x96xf32>
    %c1_301 = arith.constant 1 : index
    %c1_302 = arith.constant 1 : index
    %c0_303 = arith.constant 0 : index
    %290 = vector.load %arg14[%c1_301, %c1_302, %c0_303] : memref<10x10x96xf32, #tpu.memory_space<vmem>>, vector<8x8x96xf32>
    %291 = vector.shape_cast %290 : vector<8x8x96xf32> to vector<64x96xf32>
    %c4_304 = arith.constant 4 : index
    %c0_305 = arith.constant 0 : index
    %c0_306 = arith.constant 0 : index
    %292 = vector.load %arg8[%c4_304, %c0_305, %c0_306] : memref<9x96x96xf32, #tpu.memory_space<vmem>>, vector<1x96x96xf32>
    %293 = vector.shape_cast %292 : vector<1x96x96xf32> to vector<96x96xf32>
    %cst_307 = arith.constant dense<0.000000e+00> : vector<64x96xf32>
    %294 = tpu.matmul %291, %293, %cst_307 {dimension_numbers = #tpu.dot_dimension_numbers<[1], [0], [0], [1], [0, 0, 1, 1], [], []>} : vector<64x96xf32>, vector<96x96xf32>, vector<64x96xf32> -> vector<64x96xf32>
    %295 = arith.addf %289, %294 : vector<64x96xf32>
    %c1_308 = arith.constant 1 : index
    %c2_309 = arith.constant 2 : index
    %c0_310 = arith.constant 0 : index
    %296 = vector.load %arg14[%c1_308, %c2_309, %c0_310] : memref<10x10x96xf32, #tpu.memory_space<vmem>>, vector<8x8x96xf32>
    %297 = vector.shape_cast %296 : vector<8x8x96xf32> to vector<64x96xf32>
    %c5_311 = arith.constant 5 : index
    %c0_312 = arith.constant 0 : index
    %c0_313 = arith.constant 0 : index
    %298 = vector.load %arg8[%c5_311, %c0_312, %c0_313] : memref<9x96x96xf32, #tpu.memory_space<vmem>>, vector<1x96x96xf32>
    %299 = vector.shape_cast %298 : vector<1x96x96xf32> to vector<96x96xf32>
    %cst_314 = arith.constant dense<0.000000e+00> : vector<64x96xf32>
    %300 = tpu.matmul %297, %299, %cst_314 {dimension_numbers = #tpu.dot_dimension_numbers<[1], [0], [0], [1], [0, 0, 1, 1], [], []>} : vector<64x96xf32>, vector<96x96xf32>, vector<64x96xf32> -> vector<64x96xf32>
    %301 = arith.addf %295, %300 : vector<64x96xf32>
    %c2_315 = arith.constant 2 : index
    %c0_316 = arith.constant 0 : index
    %c0_317 = arith.constant 0 : index
    %302 = vector.load %arg14[%c2_315, %c0_316, %c0_317] : memref<10x10x96xf32, #tpu.memory_space<vmem>>, vector<8x8x96xf32>
    %303 = vector.shape_cast %302 : vector<8x8x96xf32> to vector<64x96xf32>
    %c6_318 = arith.constant 6 : index
    %c0_319 = arith.constant 0 : index
    %c0_320 = arith.constant 0 : index
    %304 = vector.load %arg8[%c6_318, %c0_319, %c0_320] : memref<9x96x96xf32, #tpu.memory_space<vmem>>, vector<1x96x96xf32>
    %305 = vector.shape_cast %304 : vector<1x96x96xf32> to vector<96x96xf32>
    %cst_321 = arith.constant dense<0.000000e+00> : vector<64x96xf32>
    %306 = tpu.matmul %303, %305, %cst_321 {dimension_numbers = #tpu.dot_dimension_numbers<[1], [0], [0], [1], [0, 0, 1, 1], [], []>} : vector<64x96xf32>, vector<96x96xf32>, vector<64x96xf32> -> vector<64x96xf32>
    %307 = arith.addf %301, %306 : vector<64x96xf32>
    %c2_322 = arith.constant 2 : index
    %c1_323 = arith.constant 1 : index
    %c0_324 = arith.constant 0 : index
    %308 = vector.load %arg14[%c2_322, %c1_323, %c0_324] : memref<10x10x96xf32, #tpu.memory_space<vmem>>, vector<8x8x96xf32>
    %309 = vector.shape_cast %308 : vector<8x8x96xf32> to vector<64x96xf32>
    %c7_325 = arith.constant 7 : index
    %c0_326 = arith.constant 0 : index
    %c0_327 = arith.constant 0 : index
    %310 = vector.load %arg8[%c7_325, %c0_326, %c0_327] : memref<9x96x96xf32, #tpu.memory_space<vmem>>, vector<1x96x96xf32>
    %311 = vector.shape_cast %310 : vector<1x96x96xf32> to vector<96x96xf32>
    %cst_328 = arith.constant dense<0.000000e+00> : vector<64x96xf32>
    %312 = tpu.matmul %309, %311, %cst_328 {dimension_numbers = #tpu.dot_dimension_numbers<[1], [0], [0], [1], [0, 0, 1, 1], [], []>} : vector<64x96xf32>, vector<96x96xf32>, vector<64x96xf32> -> vector<64x96xf32>
    %313 = arith.addf %307, %312 : vector<64x96xf32>
    %c2_329 = arith.constant 2 : index
    %c2_330 = arith.constant 2 : index
    %c0_331 = arith.constant 0 : index
    %314 = vector.load %arg14[%c2_329, %c2_330, %c0_331] : memref<10x10x96xf32, #tpu.memory_space<vmem>>, vector<8x8x96xf32>
    %315 = vector.shape_cast %314 : vector<8x8x96xf32> to vector<64x96xf32>
    %c8_332 = arith.constant 8 : index
    %c0_333 = arith.constant 0 : index
    %c0_334 = arith.constant 0 : index
    %316 = vector.load %arg8[%c8_332, %c0_333, %c0_334] : memref<9x96x96xf32, #tpu.memory_space<vmem>>, vector<1x96x96xf32>
    %317 = vector.shape_cast %316 : vector<1x96x96xf32> to vector<96x96xf32>
    %cst_335 = arith.constant dense<0.000000e+00> : vector<64x96xf32>
    %318 = tpu.matmul %315, %317, %cst_335 {dimension_numbers = #tpu.dot_dimension_numbers<[1], [0], [0], [1], [0, 0, 1, 1], [], []>} : vector<64x96xf32>, vector<96x96xf32>, vector<64x96xf32> -> vector<64x96xf32>
    %319 = arith.addf %313, %318 : vector<64x96xf32>
    %c0_336 = arith.constant 0 : index
    %c0_337 = arith.constant 0 : index
    %320 = vector.load %arg9[%c0_336, %c0_337] : memref<2x96xf32, #tpu.memory_space<vmem>>, vector<1x96xf32>
    %321 = vector.broadcast %320 : vector<1x96xf32> to vector<64x96xf32>
    %322 = arith.mulf %319, %321 : vector<64x96xf32>
    %c1_338 = arith.constant 1 : index
    %c0_339 = arith.constant 0 : index
    %323 = vector.load %arg9[%c1_338, %c0_339] : memref<2x96xf32, #tpu.memory_space<vmem>>, vector<1x96xf32>
    %324 = vector.broadcast %323 : vector<1x96xf32> to vector<64x96xf32>
    %325 = arith.addf %322, %324 : vector<64x96xf32>
    %cst_340 = arith.constant 0.000000e+00 : f32
    %326 = vector.broadcast %cst_340 : f32 to vector<64x96xf32>
    %327 = arith.maximumf %325, %326 : vector<64x96xf32>
    %328 = vector.shape_cast %327 : vector<64x96xf32> to vector<8x8x96xf32>
    %c0_341 = arith.constant 0 : index
    %c0_342 = arith.constant 0 : index
    %c0_343 = arith.constant 0 : index
    %c128 = arith.constant 128 : index
    %329 = vector.load %arg11[%c0_341, %c0_342, %c0_343, %c128] : memref<1x8x8x256xf32, #tpu.memory_space<vmem>>, vector<1x8x8x96xf32>
    %330 = vector.shape_cast %329 : vector<1x8x8x96xf32> to vector<8x8x96xf32>
    %331 = vector.shape_cast %328 : vector<8x8x96xf32> to vector<1x8x8x96xf32>
    tpu.vector_store %arg11[%c0_341, %c0_342, %c0_343, %c128], %331 {strides = array<i32>} : memref<1x8x8x256xf32, #tpu.memory_space<vmem>>, vector<1x8x8x96xf32>,
    %cst_344 = arith.constant 0.000000e+00 : f32
    %332 = vector.broadcast %cst_344 : f32 to vector<8x8x32xf32>
    %c0_345 = arith.constant 0 : index
    %c0_346 = arith.constant 0 : index
    %c0_347 = arith.constant 0 : index
    %333 = vector.load %arg15[%c0_345, %c0_346, %c0_347] : memref<10x10x32xf32, #tpu.memory_space<vmem>>, vector<8x8x32xf32>
    %334 = arith.addf %332, %333 : vector<8x8x32xf32>
    %c0_348 = arith.constant 0 : index
    %c1_349 = arith.constant 1 : index
    %c0_350 = arith.constant 0 : index
    %335 = vector.load %arg15[%c0_348, %c1_349, %c0_350] : memref<10x10x32xf32, #tpu.memory_space<vmem>>, vector<8x8x32xf32>
    %336 = arith.addf %334, %335 : vector<8x8x32xf32>
    %c0_351 = arith.constant 0 : index
    %c2_352 = arith.constant 2 : index
    %c0_353 = arith.constant 0 : index
    %337 = vector.load %arg15[%c0_351, %c2_352, %c0_353] : memref<10x10x32xf32, #tpu.memory_space<vmem>>, vector<8x8x32xf32>
    %338 = arith.addf %336, %337 : vector<8x8x32xf32>
    %c1_354 = arith.constant 1 : index
    %c0_355 = arith.constant 0 : index
    %c0_356 = arith.constant 0 : index
    %339 = vector.load %arg15[%c1_354, %c0_355, %c0_356] : memref<10x10x32xf32, #tpu.memory_space<vmem>>, vector<8x8x32xf32>
    %340 = arith.addf %338, %339 : vector<8x8x32xf32>
    %c1_357 = arith.constant 1 : index
    %c1_358 = arith.constant 1 : index
    %c0_359 = arith.constant 0 : index
    %341 = vector.load %arg15[%c1_357, %c1_358, %c0_359] : memref<10x10x32xf32, #tpu.memory_space<vmem>>, vector<8x8x32xf32>
    %342 = arith.addf %340, %341 : vector<8x8x32xf32>
    %c1_360 = arith.constant 1 : index
    %c2_361 = arith.constant 2 : index
    %c0_362 = arith.constant 0 : index
    %343 = vector.load %arg15[%c1_360, %c2_361, %c0_362] : memref<10x10x32xf32, #tpu.memory_space<vmem>>, vector<8x8x32xf32>
    %344 = arith.addf %342, %343 : vector<8x8x32xf32>
    %c2_363 = arith.constant 2 : index
    %c0_364 = arith.constant 0 : index
    %c0_365 = arith.constant 0 : index
    %345 = vector.load %arg15[%c2_363, %c0_364, %c0_365] : memref<10x10x32xf32, #tpu.memory_space<vmem>>, vector<8x8x32xf32>
    %346 = arith.addf %344, %345 : vector<8x8x32xf32>
    %c2_366 = arith.constant 2 : index
    %c1_367 = arith.constant 1 : index
    %c0_368 = arith.constant 0 : index
    %347 = vector.load %arg15[%c2_366, %c1_367, %c0_368] : memref<10x10x32xf32, #tpu.memory_space<vmem>>, vector<8x8x32xf32>
    %348 = arith.addf %346, %347 : vector<8x8x32xf32>
    %c2_369 = arith.constant 2 : index
    %c2_370 = arith.constant 2 : index
    %c0_371 = arith.constant 0 : index
    %349 = vector.load %arg15[%c2_369, %c2_370, %c0_371] : memref<10x10x32xf32, #tpu.memory_space<vmem>>, vector<8x8x32xf32>
    %350 = arith.addf %348, %349 : vector<8x8x32xf32>
    %351 = tpu.iota {dimensions = array<i32: 0>} : vector<8x8x32xi32>
    %c0_i32 = arith.constant 0 : i32
    %352 = vector.broadcast %c0_i32 : i32 to vector<8x8x32xi32>
    %353 = arith.addi %351, %352 : vector<8x8x32xi32>
    %354 = tpu.iota {dimensions = array<i32: 1>} : vector<8x8x32xi32>
    %c1_i32 = arith.constant 1 : i32
    %355 = vector.broadcast %c1_i32 : i32 to vector<8x8x32xi32>
    %356 = arith.minsi %353, %355 : vector<8x8x32xi32>
    %c1_i32_372 = arith.constant 1 : i32
    %357 = vector.broadcast %c1_i32_372 : i32 to vector<8x8x32xi32>
    %358 = arith.addi %356, %357 : vector<8x8x32xi32>
    %c7_i32 = arith.constant 7 : i32
    %359 = vector.broadcast %c7_i32 : i32 to vector<8x8x32xi32>
    %360 = arith.subi %359, %353 : vector<8x8x32xi32>
    %c1_i32_373 = arith.constant 1 : i32
    %361 = vector.broadcast %c1_i32_373 : i32 to vector<8x8x32xi32>
    %362 = arith.minsi %360, %361 : vector<8x8x32xi32>
    %363 = arith.addi %358, %362 : vector<8x8x32xi32>
    %c1_i32_374 = arith.constant 1 : i32
    %364 = vector.broadcast %c1_i32_374 : i32 to vector<8x8x32xi32>
    %365 = arith.minsi %354, %364 : vector<8x8x32xi32>
    %c1_i32_375 = arith.constant 1 : i32
    %366 = vector.broadcast %c1_i32_375 : i32 to vector<8x8x32xi32>
    %367 = arith.addi %365, %366 : vector<8x8x32xi32>
    %c7_i32_376 = arith.constant 7 : i32
    %368 = vector.broadcast %c7_i32_376 : i32 to vector<8x8x32xi32>
    %369 = arith.subi %368, %354 : vector<8x8x32xi32>
    %c1_i32_377 = arith.constant 1 : i32
    %370 = vector.broadcast %c1_i32_377 : i32 to vector<8x8x32xi32>
    %371 = arith.minsi %369, %370 : vector<8x8x32xi32>
    %372 = arith.addi %367, %371 : vector<8x8x32xi32>
    %373 = arith.muli %363, %372 : vector<8x8x32xi32>
    %374 = arith.sitofp %373 : vector<8x8x32xi32> to vector<8x8x32xf32>
    %375 = arith.divf %350, %374 : vector<8x8x32xf32>
    %376 = vector.shape_cast %375 : vector<8x8x32xf32> to vector<64x32xf32>
    %c0_378 = arith.constant 0 : index
    %c0_379 = arith.constant 0 : index
    %377 = vector.load %arg10[%c0_378, %c0_379] : memref<2x32xf32, #tpu.memory_space<vmem>>, vector<1x32xf32>
    %378 = vector.broadcast %377 : vector<1x32xf32> to vector<64x32xf32>
    %379 = arith.mulf %376, %378 : vector<64x32xf32>
    %c1_380 = arith.constant 1 : index
    %c0_381 = arith.constant 0 : index
    %380 = vector.load %arg10[%c1_380, %c0_381] : memref<2x32xf32, #tpu.memory_space<vmem>>, vector<1x32xf32>
    %381 = vector.broadcast %380 : vector<1x32xf32> to vector<64x32xf32>
    %382 = arith.addf %379, %381 : vector<64x32xf32>
    %cst_382 = arith.constant 0.000000e+00 : f32
    %383 = vector.broadcast %cst_382 : f32 to vector<64x32xf32>
    %384 = arith.maximumf %382, %383 : vector<64x32xf32>
    %385 = vector.shape_cast %384 : vector<64x32xf32> to vector<8x8x32xf32>
    %c0_383 = arith.constant 0 : index
    %c0_384 = arith.constant 0 : index
    %c0_385 = arith.constant 0 : index
    %c224 = arith.constant 224 : index
    %386 = vector.load %arg11[%c0_383, %c0_384, %c0_385, %c224] : memref<1x8x8x256xf32, #tpu.memory_space<vmem>>, vector<1x8x8x32xf32>
    %387 = vector.shape_cast %386 : vector<1x8x8x32xf32> to vector<8x8x32xf32>
    %388 = vector.shape_cast %385 : vector<8x8x32xf32> to vector<1x8x8x32xf32>
    tpu.vector_store %arg11[%c0_383, %c0_384, %c0_385, %c224], %388 {strides = array<i32>} : memref<1x8x8x256xf32, #tpu.memory_space<vmem>>, vector<1x8x8x32xf32>,
    return
  }
  func.func @transform_0(%arg0: i32) -> (i32, i32, i32, i32) {
    %c0_i32 = arith.constant 0 : i32
    %c0_i32_0 = arith.constant 0 : i32
    %c0_i32_1 = arith.constant 0 : i32
    %c0_i32_2 = arith.constant 0 : i32
    return %arg0, %c0_i32, %c0_i32_0, %c0_i32_1 : i32, i32, i32, i32
  }
  func.func @transform_1(%arg0: i32) -> (i32, i32, i32) {
    %c0_i32 = arith.constant 0 : i32
    %c0_i32_0 = arith.constant 0 : i32
    %c0_i32_1 = arith.constant 0 : i32
    %c0_i32_2 = arith.constant 0 : i32
    return %c0_i32, %c0_i32_0, %c0_i32_1 : i32, i32, i32
  }
  func.func @transform_2(%arg0: i32) -> (i32, i32) {
    %c0_i32 = arith.constant 0 : i32
    %c0_i32_0 = arith.constant 0 : i32
    %c0_i32_1 = arith.constant 0 : i32
    return %c0_i32, %c0_i32_0 : i32, i32
  }
  func.func @transform_3(%arg0: i32) -> (i32, i32, i32) {
    %c0_i32 = arith.constant 0 : i32
    %c0_i32_0 = arith.constant 0 : i32
    %c0_i32_1 = arith.constant 0 : i32
    %c0_i32_2 = arith.constant 0 : i32
    return %c0_i32, %c0_i32_0, %c0_i32_1 : i32, i32, i32
  }
  func.func @transform_4(%arg0: i32) -> (i32, i32) {
    %c0_i32 = arith.constant 0 : i32
    %c0_i32_0 = arith.constant 0 : i32
    %c0_i32_1 = arith.constant 0 : i32
    return %c0_i32, %c0_i32_0 : i32, i32
  }
  func.func @transform_5(%arg0: i32) -> (i32, i32, i32) {
    %c0_i32 = arith.constant 0 : i32
    %c0_i32_0 = arith.constant 0 : i32
    %c0_i32_1 = arith.constant 0 : i32
    %c0_i32_2 = arith.constant 0 : i32
    return %c0_i32, %c0_i32_0, %c0_i32_1 : i32, i32, i32
  }
  func.func @transform_6(%arg0: i32) -> (i32, i32) {
    %c0_i32 = arith.constant 0 : i32
    %c0_i32_0 = arith.constant 0 : i32
    %c0_i32_1 = arith.constant 0 : i32
    return %c0_i32, %c0_i32_0 : i32, i32
  }
  func.func @transform_7(%arg0: i32) -> (i32, i32, i32) {
    %c0_i32 = arith.constant 0 : i32
    %c0_i32_0 = arith.constant 0 : i32
    %c0_i32_1 = arith.constant 0 : i32
    %c0_i32_2 = arith.constant 0 : i32
    return %c0_i32, %c0_i32_0, %c0_i32_1 : i32, i32, i32
  }
  func.func @transform_8(%arg0: i32) -> (i32, i32) {
    %c0_i32 = arith.constant 0 : i32
    %c0_i32_0 = arith.constant 0 : i32
    %c0_i32_1 = arith.constant 0 : i32
    return %c0_i32, %c0_i32_0 : i32, i32
  }
  func.func @transform_9(%arg0: i32) -> (i32, i32) {
    %c0_i32 = arith.constant 0 : i32
    %c0_i32_0 = arith.constant 0 : i32
    %c0_i32_1 = arith.constant 0 : i32
    return %c0_i32, %c0_i32_0 : i32, i32
  }
  func.func @transform_10(%arg0: i32) -> (i32, i32, i32, i32) {
    %c0_i32 = arith.constant 0 : i32
    %c0_i32_0 = arith.constant 0 : i32
    %c0_i32_1 = arith.constant 0 : i32
    %c0_i32_2 = arith.constant 0 : i32
    return %arg0, %c0_i32, %c0_i32_0, %c0_i32_1 : i32, i32, i32, i32
  }
}

</mosaic_0001>

<bundles_post_ra>
// kernel: inception_a.1
= control target key start
LH: loop header
LB: loop body
LE: loop exit
PB: predicated region body
PF: predicated region fallthrough
CT: control target
= control target key end

     0   :  { %15 = vsyncpa [#allocation7], 0  ;;  %s13816_s0 = inlined_call_operand.vmem [shape: f32[2,8,8,8], index: 0, kind: input, shape index: {}]   ;;  %s13817_s1 = inlined_call_operand.vmem [shape: f32[1,8,208], index: 1, kind: input, shape index: {}]   ;;  %s13818_s2 = inlined_call_operand.vmem [shape: f32[2,176], index: 2, kind: input, shape index: {}]   ;;  %s13819_s3 = inlined_call_operand.vmem [shape: f32[25,48,64], index: 3, kind: input, shape index: {}]   ;;  %s13820_s4 = inlined_call_operand.vmem [shape: f32[2,64], index: 4, kind: input, shape index: {}]   ;;  %s13821_s5 = inlined_call_operand.vmem [shape: f32[9,64,96], index: 5, kind: input, shape index: {}]   ;;  %s13822_s6 = inlined_call_operand.vmem [shape: f32[2,96], index: 6, kind: input, shape index: {}]   ;;  %s13823_s7 = inlined_call_operand.vmem [shape: f32[9,96,96], index: 7, kind: input, shape index: {}]   ;;  %s13824_s8 = inlined_call_operand.vmem [shape: f32[2,96], index: 8, kind: input, shape index: {}]   ;;  %s13825_s9 = inlined_call_operand.vmem [shape: f32[2,32], index: 9, kind: input, shape index: {}]   ;;  %s13826_s10 = inlined_call_operand.hbm [shape: f32[2,8,8,256], index: 10, kind: output, shape index: {}]  }
   0x1   :  { %17 = vsyncpa [#allocation7 + $0x1], 0  ;;  %s10573_s13 = smov 0   ;;  %s10575_s14 = smov 0  }
   0x2   :  { %s10577_s15 = smov 0   ;;  %s10579_s16 = smov 0  }
   0x3 LB: > { %s10594_s17 = sadd.s32 4294967295, %s10509_s16   ;;  %s7868_s18 = sadd.s32 4294967294, %s10509_s16   ;;  %s10509_s16 = sphi %s10579_s16, %s13967_s16   ;;  %s10505_s15 = sphi %s10577_s15, %s13966_s15   ;;  %s10501_s14 = sphi %s10575_s14, %s13965_s14   ;;  %s10497_s13 = sphi %s10573_s13, %s13964_s13  }
   0x4   : > { %s10598_s19 = sadd.s32 1, %s10509_s16   ;;  %s245_s20 = sadd.s32 1, %s10505_s15 }
   0x5   : > { %s242_s21 = ssub.s32 %s10509_s16, %s10598_s19  ;;  %p255_p0 = scmp.ne.s32.totalorder %s10505_s15, %s10501_s14 }
   0x6   : > { %p243_p1 = scmp.eq.s32.totalorder %s242_s21, 0  ;;  %p256_p2 = scmp.eq.s32.totalorder %s10594_s17, 1 }
   0x7   : > { %p261_p3 = scmp.ne.s32.totalorder %s10501_s14, %s10497_s13  ;;  %p262_p4 = scmp.eq.s32.totalorder %s7868_s18, 1 }
   0x8   : > { %s10609_s22 = scalar_select %p243_p1, %s10505_s15, %s245_s20  }
   0x9   : > { %p10611_p5 = por %p256_p2, %p255_p0  ;;  %p10615_p6 = por %p262_p4, %p261_p3 }
   0xa   : > { %p7871_p7 = scmp.ge.s32.totalorder %s10509_s16, 1  ;;  %p315_p8 = scmp.lt.s32.totalorder %s10509_s16, 3 }
   0xc   : > { %p316_p9 = pnand %p7871_p7, %p315_p8 }
   0xe   : > { %319 = sbr.rel (%p316_p9) target bundleno = 1260 (0x4ec), region = 60 }
  0x13   : > { %v459_v0 = vld [vmem:[%s13817_s1 + $0x8] sm:$0xff]  ;;  %v458_v1 = vld [vmem:[%s13817_s1] sm:$0xff]  ;;  %p353_p10 = scmp.lt.s32.totalorder %s10594_s17, 1  ;;  %v13828_v2 = vmov 0.0   ;;  %vm460_vm0 = vcmask 64512   ;;  %vm384_vm1 = vcmask 523264   ;;  %v600_v17 = vlaneseq }
  0x14   : > { %515 = vmatprep.subr.mxu0 %v459_v0  ;;  %549 = vmatprep.mubr.f32.mxu0 %v13828_v2  ;;  %388 = vst.msk [vmem:[#allocation3 + $0x10] sm:$0xff] %vm384_vm1, %v13828_v2  ;;  %385 = vst.msk [vmem:[#allocation3] sm:$0xff] %vm384_vm1, %v13828_v2  ;;  %v7889_v11 = vld [vmem:[%s13819_s3 + $0x58] sm:$0xff]  ;;  %v7911_v12 = vld [vmem:[%s13819_s3 + $0x88] sm:$0xff]  ;;  %vm358_vm2 = vcmask 392192   ;;  %vm360_vm3 = vcmask 388096  }
  0x15   : > { %516 = vmatpush1.msra.mxu0 %v458_v1  ;;  %s354_s29 = scalar_select %p353_p10, %s10594_s17, 1  ;;  %10397 = vmatprep.subr.mxu1 %v459_v0  ;;  %390 = vst.msk [vmem:[#allocation3 + $0x20] sm:$0xff] %vm384_vm1, %v13828_v2  ;;  %392 = vst.msk [vmem:[#allocation3 + $0x30] sm:$0xff] %vm384_vm1, %v13828_v2  ;;  %v7888_v13 = vld [vmem:[%s13819_s3 + $0x50] sm:$0xff]  ;;  %v7910_v14 = vld [vmem:[%s13819_s3 + $0x80] sm:$0xff]  ;;  %v10734_v18 = vshrl.u32 %v600_v17, 7 }
  0x16   : > { %10398 = vmatpush1.msra.mxu1 %v458_v1  ;;  %579 = vmatprep.mubr.f32.mxu1 %v13828_v2  ;;  %394 = vst.msk [vmem:[#allocation3 + $0x40] sm:$0xff] %vm384_vm1, %v13828_v2  ;;  %396 = vst.msk [vmem:[#allocation3 + $0x50] sm:$0xff] %vm384_vm1, %v13828_v2  ;;  %v7887_v15 = vld [vmem:[%s13819_s3 + $0x48] sm:$0xff]  ;;  %v7909_v16 = vld [vmem:[%s13819_s3 + $0x78] sm:$0xff]  ;;  %s10512_s21 = smov 64   ;;  %vm386_vm4 = vcmask 517120  }
  0x17   : > { %s8545_s30 = sshll.u32 %s354_s29, 6  ;;  %398 = vst.msk [vmem:[#allocation3 + $0x60] sm:$0xff] %vm384_vm1, %v13828_v2  ;;  %400 = vst.msk [vmem:[#allocation3 + $0x70] sm:$0xff] %vm384_vm1, %v13828_v2  ;;  %9221 = vmatprep.subr.mxu1 %v7889_v11  ;;  %9269 = vmatprep.subr.mxu0 %v7911_v12  ;;  %v10739_v19 = vld [vmem:[%s13818_s2] ss:$2 sm:$0x3] }
  0x18   : > { %s357_s18 = scalar_lea.vmem %s13816_s0, %s8545_s30  ;;  %402 = vst.msk [vmem:[#allocation3 + $0x80] sm:$0xff] %vm384_vm1, %v13828_v2  ;;  %404 = vst.msk [vmem:[#allocation3 + $0x90] sm:$0xff] %vm384_vm1, %v13828_v2  ;;  %v602_v20 = vsub.s32 0, %v10734_v18  ;;  %v7886_v21 = vld [vmem:[%s13819_s3 + $0x40] sm:$0xff]  ;;  %v7908_v22 = vld [vmem:[%s13819_s3 + $0x70] sm:$0xff]  ;;  %s350_s29 = sand.u32 1, %s10501_s14  }
  0x19   : > { %v450_v3 = vld [vmem:[%s357_s18] sm:$0xff]  ;;  %v455_v4 = vld [vmem:[%s357_s18 + $0x28] sm:$0xff]  ;;  %v456_v6 = vld [vmem:[%s357_s18 + $0x30] sm:$0xff]  ;;  %364 = vst.msk [vmem:[#allocation2 + $0x20] sm:$0xff] %vm358_vm2, %v13828_v2  ;;  %s7872_s30 = sshll.u32 %s350_s29, 7  ;;  %s13827_s26 = smov 16  }
  0x1a   : > { %7875 = vmatmul.mubr.msk.f32.vlgmr.msra.gmra.mxu0 %vm460_vm0, %v450_v3  ;;  %v451_v5 = vld [vmem:[%s357_s18 + $0x8] sm:$0xff]  ;;  %7880 = vmatmul.mubr.msk.f32.vlgmr.msra.gmra.mxu1 %vm460_vm0, %v455_v4  ;;  %v452_v7 = vld [vmem:[%s357_s18 + $0x10] sm:$0xff]  ;;  %v457_v8 = vld [vmem:[%s357_s18 + $0x38] sm:$0xff]  ;;  %365 = vst.msk [vmem:[#allocation2 + $0x28] sm:$0xf] %vm360_vm3, %v13828_v2  ;;  %v10760_v26 = vrot.slane %v10739_v19, %v602_v20  ;;  %s10808_s25 = scalar_lea.vmem [#allocation6], %s7872_s30 }
  0x1b   : > { %555 = vmatprep.mubr.f32.mxu0 %v13828_v2  ;;  %585 = vmatprep.mubr.f32.mxu1 %v13828_v2  ;;  %v453_v9 = vld [vmem:[%s357_s18 + $0x18] sm:$0xff]  ;;  %v454_v10 = vld [vmem:[%s357_s18 + $0x20] sm:$0xff]  ;;  %359 = vst.msk [vmem:[#allocation2] sm:$0xff] %vm358_vm2, %v13828_v2  ;;  %362 = vst.msk [vmem:[#allocation2 + $0x10] sm:$0xff] %vm358_vm2, %v13828_v2  ;;  %v606_v4 = vsub.s32 1, %v10734_v18  ;;  %vm428_vm5 = vcmask 261120  }
  0x1c   : > { %361 = vst.msk [vmem:[#allocation2 + $0x8] sm:$0xf] %vm360_vm3, %v13828_v2  ;;  %363 = vst.msk [vmem:[#allocation2 + $0x18] sm:$0xf] %vm360_vm3, %v13828_v2  ;;  %9222 = vmatpush3.msra.mxu1 %v7889_v11  ;;  %9270 = vmatpush3.msra.mxu0 %v7911_v12  ;;  %v7885_v23 = vld [vmem:[%s13819_s3 + $0x38] sm:$0xff]  ;;  %v7907_v24 = vld [vmem:[%s13819_s3 + $0x68] sm:$0xff] }
  0x1d   : > { %366 = vst.msk [vmem:[#allocation2 + $0x30] sm:$0xff] %vm358_vm2, %v13828_v2  ;;  %368 = vst.msk [vmem:[#allocation2 + $0x40] sm:$0xff] %vm358_vm2, %v13828_v2  ;;  %9223 = vmatprep.subr.mxu1 %v7888_v13  ;;  %9271 = vmatprep.subr.mxu0 %v7910_v14  ;;  %v10757_v25 = vld [vmem:[%s13818_s2 + $0x1] ss:$2 sm:$0x3]  ;;  %v7884_v27 = vld [vmem:[%s13819_s3 + $0x30] sm:$0xff] }
  0x1e   : > { %7876 = vmatmul.mubr.msk.f32.gmra.mxu0 %vm460_vm0, %v451_v5  ;;  %7881 = vmatmul.mubr.msk.f32.gmra.mxu1 %vm460_vm0, %v456_v6  ;;  %367 = vst.msk [vmem:[#allocation2 + $0x38] sm:$0xf] %vm360_vm3, %v13828_v2  ;;  %369 = vst.msk [vmem:[#allocation2 + $0x48] sm:$0xf] %vm360_vm3, %v13828_v2  ;;  %v7906_v28 = vld [vmem:[%s13819_s3 + $0x60] sm:$0xff]  ;;  %v10770_v30 = vrot.slane %v10757_v25, %v602_v20  ;;  %v840_v49 = vld [vmem:[%s13819_s3 + $0x28] sm:$0xff] }
  0x1f   : > { %561 = vmatprep.mubr.f32.mxu0 %v13828_v2  ;;  %591 = vmatprep.mubr.f32.mxu1 %v13828_v2  ;;  %370 = vst.msk [vmem:[#allocation2 + $0x50] sm:$0xff] %vm358_vm2, %v13828_v2  ;;  %372 = vst.msk [vmem:[#allocation2 + $0x60] sm:$0xff] %vm358_vm2, %v13828_v2  ;;  %v839_v50 = vld [vmem:[%s13819_s3 + $0x20] sm:$0xff]  ;;  %v7939_v61 = vld [vmem:[%s13819_s3 + $0xe8] sm:$0xff]  ;;  %vm430_vm6 = vcmask 254976   ;;  %s10514_s27 = smov 80  }
  0x20   : > { %371 = vst.msk [vmem:[#allocation2 + $0x58] sm:$0xf] %vm360_vm3, %v13828_v2  ;;  %373 = vst.msk [vmem:[#allocation2 + $0x68] sm:$0xf] %vm360_vm3, %v13828_v2  ;;  %9224 = vmatpush3.msra.mxu1 %v7888_v13  ;;  %9272 = vmatpush3.msra.mxu0 %v7910_v14  ;;  %v838_v62 = vld [vmem:[%s13819_s3 + $0x18] sm:$0xff]  ;;  %v7938_v63 = vld [vmem:[%s13819_s3 + $0xe0] sm:$0xff] }
  0x21   : > { %374 = vst.msk [vmem:[#allocation2 + $0x70] sm:$0xff] %vm358_vm2, %v13828_v2  ;;  %376 = vst.msk [vmem:[#allocation2 + $0x80] sm:$0xff] %vm358_vm2, %v13828_v2  ;;  %9225 = vmatprep.subr.mxu1 %v7887_v15  ;;  %9273 = vmatprep.subr.mxu0 %v7909_v16  ;;  %v836_v11 = vld [vmem:[%s13819_s3 + $0x8] sm:$0xff]  ;;  %v7936_v13 = vld [vmem:[%s13819_s3 + $0xd0] sm:$0xff]  ;;  %vm760_vm7 = vcmask 130048   ;;  %vm7696_vm8 = vcmp.lt.s32.totalorder %v10734_v18, 1 }
  0x22   : > { %7877 = vmatmul.mubr.msk.f32.gmra.mxu0 %vm460_vm0, %v452_v7  ;;  %7882 = vmatmul.mubr.msk.f32.gmra.mxu1 %vm460_vm0, %v457_v8  ;;  %375 = vst.msk [vmem:[#allocation2 + $0x78] sm:$0xf] %vm360_vm3, %v13828_v2  ;;  %377 = vst.msk [vmem:[#allocation2 + $0x88] sm:$0xf] %vm360_vm3, %v13828_v2  ;;  %vm406_vm10 = vcmask 785408   ;;  %vm408_vm11 = vcmask 779264  }
  0x23   : > { %567 = vmatprep.mubr.f32.mxu0 %v13828_v2  ;;  %378 = vst.msk [vmem:[#allocation2 + $0x90] sm:$0xff] %vm358_vm2, %v13828_v2  ;;  %380 = vst.msk [vmem:[#allocation2 + $0xa0] sm:$0xff] %vm358_vm2, %v13828_v2  ;;  %9226 = vmatpush3.msra.mxu1 %v7887_v15  ;;  %v841_v29 = vld [vmem:[#allocation2 + $0x1] sm:$0xff]  ;;  %v10772_v32 = vld [vmem:[#allocation2 + $0x11] sm:$0xff]  ;;  %v10874_v15 = vrot.slane %v10739_v19, %v606_v4  ;;  %vm4679_vm12 = vcmask 1048064   ;;  %vm7783_vm13 = vcmask 1048320  }
  0x24   : > { %379 = vst.msk [vmem:[#allocation2 + $0x98] sm:$0xf] %vm360_vm3, %v13828_v2  ;;  %381 = vst.msk [vmem:[#allocation2 + $0xa8] sm:$0xf] %vm360_vm3, %v13828_v2  ;;  %9274 = vmatpush3.msra.mxu0 %v7909_v16  ;;  %9227 = vmatprep.subr.mxu1 %v7886_v21  ;;  %v1114_v31 = vld [vmem:[#allocation2 + $0x2] sm:$0xff]  ;;  %v1115_v33 = vld [vmem:[#allocation2 + $0x12] sm:$0xff] }
  0x25   : > { %382 = vst.msk [vmem:[#allocation2 + $0xb0] sm:$0xff] %vm358_vm2, %v13828_v2  ;;  %9275 = vmatprep.subr.mxu0 %v7908_v22  ;;  %9228 = vmatpush3.msra.mxu1 %v7886_v21  ;;  %v7935_v19 = vld [vmem:[%s13819_s3 + $0xc8] sm:$0xff]  ;;  %v835_v21 = vld [vmem:[%s13819_s3] sm:$0xff]  ;;  %s7806_s30 = sshll.u32 %s10808_s25, 4  ;;  %s13767_s30 = int_to_ptr.vmem [resolvable:$true] %s7806_s30 }
  0x26   : > { %7878 = vmatmul.mubr.msk.f32.gmra.mxu0 %vm460_vm0, %v453_v9  ;;  %383 = vst.msk [vmem:[#allocation2 + $0xb8] sm:$0xf] %vm360_vm3, %v13828_v2  ;;  %9229 = vmatprep.subr.mxu1 %v7885_v23  ;;  %v837_v9 = vld [vmem:[%s13819_s3 + $0x10] sm:$0xff]  ;;  %s10449_s20 = scalar_lea.vmem %s13767_s30, 2048 }
  0x27   : > { %573 = vmatprep.mubr.f32.mxu0 %v13828_v2  ;;  %9276 = vmatpush3.msra.mxu0 %v7908_v22  ;;  %389 = vst.msk [vmem:[#allocation3 + $0x18] sm:$0x3] %vm386_vm4, %v13828_v2  ;;  %387 = vst.msk [vmem:[#allocation3 + $0x8] sm:$0x3] %vm386_vm4, %v13828_v2  ;;  %v7934_v22 = vld [vmem:[%s13819_s3 + $0xc0] sm:$0xff]  ;;  %p10450_p11 = scmp.ne.s32.totalorder %s13767_s30, %s10449_s20 }
  0x28   : > { %9277 = vmatprep.subr.mxu0 %v7907_v24  ;;  %9230 = vmatpush3.msra.mxu1 %v7885_v23  ;;  %391 = vst.msk [vmem:[#allocation3 + $0x28] sm:$0x3] %vm386_vm4, %v13828_v2  ;;  %393 = vst.msk [vmem:[#allocation3 + $0x38] sm:$0x3] %vm386_vm4, %v13828_v2 }
  0x29   : > { %9278 = vmatpush3.msra.mxu0 %v7907_v24  ;;  %9231 = vmatprep.subr.mxu1 %v7884_v27  ;;  %395 = vst.msk [vmem:[#allocation3 + $0x48] sm:$0x3] %vm386_vm4, %v13828_v2  ;;  %397 = vst.msk [vmem:[#allocation3 + $0x58] sm:$0x3] %vm386_vm4, %v13828_v2  ;;  %p10451_p12 = pnand %p10450_p11, %p10611_p5 }
  0x2a   : > { %7879 = vmatmul.mubr.msk.f32.gmra.mxu0 %vm460_vm0, %v454_v10  ;;  %9279 = vmatprep.subr.mxu0 %v7906_v28  ;;  %v7937_v10 = vld [vmem:[%s13819_s3 + $0xd8] sm:$0xff]  ;;  %399 = vst.msk [vmem:[#allocation3 + $0x68] sm:$0x3] %vm386_vm4, %v13828_v2  ;;  %401 = vst.msk [vmem:[#allocation3 + $0x78] sm:$0x3] %vm386_vm4, %v13828_v2 }
  0x2b   : > { %9232 = vmatpush3.msra.mxu1 %v7884_v27  ;;  %9233 = vmatprep.mubr.msk.f32.mxu1 %vm358_vm2, %v841_v29  ;;  %403 = vst.msk [vmem:[#allocation3 + $0x88] sm:$0x3] %vm386_vm4, %v13828_v2  ;;  %405 = vst.msk [vmem:[#allocation3 + $0x98] sm:$0x3] %vm386_vm4, %v13828_v2  ;;  %v10913_v27 = vld [vmem:[%s13819_s3 + $0xb8] sm:$0xff]  ;;  %v10927_v29 = vld [vmem:[%s13819_s3 + $0x148] sm:$0xff]  ;;  %p10452_p13 = pneg %p10451_p12 }
  0x2c   : > { %9280 = vmatpush3.msra.mxu0 %v7906_v28  ;;  %9281 = vmatprep.mubr.msk.f32.mxu0 %vm358_vm2, %v1114_v31  ;;  %432 = vst.msk [vmem:[#allocation5 + $0x10] sm:$0xff] %vm428_vm5, %v13828_v2  ;;  %429 = vst.msk [vmem:[#allocation5] sm:$0xff] %vm428_vm5, %v13828_v2 }
  0x2d   : > { %9234 = vmatmul.mubr.msk.f32.vlgmr.msra.gmra.mxu1 %vm358_vm2, %v10772_v32  ;;  %9245 = vmatprep.subr.mxu1 %v840_v49  ;;  %433 = vst.msk [vmem:[#allocation5 + $0x18] sm:$0x3] %vm430_vm6, %v13828_v2  ;;  %431 = vst.msk [vmem:[#allocation5 + $0x8] sm:$0x3] %vm430_vm6, %v13828_v2 }
  0x2e   : > { %9282 = vmatmul.mubr.msk.f32.vlgmr.msra.gmra.mxu0 %vm358_vm2, %v1115_v33  ;;  %9246 = vmatpush3.msra.mxu1 %v840_v49  ;;  %434 = vst.msk [vmem:[#allocation5 + $0x20] sm:$0xff] %vm428_vm5, %v13828_v2  ;;  %436 = vst.msk [vmem:[#allocation5 + $0x30] sm:$0xff] %vm428_vm5, %v13828_v2 }
  0x2f   : > { %9247 = vmatprep.subr.mxu1 %v839_v50  ;;  %9317 = vmatprep.subr.mxu0 %v7939_v61  ;;  %435 = vst.msk [vmem:[#allocation5 + $0x28] sm:$0x3] %vm430_vm6, %v13828_v2  ;;  %437 = vst.msk [vmem:[#allocation5 + $0x38] sm:$0x3] %vm430_vm6, %v13828_v2 }
  0x30   : > { %9248 = vmatpush3.msra.mxu1 %v839_v50  ;;  %9318 = vmatpush3.msra.mxu0 %v7939_v61  ;;  %438 = vst.msk [vmem:[#allocation5 + $0x40] sm:$0xff] %vm428_vm5, %v13828_v2  ;;  %440 = vst.msk [vmem:[#allocation5 + $0x50] sm:$0xff] %vm428_vm5, %v13828_v2 }
  0x31   : > { %9249 = vmatprep.subr.mxu1 %v838_v62  ;;  %9319 = vmatprep.subr.mxu0 %v7938_v63  ;;  %439 = vst.msk [vmem:[#allocation5 + $0x48] sm:$0x3] %vm430_vm6, %v13828_v2  ;;  %441 = vst.msk [vmem:[#allocation5 + $0x58] sm:$0x3] %vm430_vm6, %v13828_v2 }
  0x32   : > { %9250 = vmatpush3.msra.mxu1 %v838_v62  ;;  %9320 = vmatpush3.msra.mxu0 %v7938_v63  ;;  %442 = vst.msk [vmem:[#allocation5 + $0x60] sm:$0xff] %vm428_vm5, %v13828_v2  ;;  %444 = vst.msk [vmem:[#allocation5 + $0x70] sm:$0xff] %vm428_vm5, %v13828_v2 }
  0x33   : > { %9251 = vmatprep.subr.mxu1 %v837_v9  ;;  %9321 = vmatprep.subr.mxu0 %v7937_v10  ;;  %443 = vst.msk [vmem:[#allocation5 + $0x68] sm:$0x3] %vm430_vm6, %v13828_v2  ;;  %445 = vst.msk [vmem:[#allocation5 + $0x78] sm:$0x3] %vm430_vm6, %v13828_v2 }
  0x34   : > { %9252 = vmatpush3.msra.mxu1 %v837_v9  ;;  %9322 = vmatpush3.msra.mxu0 %v7937_v10  ;;  %446 = vst.msk [vmem:[#allocation5 + $0x80] sm:$0xff] %vm428_vm5, %v13828_v2  ;;  %448 = vst.msk [vmem:[#allocation5 + $0x90] sm:$0xff] %vm428_vm5, %v13828_v2 }
  0x35   : > { %9253 = vmatprep.subr.mxu1 %v836_v11  ;;  %9323 = vmatprep.subr.mxu0 %v7936_v13  ;;  %447 = vst.msk [vmem:[#allocation5 + $0x88] sm:$0x3] %vm430_vm6, %v13828_v2  ;;  %449 = vst.msk [vmem:[#allocation5 + $0x98] sm:$0x3] %vm430_vm6, %v13828_v2 }
  0x36   : > { %9254 = vmatpush3.msra.mxu1 %v836_v11  ;;  %9324 = vmatpush3.msra.mxu0 %v7936_v13 }
  0x37   : > { %9325 = vmatprep.subr.mxu0 %v7935_v19  ;;  %9255 = vmatprep.subr.mxu1 %v835_v21 }
  0x38   : > { %9326 = vmatpush3.msra.mxu0 %v7935_v19  ;;  %9256 = vmatpush3.msra.mxu1 %v835_v21 }
  0x39   : > { %9327 = vmatprep.subr.mxu0 %v7934_v22  ;;  %9293 = vmatprep.subr.mxu1 %v10913_v27 }
  0x3a   : > { %9328 = vmatpush3.msra.mxu0 %v7934_v22  ;;  %v7924_v22 = vld [vmem:[%s13819_s3 + $0xb0] sm:$0xff] }
  0x3b   : > { %9365 = vmatprep.subr.mxu0 %v10927_v29 }
  0xda   : > { %v551_v34 = vpop.f32.mrf.mxu0  ;;  %v581_v36 = vpop.f32.mrf.mxu1 }
  0xdb   : > { %v610_v35 = vmul.f32 %v10760_v26, %v551_v34  ;;  %v620_v38 = vmul.f32 %v10760_v26, %v581_v36 }
  0xdc   : > { %v10779_v37 = vpop.f32.mrf.mxu0  ;;  %v10786_v40 = vpop.f32.mrf.mxu1 }
  0xdd   : > { %v639_v39 = vadd.f32 %v10770_v30, %v610_v35  ;;  %v649_v42 = vadd.f32 %v10770_v30, %v620_v38  ;;  %v611_v23 = vmul.f32 %v10874_v15, %v10779_v37  ;;  %v621_v38 = vmul.f32 %v10874_v15, %v10786_v40 }
  0xde   : > { %v557_v41 = vpop.f32.mrf.mxu0  ;;  %v587_v45 = vpop.f32.mrf.mxu1 }
  0xdf   : > { %v10789_v43 = vmax.f32 %v639_v39, 0.0  ;;  %v612_v44 = vmul.f32 %v10760_v26, %v557_v41  ;;  %v10794_v47 = vmax.f32 %v649_v42, 0.0  ;;  %v622_v48 = vmul.f32 %v10760_v26, %v587_v45 }
  0xe0   : > { %v10792_v46 = vpop.f32.mrf.mxu0  ;;  %v10806_v52 = vpop.f32.mrf.mxu1 }
  0xe1   : > { %v641_v51 = vadd.f32 %v10770_v30, %v612_v44  ;;  %687 = vrot.lane.b32.xlu0 %v10789_v43, %s10512_s21  ;;  %671 = vst.msk [vmem:[%s10808_s25] sm:$0xff] %vm384_vm1, %v10789_v43  ;;  %v651_v54 = vadd.f32 %v10770_v30, %v622_v48  ;;  %676 = vst.msk [vmem:[%s10808_s25 + $0x50] sm:$0xff] %vm384_vm1, %v10794_v47  ;;  %v623_v48 = vmul.f32 %v10874_v15, %v10806_v52 }
  0xe2   : > { %v563_v53 = vpop.f32.mrf.mxu0  ;;  %v593_v57 = vpop.f32.mrf.mxu1 }
  0xe3   : > { %v10817_v55 = vmax.f32 %v641_v51, 0.0  ;;  %v614_v56 = vmul.f32 %v10760_v26, %v563_v53  ;;  %v10822_v59 = vmax.f32 %v651_v54, 0.0  ;;  %v624_v60 = vmul.f32 %v10760_v26, %v593_v57 }
  0xe4   : > { %v10820_v58 = vpop.f32.mrf.mxu0  ;;  %v595_v49 = vpop.f32.mrf.mxu1 }
  0xe5   : > { %v643_v0 = vadd.f32 %v10770_v30, %v614_v56  ;;  %689 = vrot.lane.b32.xlu0 %v10817_v55, %s10512_s21  ;;  %672 = vst.msk [vmem:[%s10808_s25 + $0x10] sm:$0xff] %vm384_vm1, %v10817_v55  ;;  %v653_v3 = vadd.f32 %v10770_v30, %v624_v60  ;;  %677 = vst.msk [vmem:[%s10808_s25 + $0x60] sm:$0xff] %vm384_vm1, %v10822_v59  ;;  %v625_v53 = vmul.f32 %v10874_v15, %v595_v49 }
  0xe6   : > { %v569_v1 = vpop.f32.mrf.mxu0 }
  0xe7   : > { %v10845_v5 = vmax.f32 %v643_v0, 0.0  ;;  %v616_v6 = vmul.f32 %v10760_v26, %v569_v1  ;;  %v10850_v8 = vmax.f32 %v653_v3, 0.0 }
  0xe8   : > { %v10848_v7 = vpop.f32.mrf.mxu0 }
  0xe9   : > { %v645_v12 = vadd.f32 %v10770_v30, %v616_v6  ;;  %691 = vrot.lane.b32.xlu1 %v10845_v5, %s10512_s21  ;;  %673 = vst.msk [vmem:[%s10808_s25 + $0x20] sm:$0xff] %vm384_vm1, %v10845_v5  ;;  %678 = vst.msk [vmem:[%s10808_s25 + $0x70] sm:$0xff] %vm384_vm1, %v10850_v8  ;;  %v617_v34 = vmul.f32 %v10874_v15, %v10848_v7 }
  0xea   : > { %v575_v14 = vpop.f32.mrf.mxu0 }
  0xeb   : > { %v10876_v16 = vmax.f32 %v645_v12, 0.0  ;;  %v618_v17 = vmul.f32 %v10760_v26, %v575_v14  ;;  %v636_v26 = vrot.slane %v10757_v25, %v606_v4  ;;  %v613_v25 = vmul.f32 %v10874_v15, %v10792_v46 }
  0xec   : > { %v577_v42 = vpop.f32.mrf.mxu0 }
  0xed   : > { %v647_v20 = vadd.f32 %v10770_v30, %v618_v17  ;;  %693 = vrot.lane.b32.xlu1 %v10876_v16, %s10512_s21  ;;  %674 = vst.msk [vmem:[%s10808_s25 + $0x30] sm:$0xff] %vm384_vm1, %v10876_v16  ;;  %v640_v28 = vadd.f32 %v636_v26, %v611_v23  ;;  %v615_v30 = vmul.f32 %v10874_v15, %v10820_v58  ;;  %v11071_v17 = vld [vmem:[#allocation2 + $0x14] sm:$0xff] }
  0xee   : > { %v642_v33 = vadd.f32 %v636_v26, %v613_v25  ;;  %v646_v41 = vadd.f32 %v636_v26, %v617_v34  ;;  %v650_v45 = vadd.f32 %v636_v26, %v621_v38  ;;  %v652_v54 = vadd.f32 %v636_v26, %v623_v48  ;;  %v7966_v34 = vld [vmem:[%s13819_s3 + $0x140] sm:$0xff]  ;;  %v7964_v48 = vld [vmem:[%s13819_s3 + $0x130] sm:$0xff] }
  0xef   : > { %v663_v24 = vmax.f32 %v647_v20, 0.0  ;;  %v656_v31 = vmax.f32 %v640_v28, 0.0  ;;  %v644_v36 = vadd.f32 %v636_v26, %v615_v30  ;;  %v654_v57 = vadd.f32 %v636_v26, %v625_v53  ;;  %v7923_v28 = vld [vmem:[%s13819_s3 + $0xa8] sm:$0xff] }
  0xf0   : > { %v658_v35 = vmax.f32 %v642_v33, 0.0  ;;  %v662_v44 = vmax.f32 %v646_v41, 0.0  ;;  %v666_v50 = vmax.f32 %v650_v45, 0.0  ;;  %v668_v56 = vmax.f32 %v652_v54, 0.0  ;;  %v7921_v45 = vld [vmem:[%s13819_s3 + $0x98] sm:$0xff]  ;;  %v7963_v54 = vld [vmem:[%s13819_s3 + $0x128] sm:$0xff] }
  0xf1   : > { %697 = vrot.lane.b32.xlu1 %v10794_v47, %s10512_s21  ;;  %695 = vrot.lane.b32.xlu0 %v663_v24, %s10512_s21  ;;  %675 = vst.msk [vmem:[%s10808_s25 + $0x40] sm:$0xff] %vm384_vm1, %v663_v24  ;;  %v660_v39 = vmax.f32 %v644_v36, 0.0 }
  0xf5   : > { %701 = vrot.lane.b32.xlu1 %v10850_v8, %s10512_s21  ;;  %699 = vrot.lane.b32.xlu0 %v10822_v59, %s10512_s21 }
  0xf9   : > { %730 = vrot.lane.b32.xlu1 %v656_v31, %s13827_s26  ;;  %728 = vrot.lane.b32.xlu0 %v10789_v43, %s13827_s26  ;;  %v619_v43 = vmul.f32 %v10874_v15, %v577_v42 }
  0xfb   : > { %v648_v51 = vadd.f32 %v636_v26, %v619_v43 }
  0xfd   : > { %734 = vrot.lane.b32.xlu1 %v658_v35, %s13827_s26  ;;  %732 = vrot.lane.b32.xlu0 %v10817_v55, %s13827_s26  ;;  %v664_v55 = vmax.f32 %v648_v51, 0.0  ;;  %v7922_v35 = vld [vmem:[%s13819_s3 + $0xa0] sm:$0xff] }
 0x101   : > { %738 = vrot.lane.b32.xlu1 %v660_v39, %s13827_s26  ;;  %736 = vrot.lane.b32.xlu0 %v10845_v5, %s13827_s26 }
 0x105   : > { %742 = vrot.lane.b32.xlu1 %v662_v44, %s13827_s26  ;;  %740 = vrot.lane.b32.xlu0 %v10876_v16, %s13827_s26  ;;  %v11069_v16 = vld [vmem:[#allocation2 + $0x10] sm:$0xff] }
 0x109   : > { %750 = vrot.lane.b32.xlu1 %v666_v50, %s13827_s26  ;;  %748 = vrot.lane.b32.xlu0 %v10794_v47, %s13827_s26  ;;  %v670_v47 = vmax.f32 %v654_v57, 0.0 }
 0x10d   : > { %744 = vrot.lane.b32.xlu0 %v663_v24, %s13827_s26  ;;  %746 = vrot.lane.b32.xlu1 %v664_v55, %s13827_s26  ;;  %v7920_v55 = vld [vmem:[%s13819_s3 + $0x90] sm:$0xff] }
 0x111   : > { %752 = vrot.lane.b32.xlu0 %v10822_v59, %s13827_s26  ;;  %754 = vrot.lane.b32.xlu1 %v668_v56, %s13827_s26 }
 0x115   : > { %756 = vrot.lane.b32.xlu0 %v10850_v8, %s13827_s26  ;;  %758 = vrot.lane.b32.xlu1 %v670_v47, %s13827_s26  ;;  %v1418_v8 = vld [vmem:[#allocation2 + $0x4] sm:$0xff]  ;;  %s10515_s26 = smov 96  }
 0x116   : > { %v7962_v47 = vld [vmem:[%s13819_s3 + $0x120] sm:$0xff] }
 0x119   : > { %794 = vrot.lane.b32.xlu0 %v10779_v37, %s10514_s27  ;;  %796 = vrot.lane.b32.xlu1 %v10792_v46, %s10514_s27 }
 0x11d   : > { %798 = vrot.lane.b32.xlu0 %v10820_v58, %s10514_s27  ;;  %800 = vrot.lane.b32.xlu1 %v10848_v7, %s10514_s27  ;;  %v827_v7 = vld [vmem:[#allocation2] sm:$0xff] }
 0x121   : > { %802 = vrot.lane.b32.xlu0 %v577_v42, %s10514_s27  ;;  %804 = vrot.lane.b32.xlu1 %v10786_v40, %s10514_s27  ;;  %v7965_v42 = vld [vmem:[%s13819_s3 + $0x138] sm:$0xff] }
 0x125   : > { %806 = vrot.lane.b32.xlu0 %v10806_v52, %s10514_s27  ;;  %808 = vrot.lane.b32.xlu1 %v595_v49, %s10514_s27  ;;  %s10516_s27 = smov [#allocation6]  }
 0x126   : > { %s10453_s28 = sshll.u32 %s10516_s27, 4  ;;  %s10454_s28 = int_to_ptr.vmem [resolvable:$false] %s10453_s28 }
 0x127   : > { %p10456_p0 = scmp.lt.s32.totalorder %s13767_s30, %s10454_s28 }
 0x153   : > { %v688_v59 = vpop.permute.xlu0 %687 }
 0x154   : > { %712 = vst.msk [vmem:[#allocation2 + $0x22] sm:$0xff] %vm358_vm2, %v688_v59 }
 0x157   : > { %v690_v60 = vpop.permute.xlu0 %689 }
 0x158   : > { %713 = vst.msk [vmem:[#allocation2 + $0x32] sm:$0xff] %vm358_vm2, %v690_v60 }
 0x15b   : > { %v692_v61 = vpop.permute.xlu1 %691  ;;  %v11011_v37 = vld [vmem:[#allocation2 + $0x21] sm:$0xff] }
 0x15c   : > { %v11013_v46 = vld [vmem:[#allocation2 + $0x22] sm:$0xff]  ;;  %714 = vst.msk [vmem:[#allocation2 + $0x42] sm:$0xff] %vm358_vm2, %v692_v61  ;;  %9236 = vmatprep.mubr.msk.f32.mxu1 %vm358_vm2, %v11011_v37 }
 0x15d   : > { %9284 = vmatprep.mubr.msk.f32.mxu0 %vm358_vm2, %v11013_v46  ;;  %v11082_v23 = vld [vmem:[#allocation2 + $0x20] sm:$0xff] }
 0x15e   : > { %v11087_v24 = vld [vmem:[#allocation2 + $0x24] sm:$0xff] }
 0x15f   : > { %v694_v40 = vpop.permute.xlu1 %693  ;;  %v11020_v52 = vld [vmem:[#allocation2 + $0x31] sm:$0xff]  ;;  %v1266_v61 = vld [vmem:[#allocation2 + $0x3] sm:$0xff] }
 0x160   : > { %v11022_v58 = vld [vmem:[#allocation2 + $0x32] sm:$0xff]  ;;  %715 = vst.msk [vmem:[#allocation2 + $0x52] sm:$0xff] %vm358_vm2, %v694_v40  ;;  %9237 = vmatmul.mubr.msk.f32.gmra.mxu1 %vm358_vm2, %v11020_v52  ;;  %v7699_v40 = vsub.s32 7, %v10734_v18 }
 0x161   : > { %9285 = vmatmul.mubr.msk.f32.gmra.mxu0 %vm358_vm2, %v11022_v58  ;;  %v11095_v31 = vld [vmem:[#allocation2 + $0x30] sm:$0xff] }
 0x162   : > { %vm7700_vm9 = vcmp.lt.s32.totalorder %v7699_v40, 1 }
 0x163   : > { %v698_v62 = vpop.permute.xlu1 %697  ;;  %v696_v63 = vpop.permute.xlu0 %695  ;;  %v11029_v0 = vld [vmem:[#allocation2 + $0x41] sm:$0xff] }
 0x164   : > { %v11031_v1 = vld [vmem:[#allocation2 + $0x42] sm:$0xff]  ;;  %717 = vst.msk [vmem:[#allocation2 + $0x72] sm:$0xff] %vm358_vm2, %v698_v62  ;;  %716 = vst.msk [vmem:[#allocation2 + $0x62] sm:$0xff] %vm358_vm2, %v696_v63  ;;  %9239 = vmatprep.mubr.msk.f32.mxu1 %vm358_vm2, %v11029_v0  ;;  %v7953_v63 = vld [vmem:[%s13819_s3 + $0x118] sm:$0xff] }
 0x165   : > { %9287 = vmatprep.mubr.msk.f32.mxu0 %vm358_vm2, %v11031_v1  ;;  %v11105_v33 = vld [vmem:[#allocation2 + $0x40] sm:$0xff] }
 0x167   : > { %v702_v3 = vpop.permute.xlu1 %701  ;;  %v700_v4 = vpop.permute.xlu0 %699  ;;  %v11039_v5 = vld [vmem:[#allocation2 + $0x51] sm:$0xff] }
 0x168   : > { %v11041_v6 = vld [vmem:[#allocation2 + $0x52] sm:$0xff]  ;;  %719 = vst.msk [vmem:[#allocation2 + $0x92] sm:$0xff] %vm358_vm2, %v702_v3  ;;  %718 = vst.msk [vmem:[#allocation2 + $0x82] sm:$0xff] %vm358_vm2, %v700_v4  ;;  %9240 = vmatmul.mubr.msk.f32.gmra.mxu1 %vm358_vm2, %v11039_v5  ;;  %v7697_v4 = vsel %vm7696_vm8, %v10734_v18, 1  ;;  %v7995_v18 = vld [vmem:[%s13819_s3 + $0x1a8] sm:$0xff] }
 0x169   : > { %9288 = vmatmul.mubr.msk.f32.gmra.mxu0 %vm358_vm2, %v11041_v6  ;;  %v11120_v41 = vld [vmem:[#allocation2 + $0x50] sm:$0xff] }
 0x16a   : > { %v11128_v43 = vld [vmem:[#allocation2 + $0x54] sm:$0xff] }
 0x16b   : > { %v731_v9 = vpop.permute.xlu1 %730  ;;  %v729_v10 = vpop.permute.xlu0 %728  ;;  %v11049_v11 = vld [vmem:[#allocation2 + $0x61] sm:$0xff]  ;;  %v11053_v13 = vld [vmem:[#allocation2 + $0x71] sm:$0xff] }
 0x16c   : > { %v11051_v12 = vld [vmem:[#allocation2 + $0x62] sm:$0xff]  ;;  %v761_v14 = vsel %vm760_vm7, %v729_v10, %v731_v9  ;;  %9242 = vmatprep.mubr.msk.f32.mxu1 %vm358_vm2, %v11049_v11  ;;  %v11060_v15 = vld [vmem:[#allocation2 + $0x72] sm:$0xff] }
 0x16d   : > { %9290 = vmatprep.mubr.msk.f32.mxu0 %vm358_vm2, %v11051_v12  ;;  %778 = vst.msk [vmem:[#allocation3 + $0x11] sm:$0xff] %vm384_vm1, %v761_v14  ;;  %9243 = vmatmul.mubr.msk.f32.gmra.mxu1 %vm358_vm2, %v11053_v13  ;;  %v11132_v44 = vld [vmem:[#allocation2 + $0x60] sm:$0xff]  ;;  %v11154_v56 = vld [vmem:[#allocation2 + $0x70] sm:$0xff] }
 0x16e   : > { %9291 = vmatmul.mubr.msk.f32.gmra.mxu0 %vm358_vm2, %v11060_v15  ;;  %9257 = vmatprep.mubr.msk.f32.mxu1 %vm358_vm2, %v827_v7  ;;  %v11142_v49 = vld [vmem:[#allocation2 + $0x64] sm:$0xff]  ;;  %v11156_v57 = vld [vmem:[#allocation2 + $0x74] sm:$0xff] }
 0x16f   : > { %9329 = vmatprep.mubr.msk.f32.mxu0 %vm358_vm2, %v1418_v8  ;;  %v735_v19 = vpop.permute.xlu1 %734  ;;  %v733_v20 = vpop.permute.xlu0 %732  ;;  %v11172_v3 = vld [vmem:[#allocation2 + $0x13] sm:$0xff]  ;;  %v11189_v14 = vld [vmem:[#allocation2 + $0x23] sm:$0xff] }
 0x170   : > { %v762_v21 = vsel %vm760_vm7, %v733_v20, %v735_v19  ;;  %v7952_v9 = vld [vmem:[%s13819_s3 + $0x110] sm:$0xff]  ;;  %v7701_v19 = vsel %vm7700_vm9, %v7699_v40, 1  ;;  %v7951_v20 = vld [vmem:[%s13819_s3 + $0x108] sm:$0xff] }
 0x171   : > { %779 = vst.msk [vmem:[#allocation3 + $0x21] sm:$0xff] %vm384_vm1, %v762_v21  ;;  %9258 = vmatmul.mubr.msk.f32.vlgmr.msra.gmra.mxu1 %vm358_vm2, %v11069_v16 }
 0x172   : > { %9330 = vmatmul.mubr.msk.f32.vlgmr.msra.gmra.mxu0 %vm358_vm2, %v11071_v17  ;;  %9294 = vmatpush3.msra.mxu1 %v10913_v27  ;;  %v11097_v27 = vld [vmem:[#allocation2 + $0x34] sm:$0xff] }
 0x173   : > { %9260 = vmatprep.mubr.msk.f32.mxu1 %vm358_vm2, %v11082_v23  ;;  %9332 = vmatprep.mubr.msk.f32.mxu0 %vm358_vm2, %v11087_v24  ;;  %v739_v26 = vpop.permute.xlu1 %738  ;;  %v737_v25 = vpop.permute.xlu0 %736 }
 0x174   : > { %9295 = vmatprep.subr.mxu1 %v7924_v22  ;;  %v763_v30 = vsel %vm760_vm7, %v737_v25, %v739_v26  ;;  %9366 = vmatpush3.msra.mxu0 %v10927_v29  ;;  %v11115_v29 = vld [vmem:[#allocation2 + $0x44] sm:$0xff] }
 0x175   : > { %9296 = vmatpush3.msra.mxu1 %v7924_v22  ;;  %780 = vst.msk [vmem:[#allocation3 + $0x31] sm:$0xff] %vm384_vm1, %v763_v30  ;;  %9367 = vmatprep.subr.mxu0 %v7966_v34  ;;  %v11199_v22 = vld [vmem:[#allocation2 + $0x33] sm:$0xff]  ;;  %v7994_v26 = vld [vmem:[%s13819_s3 + $0x1a0] sm:$0xff] }
 0x176   : > { %9261 = vmatmul.mubr.msk.f32.gmra.mxu1 %vm358_vm2, %v11095_v31  ;;  %9333 = vmatmul.mubr.msk.f32.gmra.mxu0 %vm358_vm2, %v11097_v27  ;;  %v7549_v30 = vld [vmem:[#allocation5] sm:$0xff] }
 0x177   : > { %9263 = vmatprep.mubr.msk.f32.mxu1 %vm358_vm2, %v11105_v33  ;;  %9297 = vmatprep.subr.mxu1 %v7923_v28  ;;  %v743_v36 = vpop.permute.xlu1 %742  ;;  %v741_v38 = vpop.permute.xlu0 %740 }
 0x178   : > { %9335 = vmatprep.mubr.msk.f32.mxu0 %vm358_vm2, %v11115_v29  ;;  %9298 = vmatpush3.msra.mxu1 %v7923_v28  ;;  %v764_v39 = vsel %vm760_vm7, %v741_v38, %v743_v36  ;;  %v11212_v28 = vld [vmem:[#allocation2 + $0x43] sm:$0xff] }
 0x179   : > { %9299 = vmatprep.subr.mxu1 %v7922_v35  ;;  %781 = vst.msk [vmem:[#allocation3 + $0x41] sm:$0xff] %vm384_vm1, %v764_v39  ;;  %9368 = vmatpush3.msra.mxu0 %v7966_v34  ;;  %v7565_v34 = vld [vmem:[#allocation5 + $0x1] sm:$0xff]  ;;  %v7993_v39 = vld [vmem:[%s13819_s3 + $0x198] sm:$0xff] }
 0x17a   : > { %9264 = vmatmul.mubr.msk.f32.gmra.mxu1 %vm358_vm2, %v11120_v41  ;;  %9336 = vmatmul.mubr.msk.f32.gmra.mxu0 %vm358_vm2, %v11128_v43 }
 0x17b   : > { %9300 = vmatpush3.msra.mxu1 %v7922_v35  ;;  %9369 = vmatprep.subr.mxu0 %v7965_v42  ;;  %v751_v50 = vpop.permute.xlu1 %750  ;;  %v749_v51 = vpop.permute.xlu0 %748 }
 0x17c   : > { %9266 = vmatprep.mubr.msk.f32.mxu1 %vm358_vm2, %v11132_v44  ;;  %9338 = vmatprep.mubr.msk.f32.mxu0 %vm358_vm2, %v11142_v49  ;;  %v766_v53 = vsel %vm760_vm7, %v749_v51, %v751_v50  ;;  %v7949_v50 = vld [vmem:[%s13819_s3 + $0xf8] sm:$0xff]  ;;  %v7992_v51 = vld [vmem:[%s13819_s3 + $0x190] sm:$0xff] }
 0x17d   : > { %9370 = vmatpush3.msra.mxu0 %v7965_v42  ;;  %9301 = vmatprep.subr.mxu1 %v7921_v45  ;;  %783 = vst.msk [vmem:[#allocation3 + $0x61] sm:$0xff] %vm384_vm1, %v766_v53  ;;  %v7573_v42 = vadd.f32 %v7565_v34, %v7549_v30 }
 0x17e   : > { %9371 = vmatprep.subr.mxu0 %v7964_v48  ;;  %9302 = vmatpush3.msra.mxu1 %v7921_v45 }
 0x17f   : > { %9372 = vmatpush3.msra.mxu0 %v7964_v48  ;;  %9267 = vmatmul.mubr.msk.f32.gmra.mxu1 %vm358_vm2, %v11154_v56  ;;  %v745_v59 = vpop.permute.xlu0 %744  ;;  %v747_v60 = vpop.permute.xlu1 %746  ;;  %v11233_v48 = vld [vmem:[#allocation2 + $0x63] sm:$0xff] }
 0x180   : > { %9339 = vmatmul.mubr.msk.f32.gmra.mxu0 %vm358_vm2, %v11156_v57  ;;  %9373 = vmatprep.subr.mxu0 %v7963_v54  ;;  %v765_v62 = vsel %vm760_vm7, %v745_v59, %v747_v60  ;;  %v7948_v59 = vld [vmem:[%s13819_s3 + $0xf0] sm:$0xff] }
 0x181   : > { %9303 = vmatprep.subr.mxu1 %v7920_v55  ;;  %9374 = vmatpush3.msra.mxu0 %v7963_v54  ;;  %782 = vst.msk [vmem:[#allocation3 + $0x51] sm:$0xff] %vm384_vm1, %v765_v62 }
 0x182   : > { %9304 = vmatpush3.msra.mxu1 %v7920_v55  ;;  %9375 = vmatprep.subr.mxu0 %v7962_v47 }
 0x183   : > { %9305 = vmatprep.mubr.msk.f32.mxu1 %vm358_vm2, %v1266_v61  ;;  %9341 = vmatprep.subr.mxu1 %v7953_v63  ;;  %v753_v7 = vpop.permute.xlu0 %752  ;;  %v755_v8 = vpop.permute.xlu1 %754  ;;  %v7990_v61 = vld [vmem:[%s13819_s3 + $0x180] sm:$0xff] }
 0x184   : > { %9376 = vmatpush3.msra.mxu0 %v7962_v47  ;;  %9377 = vmatprep.mubr.msk.f32.mxu0 %vm358_vm2, %v10772_v32  ;;  %v767_v10 = vsel %vm760_vm7, %v753_v7, %v755_v8  ;;  %v7698_v32 = vadd.s32 1, %v7697_v4  ;;  %v7991_v47 = vld [vmem:[%s13819_s3 + $0x188] sm:$0xff]  ;;  %v7981_v8 = vld [vmem:[%s13819_s3 + $0x178] sm:$0xff] }
 0x185   : > { %9306 = vmatmul.mubr.msk.f32.vlgmr.msra.gmra.mxu1 %vm358_vm2, %v11172_v3  ;;  %9378 = vmatmul.mubr.msk.f32.vlgmr.msra.gmra.mxu0 %vm358_vm2, %v11011_v37  ;;  %784 = vst.msk [vmem:[#allocation3 + $0x71] sm:$0xff] %vm384_vm1, %v767_v10 }
 0x186   : > { %9342 = vmatpush3.msra.mxu1 %v7953_v63  ;;  %9308 = vmatprep.mubr.msk.f32.mxu1 %vm358_vm2, %v11189_v14  ;;  %v11215_v35 = vadd.s32 %v7701_v19, %v7698_v32 }
 0x187   : > { %9380 = vmatprep.mubr.msk.f32.mxu0 %vm358_vm2, %v11020_v52  ;;  %9343 = vmatprep.subr.mxu1 %v7952_v9  ;;  %v757_v21 = vpop.permute.xlu0 %756  ;;  %v759_v37 = vpop.permute.xlu1 %758  ;;  %v7950_v52 = vld [vmem:[%s13819_s3 + $0x100] sm:$0xff] }
 0x188   : > { %9413 = vmatprep.subr.mxu0 %v7995_v18  ;;  %9344 = vmatpush3.msra.mxu1 %v7952_v9  ;;  %v768_v25 = vsel %vm760_vm7, %v757_v21, %v759_v37  ;;  %v7703_v45 = vmul.u32 2, %v11215_v35  ;;  %v7704_v7 = vmul.u32 3, %v11215_v35  ;;  %v12346_v2 = vld [vmem:[#allocation3 + $0x51] sm:$0xff] }
 0x189   : > { %9414 = vmatpush3.msra.mxu0 %v7995_v18  ;;  %9309 = vmatmul.mubr.msk.f32.gmra.mxu1 %vm358_vm2, %v11199_v22  ;;  %785 = vst.msk [vmem:[#allocation3 + $0x81] sm:$0xff] %vm384_vm1, %v768_v25  ;;  %v7980_v25 = vld [vmem:[%s13819_s3 + $0x170] sm:$0xff] }
 0x18a   : > { %9381 = vmatmul.mubr.msk.f32.gmra.mxu0 %vm358_vm2, %v11029_v0  ;;  %9311 = vmatprep.mubr.msk.f32.mxu1 %vm358_vm2, %v11212_v28  ;;  %v11221_v0 = vld [vmem:[#allocation2 + $0x53] sm:$0xff]  ;;  %v7705_v60 = vcvt.s32.f32 %v7703_v45  ;;  %v7706_v34 = vcvt.s32.f32 %v7704_v7  ;;  %v8022_v7 = vld [vmem:[%s13819_s3 + $0x200] sm:$0xff] }
 0x18b   : > { %9345 = vmatprep.subr.mxu1 %v7951_v20  ;;  %9383 = vmatprep.mubr.msk.f32.mxu0 %vm358_vm2, %v11039_v5  ;;  %v795_v36 = vpop.permute.xlu0 %794  ;;  %v797_v38 = vpop.permute.xlu1 %796  ;;  %v7581_v5 = vld [vmem:[#allocation5 + $0x2] sm:$0xff] }
 0x18c   : > { %9346 = vmatpush3.msra.mxu1 %v7951_v20  ;;  %9415 = vmatprep.subr.mxu0 %v7994_v26  ;;  %819 = vst.msk [vmem:[#allocation5 + $0x11] sm:$0xff] %vm428_vm5, %v795_v36  ;;  %820 = vst.msk [vmem:[#allocation5 + $0x21] sm:$0xff] %vm428_vm5, %v797_v38  ;;  %v7589_v55 = vadd.f32 %v7581_v5, %v7573_v42  ;;  %10444 = vrcp.f32 %v7705_v60 }
 0x18d   : > { %9347 = vmatprep.subr.mxu1 %v7950_v52  ;;  %9416 = vmatpush3.msra.mxu0 %v7994_v26  ;;  %10446 = vrcp.f32 %v7706_v34 }
 0x18e   : > { %9312 = vmatmul.mubr.msk.f32.gmra.mxu1 %vm358_vm2, %v11221_v0  ;;  %9384 = vmatmul.mubr.msk.f32.gmra.mxu0 %vm358_vm2, %v11049_v11  ;;  %v11245_v11 = vld [vmem:[#allocation2 + $0x81] sm:$0xff] }
 0x18f   : > { %9348 = vmatpush3.msra.mxu1 %v7950_v52  ;;  %9417 = vmatprep.subr.mxu0 %v7993_v39  ;;  %v799_v53 = vpop.permute.xlu0 %798  ;;  %v801_v54 = vpop.permute.xlu1 %800 }
 0x190   : > { %9314 = vmatprep.mubr.msk.f32.mxu1 %vm358_vm2, %v11233_v48  ;;  %9386 = vmatprep.mubr.msk.f32.mxu0 %vm358_vm2, %v11053_v13  ;;  %821 = vst.msk [vmem:[#allocation5 + $0x31] sm:$0xff] %vm428_vm5, %v799_v53  ;;  %822 = vst.msk [vmem:[#allocation5 + $0x41] sm:$0xff] %vm428_vm5, %v801_v54  ;;  %v11255_v13 = vld [vmem:[#allocation2 + $0x73] sm:$0xff] }
 0x191   : > { %9418 = vmatpush3.msra.mxu0 %v7993_v39  ;;  %9349 = vmatprep.subr.mxu1 %v7949_v50 }
 0x192   : > { %9419 = vmatprep.subr.mxu0 %v7992_v51  ;;  %9350 = vmatpush3.msra.mxu1 %v7949_v50 }
 0x193   : > { %9420 = vmatpush3.msra.mxu0 %v7992_v51  ;;  %9315 = vmatmul.mubr.msk.f32.gmra.mxu1 %vm358_vm2, %v11255_v13  ;;  %v803_v40 = vpop.permute.xlu0 %802  ;;  %v805_v62 = vpop.permute.xlu1 %804  ;;  %v7597_v63 = vld [vmem:[#allocation5 + $0x10] sm:$0xff]  ;;  %v7646_v10 = vld [vmem:[#allocation5 + $0x20] sm:$0xff] }
 0x194   : > { %9387 = vmatmul.mubr.msk.f32.gmra.mxu0 %vm358_vm2, %v11245_v11  ;;  %v7613_v4 = vld [vmem:[#allocation5 + $0x11] sm:$0xff]  ;;  %9421 = vmatprep.subr.mxu0 %v7991_v47  ;;  %823 = vst.msk [vmem:[#allocation5 + $0x51] sm:$0xff] %vm428_vm5, %v803_v40  ;;  %824 = vst.msk [vmem:[#allocation5 + $0x61] sm:$0xff] %vm428_vm5, %v805_v62  ;;  %v7605_v9 = vadd.f32 %v7597_v63, %v7589_v55  ;;  %v7662_v18 = vld [vmem:[#allocation5 + $0x21] sm:$0xff] }
 0x195   : > { %9351 = vmatprep.subr.mxu1 %v7948_v59  ;;  %v7574_v32 = vadd.f32 %v7613_v4, %v7597_v63  ;;  %9422 = vmatpush3.msra.mxu0 %v7991_v47  ;;  %v7629_v19 = vld [vmem:[#allocation5 + $0x12] sm:$0xff]  ;;  %v7575_v20 = vadd.f32 %v7662_v18, %v7646_v10  ;;  %v11272_v37 = vld [vmem:[#allocation5 + $0x22] sm:$0xff] }
 0x196   : > { %9352 = vmatpush3.msra.mxu1 %v7948_v59  ;;  %9423 = vmatprep.subr.mxu0 %v7990_v61  ;;  %v7621_v21 = vadd.f32 %v7613_v4, %v7605_v9 }
 0x197   : > { %9353 = vmatprep.mubr.msk.f32.mxu1 %vm358_vm2, %v11069_v16  ;;  %v7590_v26 = vadd.f32 %v7629_v19, %v7574_v32  ;;  %9389 = vmatprep.subr.mxu1 %v7981_v8  ;;  %v807_v52 = vpop.permute.xlu0 %806  ;;  %v809_v30 = vpop.permute.xlu1 %808  ;;  %v7647_v35 = vld [vmem:[#allocation5 + $0x30] sm:$0xff]  ;;  %v7591_v38 = vadd.f32 %v11272_v37, %v7575_v20  ;;  %v8023_v16 = vld [vmem:[%s13819_s3 + $0x208] sm:$0xff]  ;;  %v7648_v5 = vld [vmem:[#allocation5 + $0x40] sm:$0xff] }
 0x198   : > { %9424 = vmatpush3.msra.mxu0 %v7990_v61  ;;  %v11277_v36 = vld [vmem:[#allocation5 + $0x31] sm:$0xff]  ;;  %9425 = vmatprep.mubr.msk.f32.mxu0 %vm358_vm2, %v11172_v3  ;;  %825 = vst.msk [vmem:[#allocation5 + $0x71] sm:$0xff] %vm428_vm5, %v807_v52  ;;  %826 = vst.msk [vmem:[#allocation5 + $0x81] sm:$0xff] %vm428_vm5, %v809_v30  ;;  %v7637_v39 = vadd.f32 %v7629_v19, %v7621_v21  ;;  %v11289_v45 = vld [vmem:[#allocation5 + $0x41] sm:$0xff] }
 0x199   : > { %9354 = vmatmul.mubr.msk.f32.vlgmr.msra.gmra.mxu1 %vm358_vm2, %v11082_v23  ;;  %v7606_v42 = vadd.f32 %v7646_v10, %v7590_v26  ;;  %v7576_v50 = vadd.f32 %v11277_v36, %v7647_v35  ;;  %9426 = vmatmul.mubr.msk.f32.vlgmr.msra.gmra.mxu0 %vm358_vm2, %v11189_v14  ;;  %v11294_v3 = vld [vmem:[#allocation5 + $0x32] sm:$0xff]  ;;  %v7607_v51 = vadd.f32 %v7647_v35, %v7591_v38  ;;  %v11301_v47 = vld [vmem:[#allocation5 + $0x42] sm:$0xff] }
 0x19a   : > { %9390 = vmatpush3.msra.mxu1 %v7981_v8  ;;  %v7577_v53 = vadd.f32 %v11289_v45, %v7648_v5  ;;  %9356 = vmatprep.mubr.msk.f32.mxu1 %vm358_vm2, %v11095_v31  ;;  %v7654_v54 = vadd.f32 %v7646_v10, %v7637_v39  ;;  %v7979_v14 = vld [vmem:[%s13819_s3 + $0x168] sm:$0xff]  ;;  %v7978_v8 = vld [vmem:[%s13819_s3 + $0x160] sm:$0xff]  ;;  %v8021_v26 = vld [vmem:[%s13819_s3 + $0x1f8] sm:$0xff] }
 0x19b   : > { %9428 = vmatprep.mubr.msk.f32.mxu0 %vm358_vm2, %v11199_v22  ;;  %v7622_v55 = vadd.f32 %v7662_v18, %v7606_v42  ;;  %v7592_v59 = vadd.f32 %v11294_v3, %v7576_v50  ;;  %9391 = vmatprep.subr.mxu1 %v7980_v25  ;;  %v7623_v60 = vadd.f32 %v11277_v36, %v7607_v51  ;;  %v7649_v61 = vld [vmem:[#allocation5 + $0x50] sm:$0xff]  ;;  %v7650_v30 = vld [vmem:[#allocation5 + $0x60] sm:$0xff] }
 0x19c   : > { %9461 = vmatprep.subr.mxu0 %v8023_v16  ;;  %v11308_v40 = vld [vmem:[#allocation5 + $0x51] sm:$0xff]  ;;  %v7593_v22 = vadd.f32 %v11301_v47, %v7577_v53  ;;  %9392 = vmatpush3.msra.mxu1 %v7980_v25  ;;  %v7670_v62 = vadd.f32 %v7662_v18, %v7654_v54  ;;  %v7666_v42 = vld [vmem:[#allocation5 + $0x61] sm:$0xff] }
 0x19d   : > { %9462 = vmatpush3.msra.mxu0 %v8023_v16  ;;  %v7638_v63 = vadd.f32 %v11272_v37, %v7622_v55  ;;  %v7608_v4 = vadd.f32 %v7648_v5, %v7592_v59  ;;  %9357 = vmatmul.mubr.msk.f32.gmra.mxu1 %vm358_vm2, %v11105_v33  ;;  %v7639_v9 = vadd.f32 %v11294_v3, %v7623_v60  ;;  %v11341_v16 = vpop.eup %10444  ;;  %v8020_v39 = vld [vmem:[%s13819_s3 + $0x1f0] sm:$0xff]  ;;  %v11360_v54 = vld [vmem:[#allocation2 + $0x80] sm:$0xff] }
 0x19e   : > { %9429 = vmatmul.mubr.msk.f32.gmra.mxu0 %vm358_vm2, %v11212_v28  ;;  %v7609_v10 = vadd.f32 %v7649_v61, %v7593_v22  ;;  %v7578_v18 = vadd.f32 %v11308_v40, %v7649_v61  ;;  %9359 = vmatprep.mubr.msk.f32.mxu1 %vm358_vm2, %v11120_v41  ;;  %v11327_v28 = vld [vmem:[#allocation5 + $0x52] sm:$0xff]  ;;  %v7686_v25 = vadd.f32 %v11272_v37, %v7670_v62  ;;  %v11362_v55 = vld [vmem:[#allocation2 + $0x83] sm:$0xff] }
 0x19f   : > { %9393 = vmatprep.subr.mxu1 %v7979_v14  ;;  %v7624_v32 = vadd.f32 %v11289_v45, %v7608_v4  ;;  %9431 = vmatprep.mubr.msk.f32.mxu0 %vm358_vm2, %v11221_v0  ;;  %v7655_v19 = vadd.f32 %v7647_v35, %v7638_v63  ;;  %v7656_v52 = vadd.f32 %v7648_v5, %v7639_v9  ;;  %v7977_v37 = vld [vmem:[%s13819_s3 + $0x158] sm:$0xff]  ;;  %v11354_v51 = vld [vmem:[#allocation5 + $0x70] sm:$0xff]  ;;  %v7682_v63 = vld [vmem:[#allocation5 + $0x62] sm:$0xff] }
 0x1a0   : > { %9394 = vmatpush3.msra.mxu1 %v7979_v14  ;;  %v7625_v20 = vadd.f32 %v11308_v40, %v7609_v10  ;;  %v7594_v21 = vadd.f32 %v11327_v28, %v7578_v18  ;;  %9463 = vmatprep.subr.mxu0 %v8022_v7  ;;  %v11356_v53 = vld [vmem:[#allocation5 + $0x71] sm:$0xff]  ;;  %v7708_v60 = vmul.f32 %v11341_v16, %v7686_v25  ;;  %v11378_v4 = vld [vmem:[%s13825_s9] ss:$0 sm:$0xff] }
 0x1a1   : > { %9395 = vmatprep.subr.mxu1 %v7978_v8  ;;  %9464 = vmatpush3.msra.mxu0 %v8022_v7  ;;  %v7640_v34 = vadd.f32 %v11301_v47, %v7624_v32  ;;  %v7671_v5 = vadd.f32 %v11277_v36, %v7655_v19  ;;  %v7672_v59 = vadd.f32 %v11289_v45, %v7656_v52  ;;  %v8019_v36 = vld [vmem:[%s13819_s3 + $0x1e8] sm:$0xff]  ;;  %v7976_v14 = vld [vmem:[%s13819_s3 + $0x150] sm:$0xff]  ;;  %v8018_v45 = vld [vmem:[%s13819_s3 + $0x1e0] sm:$0xff]  ;;  %v11391_v19 = vpop.eup %10446 }
 0x1a2   : > { %9360 = vmatmul.mubr.msk.f32.gmra.mxu1 %vm358_vm2, %v11132_v44  ;;  %v7641_v35 = vadd.f32 %v11327_v28, %v7625_v20  ;;  %v7610_v38 = vadd.f32 %v7650_v30, %v7594_v21  ;;  %9432 = vmatmul.mubr.msk.f32.gmra.mxu0 %vm358_vm2, %v11233_v48  ;;  %v7555_v9 = vld [vmem:[#allocation5 + $0x60] sm:$0xff]  ;;  %v11387_v10 = vld [vmem:[#allocation5 + $0x72] sm:$0xff] }
 0x1a3   : > { %9396 = vmatpush3.msra.mxu1 %v7978_v8  ;;  %9465 = vmatprep.subr.mxu0 %v8021_v26  ;;  %v7657_v22 = vadd.f32 %v7649_v61, %v7640_v34  ;;  %v7580_v8 = vadd.f32 %v11356_v53, %v11354_v51  ;;  %v7687_v61 = vadd.f32 %v11294_v3, %v7671_v5  ;;  %v11389_v18 = vld [vmem:[#allocation5 + $0x80] sm:$0xff]  ;;  %v8009_v20 = vld [vmem:[%s13819_s3 + $0x1d8] sm:$0xff]  ;;  %v8008_v5 = vld [vmem:[%s13819_s3 + $0x1d0] sm:$0xff] }
 0x1a4   : > { %9362 = vmatprep.mubr.msk.f32.mxu1 %vm358_vm2, %v11154_v56  ;;  %v7626_v50 = vadd.f32 %v7666_v42, %v7610_v38  ;;  %9434 = vmatprep.mubr.msk.f32.mxu0 %vm358_vm2, %v11255_v13  ;;  %v7658_v62 = vadd.f32 %v7650_v30, %v7641_v35  ;;  %v7571_v32 = vld [vmem:[#allocation5 + $0x61] sm:$0xff]  ;;  %v7688_v21 = vadd.f32 %v11301_v47, %v7672_v59  ;;  %v7651_v30 = vld [vmem:[#allocation5 + $0x70] sm:$0xff] }
 0x1a5   : > { %9466 = vmatpush3.msra.mxu0 %v8021_v26  ;;  %9397 = vmatprep.subr.mxu1 %v7977_v37  ;;  %v7596_v26 = vadd.f32 %v11387_v10, %v7580_v8  ;;  %v7722_v3 = vmul.f32 %v11378_v4, %v7708_v60  ;;  %v7673_v25 = vadd.f32 %v11308_v40, %v7657_v22  ;;  %v11402_v34 = vld [vmem:[#allocation5 + $0x81] sm:$0xff] }
 0x1a6   : > { %9467 = vmatprep.subr.mxu0 %v8020_v39  ;;  %9398 = vmatpush3.msra.mxu1 %v7977_v37  ;;  %v7642_v7 = vadd.f32 %v7682_v63, %v7626_v50  ;;  %v7674_v52 = vadd.f32 %v7666_v42, %v7658_v62  ;;  %v11407_v47 = vld [vmem:[%s13825_s9 + $0x1] ss:$0 sm:$0xff]  ;;  %v7579_v37 = vadd.f32 %v7571_v32, %v7555_v9  ;;  %v7587_v42 = vld [vmem:[#allocation5 + $0x62] sm:$0xff] }
 0x1a7   : > { %9468 = vmatpush3.msra.mxu0 %v8020_v39  ;;  %9363 = vmatmul.mubr.msk.f32.gmra.mxu1 %vm358_vm2, %v11360_v54  ;;  %v7612_v38 = vadd.f32 %v11389_v18, %v7596_v26  ;;  %v7710_v40 = vmul.f32 %v11391_v19, %v7687_v61  ;;  %v11412_v39 = vld [vmem:[#allocation5 + $0x82] sm:$0xff]  ;;  %v7711_v59 = vmul.f32 %v11391_v19, %v7688_v21 }
 0x1a8   : > { %9435 = vmatmul.mubr.msk.f32.gmra.mxu0 %vm358_vm2, %v11362_v55  ;;  %9469 = vmatprep.subr.mxu0 %v8019_v36  ;;  %v7659_v35 = vadd.f32 %v7651_v30, %v7642_v7  ;;  %v8051_v50 = vld [vmem:[%s13819_s3 + $0x268] sm:$0xff]  ;;  %v7735_v60 = vadd.f32 %v11407_v47, %v7722_v3  ;;  %v7689_v22 = vadd.f32 %v11327_v28, %v7673_v25  ;;  %v7653_v7 = vld [vmem:[#allocation5 + $0x90] sm:$0xff] }
 0x1a9   : > { %9399 = vmatprep.subr.mxu1 %v7976_v14  ;;  %9470 = vmatpush3.msra.mxu0 %v8019_v36  ;;  %v7628_v36 = vadd.f32 %v11402_v34, %v7612_v38  ;;  %v7690_v62 = vadd.f32 %v7682_v63, %v7674_v52  ;;  %v7723_v28 = vmul.f32 %v11378_v4, %v7710_v40  ;;  %v7669_v63 = vld [vmem:[#allocation5 + $0x91] sm:$0xff] }
 0x1aa   : > { %9473 = vmatprep.mubr.msk.f32.mxu0 %vm358_vm2, %v11082_v23  ;;  %9400 = vmatpush3.msra.mxu1 %v7976_v14  ;;  %v10448_v23 = vld [vmem:[#allocation2 + $0x12] sm:$0xff]  ;;  %v7595_v14 = vadd.f32 %v7587_v42, %v7579_v37  ;;  %v7743_v21 = vmax.f32 %v7735_v60, 0.0  ;;  %v7712_v26 = vmul.f32 %v11391_v19, %v7689_v22  ;;  %v11498_v22 = vld [vmem:[#allocation2 + $0x82] sm:$0xff] }
 0x1ab   : > { %9471 = vmatprep.subr.mxu0 %v8018_v45  ;;  %9401 = vmatprep.mubr.msk.f32.mxu1 %vm358_vm2, %v10448_v23  ;;  %v7644_v9 = vadd.f32 %v11412_v39, %v7628_v36  ;;  %v7713_v3 = vmul.f32 %v11391_v19, %v7690_v62  ;;  %v7683_v25 = vld [vmem:[#allocation5 + $0x72] sm:$0xff] }
 0x1ac   : > { %9437 = vmatprep.subr.mxu1 %v8009_v20  ;;  %9472 = vmatpush3.msra.mxu0 %v8018_v45  ;;  %v7667_v45 = vld [vmem:[#allocation5 + $0x71] sm:$0xff]  ;;  %v7611_v61 = vadd.f32 %v7595_v14, %v11354_v51 }
 0x1ad   : > { %9402 = vmatmul.mubr.msk.f32.vlgmr.msra.gmra.mxu1 %vm358_vm2, %v11013_v46  ;;  %9474 = vmatmul.mubr.msk.f32.vlgmr.msra.gmra.mxu0 %vm358_vm2, %v11095_v31  ;;  %v7675_v8 = vadd.f32 %v7667_v45, %v7659_v35  ;;  %v8007_v31 = vld [vmem:[%s13819_s3 + $0x1c8] sm:$0xff]  ;;  %v7661_v32 = vadd.f32 %v7653_v7, %v7644_v9  ;;  %v7685_v52 = vld [vmem:[#allocation5 + $0x92] sm:$0xff] }
 0x1ae   : > { %9438 = vmatpush3.msra.mxu1 %v8009_v20  ;;  %9404 = vmatprep.mubr.msk.f32.mxu1 %vm358_vm2, %v11022_v58  ;;  %v8050_v58 = vld [vmem:[%s13819_s3 + $0x260] sm:$0xff]  ;;  %v7627_v51 = vadd.f32 %v7611_v61, %v11356_v53  ;;  %v8049_v35 = vld [vmem:[%s13819_s3 + $0x258] sm:$0xff]  ;;  %v11487_v36 = vld [vmem:[#allocation2 + $0x90] sm:$0xff] }
 0x1af   : > { %9476 = vmatprep.mubr.msk.f32.mxu0 %vm358_vm2, %v11105_v33  ;;  %9439 = vmatprep.subr.mxu1 %v8008_v5  ;;  %v7724_v33 = vmul.f32 %v11378_v4, %v7711_v59  ;;  %v8006_v20 = vld [vmem:[%s13819_s3 + $0x1c0] sm:$0xff]  ;;  %v7691_v53 = vadd.f32 %v7683_v25, %v7675_v8  ;;  %v8005_v23 = vld [vmem:[%s13819_s3 + $0x1b8] sm:$0xff]  ;;  %v8004_v62 = vld [vmem:[%s13819_s3 + $0x1b0] sm:$0xff] }
 0x1b0   : > { %9509 = vmatprep.subr.mxu0 %v8051_v50  ;;  %9440 = vmatpush3.msra.mxu1 %v8008_v5  ;;  %v7643_v30 = vadd.f32 %v7627_v51, %v11387_v10  ;;  %v7726_v10 = vmul.f32 %v11378_v4, %v7713_v3  ;;  %v8048_v5 = vld [vmem:[%s13819_s3 + $0x250] sm:$0xff]  ;;  %v8037_v7 = vld [vmem:[%s13819_s3 + $0x238] sm:$0xff]  ;;  %v8074_v3 = vld [vmem:[%s13819_s3 + $0x2a0] sm:$0xff] }
 0x1b1   : > { %9510 = vmatpush3.msra.mxu0 %v8051_v50  ;;  %9405 = vmatmul.mubr.msk.f32.gmra.mxu1 %vm358_vm2, %v11031_v1  ;;  %v7677_v1 = vadd.f32 %v7669_v63, %v7661_v32  ;;  %v7737_v38 = vadd.f32 %v11407_v47, %v7724_v33  ;;  %v8035_v63 = vld [vmem:[%s13819_s3 + $0x228] sm:$0xff]  ;;  %v8034_v33 = vld [vmem:[%s13819_s3 + $0x220] sm:$0xff]  ;;  %v8033_v32 = vld [vmem:[%s13819_s3 + $0x218] sm:$0xff] }
 0x1b2   : > { %9477 = vmatmul.mubr.msk.f32.gmra.mxu0 %vm358_vm2, %v11120_v41  ;;  %9407 = vmatprep.mubr.msk.f32.mxu1 %vm358_vm2, %v11041_v6  ;;  %v7736_v41 = vadd.f32 %v11407_v47, %v7723_v28  ;;  %v7660_v37 = vadd.f32 %v7643_v30, %v11389_v18  ;;  %v7714_v18 = vmul.f32 %v11391_v19, %v7691_v53  ;;  %v8076_v51 = vld [vmem:[%s13819_s3 + $0x2b0] sm:$0xff]  ;;  %v8065_v25 = vld [vmem:[%s13819_s3 + $0x298] sm:$0xff] }
 0x1b3   : > { %9441 = vmatprep.subr.mxu1 %v8007_v31  ;;  %9479 = vmatprep.mubr.msk.f32.mxu0 %vm358_vm2, %v11132_v44  ;;  %v7693_v6 = vadd.f32 %v7685_v52, %v7677_v1  ;;  %v7725_v44 = vmul.f32 %v11378_v4, %v7712_v26  ;;  %v7739_v59 = vadd.f32 %v11407_v47, %v7726_v10  ;;  %v11592_v26 = vld [vmem:[#allocation2 + $0x84] sm:$0xff]  ;;  %v2484_v53 = vld [vmem:[#allocation2 + $0x31] sm:$0xff] }
 0x1b4   : > { %9442 = vmatpush3.msra.mxu1 %v8007_v31  ;;  %9511 = vmatprep.subr.mxu0 %v8050_v58  ;;  %v7676_v42 = vadd.f32 %v7660_v37, %v11402_v34  ;;  %v7727_v14 = vmul.f32 %v11378_v4, %v7714_v18  ;;  %v11525_v31 = vld [vmem:[#allocation2 + $0x32] sm:$0xff]  ;;  %v2939_v52 = vld [vmem:[#allocation2 + $0x24] sm:$0xff] }
 0x1b5   : > { %9443 = vmatprep.subr.mxu1 %v8006_v20  ;;  %9512 = vmatpush3.msra.mxu0 %v8050_v58  ;;  %v7716_v40 = vmul.f32 %v11341_v16, %v7693_v6  ;;  %v7738_v34 = vadd.f32 %v11407_v47, %v7725_v44  ;;  %v7747_v9 = vmax.f32 %v7739_v59, 0.0  ;;  %v8078_v58 = vld [vmem:[%s13819_s3 + $0x2c0] sm:$0xff]  ;;  %v11607_v1 = vld [vmem:[#allocation2 + $0x34] sm:$0xff]  ;;  %v8063_v6 = vld [vmem:[%s13819_s3 + $0x288] sm:$0xff] }
 0x1b6   : > { %7759 = vrot.lane.b32.xlu0 %v7743_v21, %s10515_s26  ;;  %9408 = vmatmul.mubr.msk.f32.gmra.mxu1 %vm358_vm2, %v11051_v12  ;;  %v7744_v12 = vmax.f32 %v7736_v41, 0.0  ;;  %v7692_v16 = vadd.f32 %v7676_v42, %v11412_v39  ;;  %v7740_v61 = vadd.f32 %v11407_v47, %v7727_v14  ;;  %v8032_v21 = vld [vmem:[%s13819_s3 + $0x210] sm:$0xff]  ;;  %v8107_v41 = vld [vmem:[%s13819_s3 + $0x328] sm:$0xff]  ;;  %v8062_v18 = vld [vmem:[%s13819_s3 + $0x280] sm:$0xff] }
 0x1b7   : > { %9480 = vmatmul.mubr.msk.f32.gmra.mxu0 %vm358_vm2, %v11154_v56  ;;  %9444 = vmatpush3.msra.mxu1 %v8006_v20  ;;  %v7745_v56 = vmax.f32 %v7737_v38, 0.0  ;;  %v7729_v50 = vmul.f32 %v11378_v4, %v7716_v40  ;;  %v7746_v8 = vmax.f32 %v7738_v34, 0.0  ;;  %v8075_v20 = vld [vmem:[%s13819_s3 + $0x2a8] sm:$0xff]  ;;  %v8064_v30 = vld [vmem:[%s13819_s3 + $0x290] sm:$0xff] }
 0x1b8   : > { %9513 = vmatprep.subr.mxu0 %v8049_v35  ;;  %9410 = vmatprep.mubr.msk.f32.mxu1 %vm358_vm2, %v11060_v15  ;;  %v8047_v15 = vld [vmem:[%s13819_s3 + $0x248] sm:$0xff]  ;;  %v7715_v39 = vmul.f32 %v11391_v19, %v7692_v16  ;;  %v8046_v19 = vld [vmem:[%s13819_s3 + $0x240] sm:$0xff]  ;;  %v7748_v28 = vmax.f32 %v7740_v61, 0.0  ;;  %v11628_v37 = vld [vmem:[#allocation2 + $0x51] sm:$0xff] }
 0x1b9   : > { %9482 = vmatprep.mubr.msk.f32.mxu0 %vm358_vm2, %v11360_v54  ;;  %9514 = vmatpush3.msra.mxu0 %v8049_v35  ;;  %v11494_v60 = vadd.f32 %v11407_v47, %v7729_v50  ;;  %v11617_v35 = vld [vmem:[#allocation2 + $0x41] sm:$0xff]  ;;  %v11630_v44 = vld [vmem:[#allocation2 + $0x54] sm:$0xff] }
 0x1ba   : > { %9445 = vmatprep.subr.mxu1 %v8005_v23  ;;  %9515 = vmatprep.subr.mxu0 %v8048_v5  ;;  %v7728_v45 = vmul.f32 %v11378_v4, %v7715_v39  ;;  %v11619_v38 = vld [vmem:[#allocation2 + $0x44] sm:$0xff]  ;;  %v11650_v42 = vld [vmem:[#allocation2 + $0x71] sm:$0xff] }
 0x1bb   : > { %9446 = vmatpush3.msra.mxu1 %v8005_v23  ;;  %13834 = vst [vmem:[#allocation9_spill] sm:$0xff] %v11494_v60  ;;  %9516 = vmatpush3.msra.mxu0 %v8048_v5  ;;  %v11636_v10 = vld [vmem:[#allocation2 + $0x61] sm:$0xff]  ;;  %v8105_v5 = vld [vmem:[%s13819_s3 + $0x318] sm:$0xff]  ;;  %v8104_v50 = vld [vmem:[%s13819_s3 + $0x310] sm:$0xff] }
 0x1bc   : > { %7761 = vrot.lane.b32.xlu1 %v7744_v12, %s10515_s26  ;;  %7763 = vrot.lane.b32.xlu0 %v7745_v56, %s10515_s26  ;;  %v11517_v4 = vadd.f32 %v11407_v47, %v7728_v45  ;;  %v8036_v47 = vld [vmem:[%s13819_s3 + $0x230] sm:$0xff]  ;;  %v8106_v23 = vld [vmem:[%s13819_s3 + $0x320] sm:$0xff] }
 0x1bd   : > { %9411 = vmatmul.mubr.msk.f32.gmra.mxu1 %vm358_vm2, %v11498_v22  ;;  %9483 = vmatmul.mubr.msk.f32.gmra.mxu0 %vm358_vm2, %v11487_v36  ;;  %v11646_v40 = vld [vmem:[#allocation2 + $0x64] sm:$0xff]  ;;  %v11657_v12 = vld [vmem:[#allocation2 + $0x74] sm:$0xff] }
 0x1be   : > { %9517 = vmatprep.subr.mxu0 %v8047_v15  ;;  %9447 = vmatprep.subr.mxu1 %v8004_v62  ;;  %13835 = vst [vmem:[#allocation10_spill] sm:$0xff] %v11517_v4  ;;  %v8061_v56 = vld [vmem:[%s13819_s3 + $0x278] sm:$0xff]  ;;  %v8103_v16 = vld [vmem:[%s13819_s3 + $0x308] sm:$0xff]  ;;  %v8060_v34 = vld [vmem:[%s13819_s3 + $0x270] sm:$0xff] }
 0x1bf   : > { %9518 = vmatpush3.msra.mxu0 %v8047_v15  ;;  %9521 = vmatprep.mubr.msk.f32.mxu0 %vm358_vm2, %v11013_v46  ;;  %v11536_v46 = vld [vmem:[#allocation2 + $0x42] sm:$0xff]  ;;  %v11677_v59 = vld [vmem:[#allocation2 + $0x91] sm:$0xff] }
 0x1c0   : > { %9448 = vmatpush3.msra.mxu1 %v8004_v62  ;;  %9519 = vmatprep.subr.mxu0 %v8046_v19  ;;  %v11679_v15 = vld [vmem:[#allocation2 + $0x94] sm:$0xff]  ;;  %v2787_v14 = vld [vmem:[#allocation2 + $0x23] sm:$0xff] }
 0x1c1   : > { %9449 = vmatprep.mubr.msk.f32.mxu1 %vm358_vm2, %v11071_v17  ;;  %9485 = vmatprep.subr.mxu1 %v8037_v7  ;;  %v8079_v17 = vld [vmem:[%s13819_s3 + $0x2c8] sm:$0xff]  ;;  %v8102_v39 = vld [vmem:[%s13819_s3 + $0x300] sm:$0xff]  ;;  %v8093_v62 = vld [vmem:[%s13819_s3 + $0x2f8] sm:$0xff] }
 0x1c2   : > { %9520 = vmatpush3.msra.mxu0 %v8046_v19  ;;  %7765 = vrot.lane.b32.xlu1 %v7746_v8, %s10515_s26  ;;  %v2788_v45 = vld [vmem:[#allocation2 + $0x33] sm:$0xff]  ;;  %v11702_v8 = vld [vmem:[#allocation2 + $0x43] sm:$0xff] }
 0x1c3   : > { %7767 = vrot.lane.b32.xlu0 %v7747_v9, %s10515_s26  ;;  %9450 = vmatmul.mubr.msk.f32.vlgmr.msra.gmra.mxu1 %vm358_vm2, %v11087_v24  ;;  %v11544_v24 = vld [vmem:[#allocation2 + $0x52] sm:$0xff]  ;;  %v8091_v9 = vld [vmem:[%s13819_s3 + $0x2e8] sm:$0xff]  ;;  %v8134_v61 = vld [vmem:[%s13819_s3 + $0x380] sm:$0xff] }
 0x1c4   : > { %9522 = vmatmul.mubr.msk.f32.vlgmr.msra.gmra.mxu0 %vm358_vm2, %v11525_v31  ;;  %9486 = vmatpush3.msra.mxu1 %v8037_v7  ;;  %v8092_v19 = vld [vmem:[%s13819_s3 + $0x2f0] sm:$0xff]  ;;  %v8135_v7 = vld [vmem:[%s13819_s3 + $0x388] sm:$0xff]  ;;  %v8305_v4 = vld [vmem:[%s13821_s5 + $0x158] sm:$0xff] }
 0x1c5   : > { %9452 = vmatprep.mubr.msk.f32.mxu1 %vm358_vm2, %v11097_v27  ;;  %9524 = vmatprep.mubr.msk.f32.mxu0 %vm358_vm2, %v11536_v46  ;;  %v11555_v27 = vld [vmem:[#allocation2 + $0x62] sm:$0xff] }
 0x1c6   : > { %9487 = vmatprep.subr.mxu1 %v8036_v47  ;;  %7769 = vrot.lane.b32.xlu1 %v7748_v28, %s10515_s26  ;;  %v8132_v28 = vld [vmem:[%s13819_s3 + $0x370] sm:$0xff] }
 0x1c7   : > { %9488 = vmatpush3.msra.mxu1 %v8036_v47  ;;  %9557 = vmatprep.subr.mxu0 %v8079_v17  ;;  %v8090_v47 = vld [vmem:[%s13819_s3 + $0x2e0] sm:$0xff] }
 0x1c8   : > { %9453 = vmatmul.mubr.msk.f32.gmra.mxu1 %vm358_vm2, %v11115_v29  ;;  %9525 = vmatmul.mubr.msk.f32.gmra.mxu0 %vm358_vm2, %v11544_v24  ;;  %v8077_v29 = vld [vmem:[%s13819_s3 + $0x2b8] sm:$0xff] }
 0x1c9   : > { %9455 = vmatprep.mubr.msk.f32.mxu1 %vm358_vm2, %v11128_v43  ;;  %9489 = vmatprep.subr.mxu1 %v8035_v63  ;;  %v11570_v43 = vld [vmem:[#allocation2 + $0x72] sm:$0xff] }
 0x1ca   : > { %9527 = vmatprep.mubr.msk.f32.mxu0 %vm358_vm2, %v11555_v27  ;;  %9558 = vmatpush3.msra.mxu0 %v8079_v17  ;;  %v8088_v17 = vld [vmem:[%s13819_s3 + $0x2d0] sm:$0xff] }
 0x1cb   : > { %9490 = vmatpush3.msra.mxu1 %v8035_v63  ;;  %9559 = vmatprep.subr.mxu0 %v8078_v58  ;;  %v11750_v63 = vld [vmem:[#allocation2 + $0x93] sm:$0xff] }
 0x1cc   : > { %9491 = vmatprep.subr.mxu1 %v8034_v33  ;;  %9560 = vmatpush3.msra.mxu0 %v8078_v58  ;;  %v3092_v58 = vld [vmem:[#allocation2 + $0x30] sm:$0xff] }
 0x1cd   : > { %9456 = vmatmul.mubr.msk.f32.gmra.mxu1 %vm358_vm2, %v11142_v49  ;;  %9528 = vmatmul.mubr.msk.f32.gmra.mxu0 %vm358_vm2, %v11570_v43  ;;  %v11584_v49 = vld [vmem:[#allocation2 + $0x92] sm:$0xff] }
 0x1ce   : > { %9492 = vmatpush3.msra.mxu1 %v8034_v33  ;;  %9561 = vmatprep.subr.mxu0 %v8077_v29  ;;  %v8130_v33 = vld [vmem:[%s13819_s3 + $0x360] sm:$0xff] }
 0x1cf   : > { %9458 = vmatprep.mubr.msk.f32.mxu1 %vm358_vm2, %v11156_v57  ;;  %9530 = vmatprep.mubr.msk.f32.mxu0 %vm358_vm2, %v11498_v22  ;;  %v2483_v57 = vld [vmem:[#allocation2 + $0x21] sm:$0xff] }
 0x1d0   : > { %9562 = vmatpush3.msra.mxu0 %v8077_v29  ;;  %9493 = vmatprep.subr.mxu1 %v8033_v32  ;;  %v8121_v29 = vld [vmem:[%s13819_s3 + $0x358] sm:$0xff] }
 0x1d1   : > { %9563 = vmatprep.subr.mxu0 %v8076_v51  ;;  %9494 = vmatpush3.msra.mxu1 %v8033_v32  ;;  %v3093_v32 = vld [vmem:[#allocation2 + $0x40] sm:$0xff] }
 0x1d2   : > { %9564 = vmatpush3.msra.mxu0 %v8076_v51  ;;  %9459 = vmatmul.mubr.msk.f32.gmra.mxu1 %vm358_vm2, %v11592_v26  ;;  %v8120_v51 = vld [vmem:[%s13819_s3 + $0x350] sm:$0xff] }
 0x1d3   : > { %9531 = vmatmul.mubr.msk.f32.gmra.mxu0 %vm358_vm2, %v11584_v49  ;;  %9565 = vmatprep.subr.mxu0 %v8075_v20 }
 0x1d4   : > { %9495 = vmatprep.subr.mxu1 %v8032_v21  ;;  %9497 = vmatprep.mubr.msk.f32.mxu1 %vm358_vm2, %v2483_v57  ;;  %v11773_v57 = vld [vmem:[#allocation2 + $0x53] sm:$0xff] }
 0x1d5   : > { %9566 = vmatpush3.msra.mxu0 %v8075_v20  ;;  %9569 = vmatprep.mubr.msk.f32.mxu0 %vm358_vm2, %v2939_v52  ;;  %v8163_v20 = vld [vmem:[%s13819_s3 + $0x3e8] sm:$0xff] }
 0x1d6   : > { %9496 = vmatpush3.msra.mxu1 %v8032_v21  ;;  %9567 = vmatprep.subr.mxu0 %v8074_v3  ;;  %v3094_v21 = vld [vmem:[#allocation2 + $0x50] sm:$0xff]  ;;  %v11781_v52 = vld [vmem:[#allocation2 + $0x63] sm:$0xff] }
 0x1d7   : > { %9533 = vmatprep.subr.mxu1 %v8065_v25  ;;  %9568 = vmatpush3.msra.mxu0 %v8074_v3  ;;  %v8119_v3 = vld [vmem:[%s13819_s3 + $0x348] sm:$0xff] }
 0x1d8   : > { %9498 = vmatmul.mubr.msk.f32.vlgmr.msra.gmra.mxu1 %vm358_vm2, %v2484_v53  ;;  %9570 = vmatmul.mubr.msk.f32.vlgmr.msra.gmra.mxu0 %vm358_vm2, %v11607_v1 }
 0x1d9   : > { %9534 = vmatpush3.msra.mxu1 %v8065_v25  ;;  %9500 = vmatprep.mubr.msk.f32.mxu1 %vm358_vm2, %v11617_v35  ;;  %v3095_v25 = vld [vmem:[#allocation2 + $0x60] sm:$0xff] }
 0x1da   : > { %9572 = vmatprep.mubr.msk.f32.mxu0 %vm358_vm2, %v11619_v38  ;;  %9535 = vmatprep.subr.mxu1 %v8064_v30 }
 0x1db   : > { %9605 = vmatprep.subr.mxu0 %v8107_v41  ;;  %9536 = vmatpush3.msra.mxu1 %v8064_v30  ;;  %v8162_v30 = vld [vmem:[%s13819_s3 + $0x3e0] sm:$0xff] }
 0x1dc   : > { %9606 = vmatpush3.msra.mxu0 %v8107_v41  ;;  %9501 = vmatmul.mubr.msk.f32.gmra.mxu1 %vm358_vm2, %v11628_v37  ;;  %v8118_v41 = vld [vmem:[%s13819_s3 + $0x340] sm:$0xff] }
 0x1dd   : > { %9573 = vmatmul.mubr.msk.f32.gmra.mxu0 %vm358_vm2, %v11630_v44  ;;  %9503 = vmatprep.mubr.msk.f32.mxu1 %vm358_vm2, %v11636_v10 }
 0x1de   : > { %9537 = vmatprep.subr.mxu1 %v8063_v6  ;;  %9575 = vmatprep.mubr.msk.f32.mxu0 %vm358_vm2, %v11646_v40 }
 0x1df   : > { %9538 = vmatpush3.msra.mxu1 %v8063_v6  ;;  %9607 = vmatprep.subr.mxu0 %v8106_v23  ;;  %v11793_v6 = vld [vmem:[#allocation2 + $0x73] sm:$0xff] }
 0x1e0   : > { %9539 = vmatprep.subr.mxu1 %v8062_v18  ;;  %9608 = vmatpush3.msra.mxu0 %v8106_v23  ;;  %v8161_v23 = vld [vmem:[%s13819_s3 + $0x3d8] sm:$0xff] }
 0x1e1   : > { %9504 = vmatmul.mubr.msk.f32.gmra.mxu1 %vm358_vm2, %v11650_v42  ;;  %9576 = vmatmul.mubr.msk.f32.gmra.mxu0 %vm358_vm2, %v11657_v12 }
 0x1e2   : > { %9540 = vmatpush3.msra.mxu1 %v8062_v18  ;;  %9609 = vmatprep.subr.mxu0 %v8105_v5  ;;  %v8117_v18 = vld [vmem:[%s13819_s3 + $0x338] sm:$0xff] }
 0x1e3   : > { %9506 = vmatprep.mubr.msk.f32.mxu1 %vm358_vm2, %v11245_v11  ;;  %9578 = vmatprep.mubr.msk.f32.mxu0 %vm358_vm2, %v11592_v26 }
 0x1e4   : > { %9610 = vmatpush3.msra.mxu0 %v8105_v5  ;;  %9541 = vmatprep.subr.mxu1 %v8061_v56  ;;  %v8160_v5 = vld [vmem:[%s13819_s3 + $0x3d0] sm:$0xff] }
 0x1e5   : > { %9611 = vmatprep.subr.mxu0 %v8104_v50  ;;  %9542 = vmatpush3.msra.mxu1 %v8061_v56  ;;  %v11816_v56 = vld [vmem:[#allocation2 + $0xa3] sm:$0xff] }
 0x1e6   : > { %9612 = vmatpush3.msra.mxu0 %v8104_v50  ;;  %9507 = vmatmul.mubr.msk.f32.gmra.mxu1 %vm358_vm2, %v11677_v59  ;;  %v8116_v50 = vld [vmem:[%s13819_s3 + $0x330] sm:$0xff] }
 0x1e7   : > { %9579 = vmatmul.mubr.msk.f32.gmra.mxu0 %vm358_vm2, %v11679_v15  ;;  %9613 = vmatprep.subr.mxu0 %v8103_v16 }
 0x1e8   : > { %9543 = vmatprep.subr.mxu1 %v8060_v34  ;;  %9545 = vmatprep.mubr.msk.f32.mxu1 %vm358_vm2, %v2787_v14  ;;  %v8148_v14 = vld [vmem:[%s13819_s3 + $0x3b0] sm:$0xff] }
 0x1e9   : > { %9614 = vmatpush3.msra.mxu0 %v8103_v16  ;;  %9617 = vmatprep.mubr.msk.f32.mxu0 %vm358_vm2, %v2484_v53  ;;  %v3096_v53 = vld [vmem:[#allocation2 + $0x70] sm:$0xff]  ;;  %v8158_v16 = vld [vmem:[%s13819_s3 + $0x3c0] sm:$0xff] }
 0x1ea   : > { %9544 = vmatpush3.msra.mxu1 %v8060_v34  ;;  %9615 = vmatprep.subr.mxu0 %v8102_v39  ;;  %v8149_v34 = vld [vmem:[%s13819_s3 + $0x3b8] sm:$0xff] }
 0x1eb   : > { %9581 = vmatprep.subr.mxu1 %v8093_v62  ;;  %9616 = vmatpush3.msra.mxu0 %v8102_v39  ;;  %v8191_v39 = vld [vmem:[%s13819_s3 + $0x448] sm:$0xff] }
 0x1ec   : > { %9546 = vmatmul.mubr.msk.f32.vlgmr.msra.gmra.mxu1 %vm358_vm2, %v2788_v45  ;;  %9618 = vmatmul.mubr.msk.f32.vlgmr.msra.gmra.mxu0 %vm358_vm2, %v11617_v35 }
 0x1ed   : > { %9582 = vmatpush3.msra.mxu1 %v8093_v62  ;;  %9548 = vmatprep.mubr.msk.f32.mxu1 %vm358_vm2, %v11702_v8  ;;  %v8190_v62 = vld [vmem:[%s13819_s3 + $0x440] sm:$0xff] }
 0x1ee   : > { %9620 = vmatprep.mubr.msk.f32.mxu0 %vm358_vm2, %v11628_v37  ;;  %9583 = vmatprep.subr.mxu1 %v8092_v19 }
 0x1ef   : > { %9653 = vmatprep.subr.mxu0 %v8135_v7  ;;  %9584 = vmatpush3.msra.mxu1 %v8092_v19  ;;  %v3857_v19 = vld [vmem:[#allocation2 + $0x80] sm:$0xff] }
 0x1f0   : > { %9654 = vmatpush3.msra.mxu0 %v8135_v7  ;;  %9549 = vmatmul.mubr.msk.f32.gmra.mxu1 %vm358_vm2, %v11221_v0  ;;  %v8133_v0 = vld [vmem:[%s13819_s3 + $0x378] sm:$0xff]  ;;  %v11864_v7 = vpop.f32.mrf.mxu1 }
 0x1f1   : > { %9621 = vmatmul.mubr.msk.f32.gmra.mxu0 %vm358_vm2, %v11636_v10  ;;  %9551 = vmatprep.mubr.msk.f32.mxu1 %vm358_vm2, %v11233_v48  ;;  %v8089_v48 = vld [vmem:[%s13819_s3 + $0x2d8] sm:$0xff] }
 0x1f2   : > { %9585 = vmatprep.subr.mxu1 %v8091_v9  ;;  %9623 = vmatprep.mubr.msk.f32.mxu0 %vm358_vm2, %v11650_v42 }
 0x1f3   : > { %9586 = vmatpush3.msra.mxu1 %v8091_v9  ;;  %9655 = vmatprep.subr.mxu0 %v8134_v61  ;;  %v11866_v9 = vpop.f32.mrf.mxu0 }
 0x1f4   : > { %9587 = vmatprep.subr.mxu1 %v8090_v47  ;;  %9656 = vmatpush3.msra.mxu0 %v8134_v61  ;;  %v8189_v61 = vld [vmem:[%s13819_s3 + $0x438] sm:$0xff] }
 0x1f5   : > { %9552 = vmatmul.mubr.msk.f32.gmra.mxu1 %vm358_vm2, %v11255_v13  ;;  %9624 = vmatmul.mubr.msk.f32.gmra.mxu0 %vm358_vm2, %v11245_v11  ;;  %v11742_v13 = vld [vmem:[#allocation2 + $0xa1] sm:$0xff] }
 0x1f6   : > { %9588 = vmatpush3.msra.mxu1 %v8090_v47  ;;  %9657 = vmatprep.subr.mxu0 %v8133_v0  ;;  %v8131_v11 = vld [vmem:[%s13819_s3 + $0x368] sm:$0xff]  ;;  %v8145_v47 = vld [vmem:[%s13819_s3 + $0x398] sm:$0xff] }
 0x1f7   : > { %9554 = vmatprep.mubr.msk.f32.mxu1 %vm358_vm2, %v11362_v55  ;;  %9626 = vmatprep.mubr.msk.f32.mxu0 %vm358_vm2, %v11677_v59 }
 0x1f8   : > { %9658 = vmatpush3.msra.mxu0 %v8133_v0  ;;  %9589 = vmatprep.subr.mxu1 %v8089_v48  ;;  %v8188_v0 = vld [vmem:[%s13819_s3 + $0x430] sm:$0xff] }
 0x1f9   : > { %9659 = vmatprep.subr.mxu0 %v8132_v28  ;;  %9590 = vmatpush3.msra.mxu1 %v8089_v48  ;;  %v11883_v48 = vpop.f32.mrf.mxu1 }
 0x1fa   : > { %9660 = vmatpush3.msra.mxu0 %v8132_v28  ;;  %9555 = vmatmul.mubr.msk.f32.gmra.mxu1 %vm358_vm2, %v11750_v63  ;;  %v11885_v28 = vpop.f32.mrf.mxu0 }
 0x1fb   : > { %9627 = vmatmul.mubr.msk.f32.gmra.mxu0 %vm358_vm2, %v11742_v13  ;;  %9661 = vmatprep.subr.mxu0 %v8131_v11 }
 0x1fc   : > { %9591 = vmatprep.subr.mxu1 %v8088_v17  ;;  %9593 = vmatprep.mubr.msk.f32.mxu1 %vm358_vm2, %v3092_v58  ;;  %v8144_v58 = vld [vmem:[%s13819_s3 + $0x390] sm:$0xff] }
 0x1fd   : > { %9662 = vmatpush3.msra.mxu0 %v8131_v11  ;;  %9665 = vmatprep.mubr.msk.f32.mxu0 %vm358_vm2, %v2788_v45  ;;  %v8146_v45 = vld [vmem:[%s13819_s3 + $0x3a0] sm:$0xff] }
 0x1fe   : > { %9592 = vmatpush3.msra.mxu1 %v8088_v17  ;;  %9663 = vmatprep.subr.mxu0 %v8130_v33  ;;  %v11887_v11 = vld [vmem:[#allocation2 + $0xa2] sm:$0xff]  ;;  %v3860_v17 = vld [vmem:[#allocation2 + $0xb0] sm:$0xff] }
 0x1ff   : > { %9629 = vmatprep.subr.mxu1 %v8121_v29  ;;  %9664 = vmatpush3.msra.mxu0 %v8130_v33 }
 0x200   : > { %9594 = vmatmul.mubr.msk.f32.vlgmr.msra.gmra.mxu1 %vm358_vm2, %v3093_v32  ;;  %9666 = vmatmul.mubr.msk.f32.vlgmr.msra.gmra.mxu0 %vm358_vm2, %v11702_v8 }
 0x201   : > { %9630 = vmatpush3.msra.mxu1 %v8121_v29  ;;  %9596 = vmatprep.mubr.msk.f32.mxu1 %vm358_vm2, %v3094_v21 }
 0x202   : > { %9668 = vmatprep.mubr.msk.f32.mxu0 %vm358_vm2, %v11773_v57  ;;  %9631 = vmatprep.subr.mxu1 %v8120_v51 }
 0x203   : > { %9701 = vmatprep.subr.mxu0 %v8163_v20  ;;  %9632 = vmatpush3.msra.mxu1 %v8120_v51  ;;  %v8177_v51 = vld [vmem:[%s13819_s3 + $0x418] sm:$0xff] }
 0x204   : > { %9702 = vmatpush3.msra.mxu0 %v8163_v20  ;;  %9597 = vmatmul.mubr.msk.f32.gmra.mxu1 %vm358_vm2, %v3095_v25 }
 0x205   : > { %9669 = vmatmul.mubr.msk.f32.gmra.mxu0 %vm358_vm2, %v11781_v52  ;;  %9599 = vmatprep.mubr.msk.f32.mxu1 %vm358_vm2, %v3096_v53 }
 0x206   : > { %9633 = vmatprep.subr.mxu1 %v8119_v3  ;;  %9671 = vmatprep.mubr.msk.f32.mxu0 %vm358_vm2, %v11793_v6 }
 0x207   : > { %9634 = vmatpush3.msra.mxu1 %v8119_v3  ;;  %9703 = vmatprep.subr.mxu0 %v8162_v30  ;;  %v8176_v3 = vld [vmem:[%s13819_s3 + $0x410] sm:$0xff] }
 0x208   : > { %9635 = vmatprep.subr.mxu1 %v8118_v41  ;;  %9704 = vmatpush3.msra.mxu0 %v8162_v30 }
 0x209   : > { %9600 = vmatmul.mubr.msk.f32.gmra.mxu1 %vm358_vm2, %v11360_v54  ;;  %9672 = vmatmul.mubr.msk.f32.gmra.mxu0 %vm358_vm2, %v11362_v55  ;;  %v11814_v54 = vld [vmem:[#allocation2 + $0xa0] sm:$0xff]  ;;  %v8159_v55 = vld [vmem:[%s13819_s3 + $0x3c8] sm:$0xff] }
 0x20a   : > { %9636 = vmatpush3.msra.mxu1 %v8118_v41  ;;  %9705 = vmatprep.subr.mxu0 %v8161_v23 }
 0x20b   : > { %9602 = vmatprep.mubr.msk.f32.mxu1 %vm358_vm2, %v11487_v36  ;;  %9674 = vmatprep.mubr.msk.f32.mxu0 %vm358_vm2, %v11750_v63 }
 0x20c   : > { %9706 = vmatpush3.msra.mxu0 %v8161_v23  ;;  %9637 = vmatprep.subr.mxu1 %v8117_v18 }
 0x20d   : > { %9707 = vmatprep.subr.mxu0 %v8160_v5  ;;  %9638 = vmatpush3.msra.mxu1 %v8117_v18 }
 0x20e   : > { %9708 = vmatpush3.msra.mxu0 %v8160_v5  ;;  %9603 = vmatmul.mubr.msk.f32.gmra.mxu1 %vm358_vm2, %v11814_v54 }
 0x20f   : > { %9675 = vmatmul.mubr.msk.f32.gmra.mxu0 %vm358_vm2, %v11816_v56  ;;  %9709 = vmatprep.subr.mxu0 %v8159_v55 }
 0x210   : > { %9639 = vmatprep.subr.mxu1 %v8116_v50  ;;  %9641 = vmatprep.mubr.msk.f32.mxu1 %vm358_vm2, %v11525_v31  ;;  %v8147_v31 = vld [vmem:[%s13819_s3 + $0x3a8] sm:$0xff] }
 0x211   : > { %9710 = vmatpush3.msra.mxu0 %v8159_v55  ;;  %9713 = vmatprep.mubr.msk.f32.mxu0 %vm358_vm2, %v3093_v32  ;;  %v8186_v32 = vld [vmem:[%s13819_s3 + $0x420] sm:$0xff]  ;;  %v8216_v55 = vld [vmem:[%s13819_s3 + $0x490] sm:$0xff] }
 0x212   : > { %9640 = vmatpush3.msra.mxu1 %v8116_v50  ;;  %9711 = vmatprep.subr.mxu0 %v8158_v16 }
 0x213   : > { %9677 = vmatprep.subr.mxu1 %v8149_v34  ;;  %9712 = vmatpush3.msra.mxu0 %v8158_v16 }
 0x214   : > { %9642 = vmatmul.mubr.msk.f32.vlgmr.msra.gmra.mxu1 %vm358_vm2, %v11536_v46  ;;  %9714 = vmatmul.mubr.msk.f32.vlgmr.msra.gmra.mxu0 %vm358_vm2, %v3094_v21 }
 0x215   : > { %9678 = vmatpush3.msra.mxu1 %v8149_v34  ;;  %9644 = vmatprep.mubr.msk.f32.mxu1 %vm358_vm2, %v11544_v24  ;;  %v11982_v34 = vld [vmem:[#allocation2 + $0xa4] sm:$0xff] }
 0x216   : > { %9716 = vmatprep.mubr.msk.f32.mxu0 %vm358_vm2, %v3095_v25  ;;  %9679 = vmatprep.subr.mxu1 %v8148_v14 }
 0x217   : > { %9749 = vmatprep.subr.mxu0 %v8191_v39  ;;  %9680 = vmatpush3.msra.mxu1 %v8148_v14  ;;  %v4164_v14 = vld [vmem:[#allocation2 + $0xb2] sm:$0xff] }
 0x218   : > { %9750 = vmatpush3.msra.mxu0 %v8191_v39  ;;  %9645 = vmatmul.mubr.msk.f32.gmra.mxu1 %vm358_vm2, %v11555_v27 }
 0x219   : > { %9717 = vmatmul.mubr.msk.f32.gmra.mxu0 %vm358_vm2, %v3096_v53  ;;  %9647 = vmatprep.mubr.msk.f32.mxu1 %vm358_vm2, %v11570_v43  ;;  %v8175_v53 = vld [vmem:[%s13819_s3 + $0x408] sm:$0xff] }
 0x21a   : > { %9681 = vmatprep.subr.mxu1 %v8147_v31  ;;  %9719 = vmatprep.mubr.msk.f32.mxu0 %vm358_vm2, %v3857_v19 }
 0x21b   : > { %9682 = vmatpush3.msra.mxu1 %v8147_v31  ;;  %9751 = vmatprep.subr.mxu0 %v8190_v62  ;;  %v8172_v31 = vld [vmem:[%s13819_s3 + $0x3f0] sm:$0xff] }
 0x21c   : > { %9683 = vmatprep.subr.mxu1 %v8146_v45  ;;  %9752 = vmatpush3.msra.mxu0 %v8190_v62 }
 0x21d   : > { %9648 = vmatmul.mubr.msk.f32.gmra.mxu1 %vm358_vm2, %v11498_v22  ;;  %9720 = vmatmul.mubr.msk.f32.gmra.mxu0 %vm358_vm2, %v11487_v36  ;;  %v8187_v36 = vld [vmem:[%s13819_s3 + $0x428] sm:$0xff] }
 0x21e   : > { %9684 = vmatpush3.msra.mxu1 %v8146_v45  ;;  %9753 = vmatprep.subr.mxu0 %v8189_v61 }
 0x21f   : > { %9650 = vmatprep.mubr.msk.f32.mxu1 %vm358_vm2, %v11584_v49  ;;  %9754 = vmatpush3.msra.mxu0 %v8189_v61  ;;  %v8214_v61 = vld [vmem:[%s13819_s3 + $0x480] sm:$0xff] }
 0x220   : > { %9685 = vmatprep.subr.mxu1 %v8145_v47  ;;  %9755 = vmatprep.subr.mxu0 %v8188_v0  ;;  %v11900_v33 = vpop.f32.mrf.mxu1 }
 0x221   : > { %9686 = vmatpush3.msra.mxu1 %v8145_v47  ;;  %9722 = vmatprep.mubr.msk.f32.mxu0 %vm358_vm2, %v11814_v54  ;;  %v11902_v29 = vpop.f32.mrf.mxu0  ;;  %v8173_v54 = vld [vmem:[%s13819_s3 + $0x3f8] sm:$0xff] }
 0x222   : > { %9756 = vmatpush3.msra.mxu0 %v8188_v0  ;;  %9651 = vmatmul.mubr.msk.f32.gmra.mxu1 %vm358_vm2, %v11887_v11  ;;  %v11914_v20 = vpop.f32.mrf.mxu1  ;;  %v8205_v47 = vld [vmem:[%s13819_s3 + $0x478] sm:$0xff] }
 0x223   : > { %9723 = vmatmul.mubr.msk.f32.gmra.mxu0 %vm358_vm2, %v3860_v17  ;;  %9757 = vmatprep.subr.mxu0 %v8187_v36  ;;  %v11916_v21 = vpop.f32.mrf.mxu0 }
 0x224   : > { %9687 = vmatprep.subr.mxu1 %v8144_v58  ;;  %9689 = vmatprep.mubr.msk.f32.mxu1 %vm358_vm2, %v11607_v1  ;;  %v8219_v1 = vld [vmem:[%s13819_s3 + $0x4a8] sm:$0xff] }
 0x225   : > { %9758 = vmatpush3.msra.mxu0 %v8187_v36  ;;  %9761 = vmatprep.mubr.msk.f32.mxu0 %vm358_vm2, %v11536_v46 }
 0x226   : > { %9688 = vmatpush3.msra.mxu1 %v8144_v58  ;;  %9759 = vmatprep.subr.mxu0 %v8186_v32 }
 0x227   : > { %9725 = vmatprep.subr.mxu1 %v8177_v51  ;;  %9760 = vmatpush3.msra.mxu0 %v8186_v32 }
 0x228   : > { %9690 = vmatmul.mubr.msk.f32.vlgmr.msra.gmra.mxu1 %vm358_vm2, %v11619_v38  ;;  %9762 = vmatmul.mubr.msk.f32.vlgmr.msra.gmra.mxu0 %vm358_vm2, %v11544_v24  ;;  %v11928_v46 = vpop.f32.mrf.mxu1  ;;  %v8218_v24 = vld [vmem:[%s13819_s3 + $0x4a0] sm:$0xff] }
 0x229   : > { %9726 = vmatpush3.msra.mxu1 %v8177_v51  ;;  %v11930_v25 = vpop.f32.mrf.mxu0  ;;  %9692 = vmatprep.mubr.msk.f32.mxu1 %vm358_vm2, %v11630_v44  ;;  %v4702_v51 = vld [vmem:[%s13821_s5 + $0x30] sm:$0xff] }
 0x22a   : > { %9764 = vmatprep.mubr.msk.f32.mxu0 %vm358_vm2, %v11555_v27  ;;  %9727 = vmatprep.subr.mxu1 %v8176_v3  ;;  %v11939_v30 = vpop.f32.mrf.mxu1  ;;  %v8174_v27 = vld [vmem:[%s13819_s3 + $0x400] sm:$0xff] }
 0x22b   : > { %9797 = vmatprep.subr.mxu0 %v8219_v1  ;;  %v11941_v41 = vpop.f32.mrf.mxu0  ;;  %9728 = vmatpush3.msra.mxu1 %v8176_v3 }
 0x22c   : > { %9798 = vmatpush3.msra.mxu0 %v8219_v1  ;;  %9693 = vmatmul.mubr.msk.f32.gmra.mxu1 %vm358_vm2, %v11646_v40 }
 0x22d   : > { %9765 = vmatmul.mubr.msk.f32.gmra.mxu0 %vm358_vm2, %v11570_v43  ;;  %9695 = vmatprep.mubr.msk.f32.mxu1 %vm358_vm2, %v11657_v12  ;;  %v11955_v23 = vpop.f32.mrf.mxu1  ;;  %v8217_v43 = vld [vmem:[%s13819_s3 + $0x498] sm:$0xff] }
 0x22e   : > { %9729 = vmatprep.subr.mxu1 %v8175_v53  ;;  %9767 = vmatprep.mubr.msk.f32.mxu0 %vm358_vm2, %v11498_v22  ;;  %v11959_v18 = vpop.f32.mrf.mxu0 }
 0x22f   : > { %9730 = vmatpush3.msra.mxu1 %v8175_v53  ;;  %9799 = vmatprep.subr.mxu0 %v8218_v24  ;;  %v11964_v5 = vpop.f32.mrf.mxu1  ;;  %v4009_v53 = vld [vmem:[#allocation2 + $0x81] sm:$0xff] }
 0x230   : > { %9731 = vmatprep.subr.mxu1 %v8174_v27  ;;  %9800 = vmatpush3.msra.mxu0 %v8218_v24  ;;  %v11971_v22 = vpop.f32.mrf.mxu0 }
 0x231   : > { %9696 = vmatmul.mubr.msk.f32.gmra.mxu1 %vm358_vm2, %v11592_v26  ;;  %9768 = vmatmul.mubr.msk.f32.gmra.mxu0 %vm358_vm2, %v11584_v49  ;;  %v9259_v50 = vpop.f32.mrf.mxu1  ;;  %v8215_v49 = vld [vmem:[%s13819_s3 + $0x488] sm:$0xff] }
 0x232   : > { %9732 = vmatpush3.msra.mxu1 %v8174_v27  ;;  %9801 = vmatprep.subr.mxu0 %v8217_v43  ;;  %v11980_v16 = vpop.f32.mrf.mxu0  ;;  %v1081_v1 = vadd.f32 %v9259_v50, %v11864_v7  ;;  %v4700_v27 = vld [vmem:[%s13821_s5 + $0x20] sm:$0xff] }
 0x233   : > { %9698 = vmatprep.mubr.msk.f32.mxu1 %vm358_vm2, %v11679_v15  ;;  %9802 = vmatpush3.msra.mxu0 %v8217_v43  ;;  %v11984_v39 = vpop.f32.mrf.mxu1 }
 0x234   : > { %9733 = vmatprep.subr.mxu1 %v8173_v54  ;;  %9803 = vmatprep.subr.mxu0 %v8216_v55  ;;  %v11994_v62 = vpop.f32.mrf.mxu0 }
 0x235   : > { %9734 = vmatpush3.msra.mxu1 %v8173_v54  ;;  %9770 = vmatprep.mubr.msk.f32.mxu0 %vm358_vm2, %v11887_v11  ;;  %v4699_v54 = vld [vmem:[%s13821_s5 + $0x18] sm:$0xff] }
 0x236   : > { %9804 = vmatpush3.msra.mxu0 %v8216_v55  ;;  %v9262_v45 = vpop.f32.mrf.mxu1  ;;  %9699 = vmatmul.mubr.msk.f32.gmra.mxu1 %vm358_vm2, %v11982_v34  ;;  %v12006_v0 = vpop.f32.mrf.mxu0 }
 0x237   : > { %9771 = vmatmul.mubr.msk.f32.gmra.mxu0 %vm358_vm2, %v4164_v14  ;;  %v1091_v19 = vadd.f32 %v9262_v45, %v11900_v33  ;;  %9805 = vmatprep.subr.mxu0 %v8215_v49  ;;  %v4703_v33 = vld [vmem:[%s13821_s5 + $0x38] sm:$0xff] }
 0x238   : > { %9735 = vmatprep.subr.mxu1 %v8172_v31  ;;  %v12008_v11 = vpop.f32.mrf.mxu1  ;;  %9737 = vmatprep.mubr.msk.f32.mxu1 %vm358_vm2, %v11617_v35  ;;  %v12017_v36 = vpop.f32.mrf.mxu0 }
 0x239   : > { %9806 = vmatpush3.msra.mxu0 %v8215_v49  ;;  %v12013_v17 = vadd.f32 %v11902_v29, %v1091_v19  ;;  %9809 = vmatprep.mubr.msk.f32.mxu0 %vm358_vm2, %v11619_v38  ;;  %v8204_v38 = vld [vmem:[%s13819_s3 + $0x470] sm:$0xff] }
 0x23a   : > { %9736 = vmatpush3.msra.mxu1 %v8172_v31  ;;  %v9265_v58 = vpop.f32.mrf.mxu1  ;;  %9807 = vmatprep.subr.mxu0 %v8214_v61  ;;  %v12025_v35 = vpop.f32.mrf.mxu0  ;;  %v4468_v31 = vld [vmem:[#allocation2 + $0xb4] sm:$0xff] }
 0x23b   : > { %9773 = vmatprep.subr.mxu1 %v8205_v47  ;;  %v1101_v32 = vadd.f32 %v9265_v58, %v11928_v46  ;;  %9808 = vmatpush3.msra.mxu0 %v8214_v61  ;;  %v4696_v58 = vld [vmem:[%s13821_s5] sm:$0xff] }
 0x23c   : > { %9738 = vmatmul.mubr.msk.f32.vlgmr.msra.gmra.mxu1 %vm358_vm2, %v11628_v37  ;;  %v12027_v29 = vpop.f32.mrf.mxu1  ;;  %9810 = vmatmul.mubr.msk.f32.vlgmr.msra.gmra.mxu0 %vm358_vm2, %v11630_v44  ;;  %v12042_v37 = vpop.f32.mrf.mxu0  ;;  %v4701_v44 = vld [vmem:[%s13821_s5 + $0x28] sm:$0xff] }
 0x23d   : > { %9774 = vmatpush3.msra.mxu1 %v8205_v47  ;;  %v12038_v3 = vadd.f32 %v11930_v25, %v1101_v32  ;;  %9849 = vmatprep.subr.mxu0 %v4703_v33  ;;  %v4688_v32 = vld [vmem:[#allocation3] sm:$0xff] }
 0x23e   : > { %9740 = vmatprep.mubr.msk.f32.mxu1 %vm358_vm2, %v11636_v10  ;;  %9812 = vmatprep.mubr.msk.f32.mxu0 %vm358_vm2, %v11646_v40  ;;  %v8203_v10 = vld [vmem:[%s13819_s3 + $0x468] sm:$0xff] }
 0x23f   : > { %9850 = vmatpush3.msra.mxu0 %v4703_v33  ;;  %9775 = vmatprep.subr.mxu1 %v8204_v38  ;;  %v9268_v46 = vpop.f32.mrf.mxu1 }
 0x240   : > { %9851 = vmatprep.subr.mxu0 %v4702_v51  ;;  %v12050_v25 = vpop.f32.mrf.mxu0  ;;  %9776 = vmatpush3.msra.mxu1 %v8204_v38  ;;  %v1111_v40 = vadd.f32 %v9268_v46, %v11955_v23  ;;  %v8202_v23 = vld [vmem:[%s13819_s3 + $0x460] sm:$0xff]  ;;  %v8236_v46 = vld [vmem:[%s13821_s5 + $0x70] sm:$0xff] }
 0x241   : > { %9852 = vmatpush3.msra.mxu0 %v4702_v51  ;;  %9741 = vmatmul.mubr.msk.f32.gmra.mxu1 %vm358_vm2, %v11650_v42  ;;  %v12060_v24 = vpop.f32.mrf.mxu1 }
 0x242   : > { %9813 = vmatmul.mubr.msk.f32.gmra.mxu0 %vm358_vm2, %v11657_v12  ;;  %v12062_v7 = vpop.f32.mrf.mxu0  ;;  %9853 = vmatprep.subr.mxu0 %v4701_v44  ;;  %v12072_v42 = vadd.f32 %v11959_v18, %v1111_v40  ;;  %v1259_v12 = vadd.f32 %v11866_v9, %v1081_v1  ;;  %v8201_v18 = vld [vmem:[%s13819_s3 + $0x458] sm:$0xff]  ;;  %v4698_v9 = vld [vmem:[%s13821_s5 + $0x10] sm:$0xff] }
 0x243   : > { %13836 = vst [vmem:[#allocation11_spill] sm:$0xff] %v12062_v7  ;;  %9743 = vmatprep.mubr.msk.f32.mxu1 %vm358_vm2, %v4009_v53  ;;  %9777 = vmatprep.subr.mxu1 %v8203_v10 }
 0x244   : > { %9815 = vmatprep.mubr.msk.f32.mxu0 %vm358_vm2, %v11592_v26  ;;  %9854 = vmatpush3.msra.mxu0 %v4701_v44  ;;  %v8277_v44 = vld [vmem:[%s13821_s5 + $0xf8] sm:$0xff] }
 0x245   : > { %9778 = vmatpush3.msra.mxu1 %v8203_v10  ;;  %v9307_v43 = vpop.f32.mrf.mxu1  ;;  %9855 = vmatprep.subr.mxu0 %v4700_v27  ;;  %v12083_v50 = vpop.f32.mrf.mxu0  ;;  %v8235_v10 = vld [vmem:[%s13821_s5 + $0x68] sm:$0xff] }
 0x246   : > { %9779 = vmatprep.subr.mxu1 %v8202_v23  ;;  %v1411_v55 = vadd.f32 %v9307_v43, %v1259_v12  ;;  %9856 = vmatpush3.msra.mxu0 %v4700_v27  ;;  %v8275_v12 = vld [vmem:[%s13821_s5 + $0xe8] sm:$0xff] }
 0x247   : > { %9744 = vmatmul.mubr.msk.f32.gmra.mxu1 %vm358_vm2, %v11677_v59  ;;  %v12087_v26 = vpop.f32.mrf.mxu1  ;;  %9816 = vmatmul.mubr.msk.f32.gmra.mxu0 %vm358_vm2, %v11679_v15  ;;  %v12094_v14 = vpop.f32.mrf.mxu0  ;;  %v4012_v59 = vld [vmem:[#allocation2 + $0xb1] sm:$0xff]  ;;  %v4697_v15 = vld [vmem:[%s13821_s5 + $0x8] sm:$0xff] }
 0x248   : > { %9780 = vmatpush3.msra.mxu1 %v8202_v23  ;;  %v12097_v49 = vadd.f32 %v11980_v16, %v1411_v55  ;;  %9857 = vmatprep.subr.mxu0 %v4699_v54  ;;  %v8200_v16 = vld [vmem:[%s13819_s3 + $0x450] sm:$0xff] }
 0x249   : > { %9781 = vmatprep.subr.mxu1 %v8201_v18  ;;  %9858 = vmatpush3.msra.mxu0 %v4699_v54  ;;  %v9310_v45 = vpop.f32.mrf.mxu1  ;;  %v8234_v54 = vld [vmem:[%s13821_s5 + $0x60] sm:$0xff] }
 0x24a   : > { %9746 = vmatprep.mubr.msk.f32.mxu1 %vm358_vm2, %v11742_v13  ;;  %v12101_v19 = vpop.f32.mrf.mxu0  ;;  %9859 = vmatprep.subr.mxu0 %v4698_v9  ;;  %v1413_v61 = vadd.f32 %v9310_v45, %v12013_v17 }
 0x24b   : > { %9782 = vmatpush3.msra.mxu1 %v8201_v18  ;;  %9818 = vmatprep.mubr.msk.f32.mxu0 %vm358_vm2, %v11982_v34  ;;  %v12112_v13 = vpop.f32.mrf.mxu1  ;;  %v8237_v34 = vld [vmem:[%s13821_s5 + $0x78] sm:$0xff]  ;;  %v4313_v18 = vld [vmem:[#allocation2 + $0x83] sm:$0xff] }
 0x24c   : > { %9860 = vmatpush3.msra.mxu0 %v4698_v9  ;;  %v12114_v47 = vpop.f32.mrf.mxu0  ;;  %9747 = vmatmul.mubr.msk.f32.gmra.mxu1 %vm358_vm2, %v4012_v59  ;;  %v12122_v33 = vadd.f32 %v12006_v0, %v1413_v61  ;;  %v8233_v9 = vld [vmem:[%s13821_s5 + $0x58] sm:$0xff]  ;;  %v8232_v61 = vld [vmem:[%s13821_s5 + $0x50] sm:$0xff] }
 0x24d   : > { %9819 = vmatmul.mubr.msk.f32.gmra.mxu0 %vm358_vm2, %v4468_v31  ;;  %9861 = vmatprep.subr.mxu0 %v4697_v15 }
 0x24e   : > { %9783 = vmatprep.subr.mxu1 %v8200_v16  ;;  %v9313_v17 = vpop.f32.mrf.mxu1  ;;  %9785 = vmatprep.mubr.msk.f32.mxu1 %vm358_vm2, %v11702_v8  ;;  %v12130_v51 = vpop.f32.mrf.mxu0 }
 0x24f   : > { %9862 = vmatpush3.msra.mxu0 %v4697_v15  ;;  %v1415_v38 = vadd.f32 %v9313_v17, %v12038_v3  ;;  %9784 = vmatpush3.msra.mxu1 %v8200_v16  ;;  %v12145_v3 = vld [vmem:[#allocation3 + $0x10] sm:$0xff] }
 0x250   : > { %9863 = vmatprep.subr.mxu0 %v4696_v58  ;;  %v12132_v0 = vpop.f32.mrf.mxu1  ;;  %9821 = vmatprep.subr.mxu1 %v8237_v34  ;;  %v12137_v1 = vpop.f32.mrf.mxu0 }
 0x251   : > { %9864 = vmatpush3.msra.mxu0 %v4696_v58  ;;  %13837 = vst [vmem:[#allocation12_spill] sm:$0xff] %v12137_v1  ;;  %v12140_v8 = vadd.f32 %v12025_v35, %v1415_v38  ;;  %9865 = vmatprep.mubr.msk.f32.mxu0 %vm384_vm1, %v4688_v32  ;;  %v12154_v35 = vld [vmem:[#allocation3 + $0x20] sm:$0xff]  ;;  %v12215_v58 = vld [vmem:[#allocation3 + $0x50] sm:$0xff] }
 0x252   : > { %9786 = vmatmul.mubr.msk.f32.vlgmr.msra.gmra.mxu1 %vm358_vm2, %v11773_v57  ;;  %9866 = vmatmul.mubr.msk.f32.vlgmr.msra.gmra.mxu0 %vm384_vm1, %v12145_v3  ;;  %v8276_v57 = vld [vmem:[%s13821_s5 + $0xf0] sm:$0xff]  ;;  %v12225_v38 = vld [vmem:[#allocation3 + $0x60] sm:$0xff] }
 0x253   : > { %9822 = vmatpush3.msra.mxu1 %v8237_v34  ;;  %9905 = vmatprep.subr.mxu0 %v8277_v44  ;;  %v9316_v40 = vpop.f32.mrf.mxu1 }
 0x254   : > { %9788 = vmatprep.mubr.msk.f32.mxu1 %vm358_vm2, %v11781_v52  ;;  %v12162_v53 = vpop.f32.mrf.mxu0  ;;  %9823 = vmatprep.subr.mxu1 %v8236_v46  ;;  %v1417_v27 = vadd.f32 %v9316_v40, %v12072_v42  ;;  %v12179_v42 = vld [vmem:[#allocation3 + $0x30] sm:$0xff]  ;;  %v8271_v40 = vld [vmem:[%s13821_s5 + $0xc8] sm:$0xff] }
 0x255   : > { %9868 = vmatprep.mubr.msk.f32.mxu0 %vm384_vm1, %v12154_v35  ;;  %9906 = vmatpush3.msra.mxu0 %v8277_v44  ;;  %v12167_v52 = vpop.f32.mrf.mxu1 }
 0x256   : > { %9824 = vmatpush3.msra.mxu1 %v8236_v46  ;;  %v12169_v23 = vpop.f32.mrf.mxu0  ;;  %9907 = vmatprep.subr.mxu0 %v8276_v57  ;;  %v12175_v43 = vadd.f32 %v12050_v25, %v1417_v27  ;;  %v12187_v25 = vld [vmem:[#allocation3 + $0x40] sm:$0xff] }
 0x257   : > { %13838 = vst [vmem:[#allocation13_spill] sm:$0xff] %v12169_v23  ;;  %9825 = vmatprep.subr.mxu1 %v8235_v10  ;;  %9908 = vmatpush3.msra.mxu0 %v8276_v57  ;;  %v4316_v57 = vld [vmem:[#allocation2 + $0xb3] sm:$0xff]  ;;  %v8230_v27 = vld [vmem:[%s13821_s5 + $0x40] sm:$0xff] }
 0x258   : > { %9789 = vmatmul.mubr.msk.f32.gmra.mxu1 %vm358_vm2, %v11793_v6  ;;  %9869 = vmatmul.mubr.msk.f32.gmra.mxu0 %vm384_vm1, %v12179_v42  ;;  %v8274_v6 = vld [vmem:[%s13821_s5 + $0xe0] sm:$0xff] }
 0x259   : > { %9826 = vmatpush3.msra.mxu1 %v8235_v10  ;;  %v9355_v55 = vpop.f32.mrf.mxu1  ;;  %9909 = vmatprep.subr.mxu0 %v8275_v12  ;;  %v12196_v31 = vpop.f32.mrf.mxu0 }
 0x25a   : > { %9791 = vmatprep.mubr.msk.f32.mxu1 %vm358_vm2, %v4313_v18  ;;  %v1716_v59 = vadd.f32 %v9355_v55, %v12097_v49  ;;  %9827 = vmatprep.subr.mxu1 %v8234_v54  ;;  %v8273_v49 = vld [vmem:[%s13821_s5 + $0xd8] sm:$0xff] }
 0x25b   : > { %9871 = vmatprep.mubr.msk.f32.mxu0 %vm384_vm1, %v12187_v25  ;;  %v12200_v45 = vpop.f32.mrf.mxu1  ;;  %9910 = vmatpush3.msra.mxu0 %v8275_v12  ;;  %v12202_v15 = vpop.f32.mrf.mxu0 }
 0x25c   : > { %9828 = vmatpush3.msra.mxu1 %v8234_v54  ;;  %13839 = vst [vmem:[#allocation14_spill] sm:$0xff] %v12202_v15  ;;  %v12205_v16 = vadd.f32 %v12083_v50, %v1716_v59  ;;  %9911 = vmatprep.subr.mxu0 %v8274_v6  ;;  %v8272_v50 = vld [vmem:[%s13821_s5 + $0xd0] sm:$0xff]  ;;  %v8325_v15 = vld [vmem:[%s13821_s5 + $0x1b8] sm:$0xff] }
 0x25d   : > { %9829 = vmatprep.subr.mxu1 %v8233_v9  ;;  %9912 = vmatpush3.msra.mxu0 %v8274_v6  ;;  %v9358_v34 = vpop.f32.mrf.mxu1  ;;  %v4704_v6 = vld [vmem:[#allocation3 + $0x1] sm:$0xff] }
 0x25e   : > { %9792 = vmatmul.mubr.msk.f32.gmra.mxu1 %vm358_vm2, %v11750_v63  ;;  %v12217_v17 = vpop.f32.mrf.mxu0  ;;  %9872 = vmatmul.mubr.msk.f32.gmra.mxu0 %vm384_vm1, %v12215_v58  ;;  %v1718_v32 = vadd.f32 %v9358_v34, %v12122_v33  ;;  %v8231_v63 = vld [vmem:[%s13821_s5 + $0x48] sm:$0xff] }
 0x25f   : > { %9830 = vmatpush3.msra.mxu1 %v8233_v9  ;;  %9913 = vmatprep.subr.mxu0 %v8273_v49  ;;  %v12230_v44 = vpop.f32.mrf.mxu1  ;;  %v8261_v9 = vld [vmem:[%s13821_s5 + $0xb8] sm:$0xff] }
 0x260   : > { %9831 = vmatprep.subr.mxu1 %v8232_v61  ;;  %v12232_v46 = vpop.f32.mrf.mxu0  ;;  %9874 = vmatprep.mubr.msk.f32.mxu0 %vm384_vm1, %v12225_v38  ;;  %v12237_v10 = vadd.f32 %v12101_v19, %v1718_v32  ;;  %v12251_v19 = vld [vmem:[#allocation3 + $0x70] sm:$0xff] }
 0x261   : > { %13840 = vst [vmem:[#allocation15_spill] sm:$0xff] %v12232_v46  ;;  %9914 = vmatpush3.msra.mxu0 %v8273_v49  ;;  %9832 = vmatpush3.msra.mxu1 %v8232_v61  ;;  %v8309_v61 = vld [vmem:[%s13821_s5 + $0x178] sm:$0xff] }
 0x262   : > { %9915 = vmatprep.subr.mxu0 %v8272_v50  ;;  %v9361_v33 = vpop.f32.mrf.mxu1  ;;  %9794 = vmatprep.mubr.msk.f32.mxu1 %vm358_vm2, %v11816_v56  ;;  %v12248_v54 = vpop.f32.mrf.mxu0  ;;  %v8270_v56 = vld [vmem:[%s13821_s5 + $0xc0] sm:$0xff] }
 0x263   : > { %9833 = vmatprep.subr.mxu1 %v8231_v63  ;;  %v1720_v12 = vadd.f32 %v9361_v33, %v12140_v8  ;;  %9916 = vmatpush3.msra.mxu0 %v8272_v50  ;;  %v8259_v33 = vld [vmem:[%s13821_s5 + $0xa8] sm:$0xff] }
 0x264   : > { %9795 = vmatmul.mubr.msk.f32.gmra.mxu1 %vm358_vm2, %v4316_v57  ;;  %v12253_v18 = vpop.f32.mrf.mxu1  ;;  %9875 = vmatmul.mubr.msk.f32.gmra.mxu0 %vm384_vm1, %v12251_v19  ;;  %v12260_v55 = vpop.f32.mrf.mxu0  ;;  %v8308_v57 = vld [vmem:[%s13821_s5 + $0x170] sm:$0xff] }
 0x265   : > { %9834 = vmatpush3.msra.mxu1 %v8231_v63  ;;  %13841 = vst [vmem:[#allocation16_spill] sm:$0xff] %v12260_v55  ;;  %v12263_v8 = vadd.f32 %v12130_v51, %v1720_v12  ;;  %9917 = vmatprep.subr.mxu0 %v8271_v40  ;;  %v12273_v51 = vld [vmem:[#allocation3 + $0x11] sm:$0xff]  ;;  %v12290_v63 = vld [vmem:[#allocation3 + $0x21] sm:$0xff] }
 0x266   : > { %9835 = vmatprep.subr.mxu1 %v8230_v27  ;;  %9918 = vmatpush3.msra.mxu0 %v8271_v40  ;;  %v12308_v12 = vld [vmem:[#allocation3 + $0x31] sm:$0xff] }
 0x267   : > { %9921 = vmatprep.mubr.msk.f32.mxu0 %vm384_vm1, %v12145_v3  ;;  %9836 = vmatpush3.msra.mxu1 %v8230_v27  ;;  %v9364_v59 = vpop.f32.mrf.mxu1  ;;  %v8260_v3 = vld [vmem:[%s13821_s5 + $0xb0] sm:$0xff] }
 0x268   : > { %9919 = vmatprep.subr.mxu0 %v8270_v56  ;;  %v12270_v49 = vpop.f32.mrf.mxu0  ;;  %9837 = vmatprep.mubr.msk.f32.mxu1 %vm384_vm1, %v4704_v6  ;;  %v1722_v34 = vadd.f32 %v9364_v59, %v12175_v43  ;;  %v12383_v55 = vld [vmem:[#allocation3 + $0x71] sm:$0xff] }
 0x269   : > { %9877 = vmatprep.subr.mxu1 %v8261_v9  ;;  %9920 = vmatpush3.msra.mxu0 %v8270_v56  ;;  %v12284_v50 = vpop.f32.mrf.mxu1  ;;  %v8307_v56 = vld [vmem:[%s13821_s5 + $0x168] sm:$0xff] }
 0x26a   : > { %9838 = vmatmul.mubr.msk.f32.vlgmr.msra.gmra.mxu1 %vm384_vm1, %v12273_v51  ;;  %13842 = vst [vmem:[#allocation17_spill] sm:$0xff] %v12284_v50  ;;  %v12286_v32 = vpop.f32.mrf.mxu0  ;;  %9922 = vmatmul.mubr.msk.f32.vlgmr.msra.gmra.mxu0 %vm384_vm1, %v12154_v35  ;;  %v12293_v43 = vadd.f32 %v12162_v53, %v1722_v34  ;;  %v8306_v34 = vld [vmem:[%s13821_s5 + $0x160] sm:$0xff] }
 0x26b   : > { %13843 = vst [vmem:[#allocation18_spill] sm:$0xff] %v12286_v32  ;;  %9878 = vmatpush3.msra.mxu1 %v8261_v9  ;;  %9961 = vmatprep.subr.mxu0 %v8309_v61 }
 0x26c   : > { %9840 = vmatprep.mubr.msk.f32.mxu1 %vm384_vm1, %v12290_v63  ;;  %9879 = vmatprep.subr.mxu1 %v8260_v3 }
 0x26d   : > { %9924 = vmatprep.mubr.msk.f32.mxu0 %vm384_vm1, %v12179_v42  ;;  %v9403_v40 = vpop.f32.mrf.mxu1  ;;  %9962 = vmatpush3.msra.mxu0 %v8309_v61  ;;  %v12306_v27 = vpop.f32.mrf.mxu0  ;;  %v12327_v61 = vld [vmem:[#allocation3 + $0x41] sm:$0xff] }
 0x26e   : > { %9880 = vmatpush3.msra.mxu1 %v8260_v3  ;;  %v2020_v53 = vadd.f32 %v9403_v40, %v12205_v16  ;;  %9963 = vmatprep.subr.mxu0 %v8308_v57  ;;  %v8258_v16 = vld [vmem:[%s13821_s5 + $0xa0] sm:$0xff]  ;;  %v8257_v3 = vld [vmem:[%s13821_s5 + $0x98] sm:$0xff] }
 0x26f   : > { %9881 = vmatprep.subr.mxu1 %v8259_v33  ;;  %v12313_v6 = vpop.f32.mrf.mxu1  ;;  %9964 = vmatpush3.msra.mxu0 %v8308_v57  ;;  %v12320_v9 = vpop.f32.mrf.mxu0 }
 0x270   : > { %9841 = vmatmul.mubr.msk.f32.gmra.mxu1 %vm384_vm1, %v12308_v12  ;;  %13844 = vst [vmem:[#allocation19_spill] sm:$0xff] %v12320_v9  ;;  %v12323_v59 = vadd.f32 %v12196_v31, %v2020_v53  ;;  %9925 = vmatmul.mubr.msk.f32.gmra.mxu0 %vm384_vm1, %v12187_v25 }
 0x271   : > { %9882 = vmatpush3.msra.mxu1 %v8259_v33  ;;  %9965 = vmatprep.subr.mxu0 %v8307_v56  ;;  %v9406_v31 = vpop.f32.mrf.mxu1 }
 0x272   : > { %9843 = vmatprep.mubr.msk.f32.mxu1 %vm384_vm1, %v12327_v61  ;;  %v12337_v57 = vpop.f32.mrf.mxu0  ;;  %9883 = vmatprep.subr.mxu1 %v8258_v16  ;;  %v2022_v33 = vadd.f32 %v9406_v31, %v12237_v10  ;;  %v8256_v10 = vld [vmem:[%s13821_s5 + $0x90] sm:$0xff] }
 0x273   : > { %9927 = vmatprep.mubr.msk.f32.mxu0 %vm384_vm1, %v12215_v58  ;;  %9966 = vmatpush3.msra.mxu0 %v8307_v56  ;;  %v12342_v40 = vpop.f32.mrf.mxu1  ;;  %v12361_v56 = vld [vmem:[#allocation3 + $0x61] sm:$0xff] }
 0x274   : > { %9884 = vmatpush3.msra.mxu1 %v8258_v16  ;;  %13845 = vst [vmem:[#allocation20_spill] sm:$0xff] %v12342_v40  ;;  %v12344_v53 = vpop.f32.mrf.mxu0  ;;  %9967 = vmatprep.subr.mxu0 %v8306_v34  ;;  %v12352_v60 = vadd.f32 %v12217_v17, %v2022_v33  ;;  %v8304_v17 = vld [vmem:[%s13821_s5 + $0x150] sm:$0xff] }
 0x275   : > { %13846 = vst [vmem:[#allocation21_spill] sm:$0xff] %v12344_v53  ;;  %9885 = vmatprep.subr.mxu1 %v8257_v3  ;;  %9968 = vmatpush3.msra.mxu0 %v8306_v34  ;;  %v8255_v34 = vld [vmem:[%s13821_s5 + $0x88] sm:$0xff] }
 0x276   : > { %9844 = vmatmul.mubr.msk.f32.gmra.mxu1 %vm384_vm1, %v12346_v2  ;;  %9928 = vmatmul.mubr.msk.f32.gmra.mxu0 %vm384_vm1, %v12225_v38  ;;  %v9409_v16 = vpop.f32.mrf.mxu1 }
 0x277   : > { %9886 = vmatpush3.msra.mxu1 %v8257_v3  ;;  %v12363_v31 = vpop.f32.mrf.mxu0  ;;  %9969 = vmatprep.subr.mxu0 %v8305_v4  ;;  %v2024_v3 = vadd.f32 %v9409_v16, %v12263_v8  ;;  %v8303_v8 = vld [vmem:[%s13821_s5 + $0x148] sm:$0xff]  ;;  %v8254_v16 = vld [vmem:[%s13821_s5 + $0x80] sm:$0xff] }
 0x278   : > { %9846 = vmatprep.mubr.msk.f32.mxu1 %vm384_vm1, %v12361_v56  ;;  %9887 = vmatprep.subr.mxu1 %v8256_v10  ;;  %v12376_v33 = vpop.f32.mrf.mxu1 }
 0x279   : > { %9930 = vmatprep.mubr.msk.f32.mxu0 %vm384_vm1, %v12251_v19  ;;  %13847 = vst [vmem:[#allocation22_spill] sm:$0xff] %v12376_v33  ;;  %9970 = vmatpush3.msra.mxu0 %v8305_v4  ;;  %v12378_v32 = vpop.f32.mrf.mxu0  ;;  %v12381_v53 = vadd.f32 %v12248_v54, %v2024_v3  ;;  %v12393_v4 = vld [vmem:[#allocation3 + $0x80] sm:$0xff]  ;;  %v5441_v3 = vld [vmem:[#allocation3 + $0x12] sm:$0xff] }
 0x27a   : > { %9888 = vmatpush3.msra.mxu1 %v8256_v10  ;;  %13848 = vst [vmem:[#allocation23_spill] sm:$0xff] %v12378_v32  ;;  %9971 = vmatprep.subr.mxu0 %v8304_v17  ;;  %v8302_v54 = vld [vmem:[%s13821_s5 + $0x140] sm:$0xff] }
 0x27b   : > { %9889 = vmatprep.subr.mxu1 %v8255_v34  ;;  %9972 = vmatpush3.msra.mxu0 %v8304_v17  ;;  %v4979_v32 = vld [vmem:[#allocation3 + $0x2] sm:$0xff]  ;;  %v8293_v17 = vld [vmem:[%s13821_s5 + $0x138] sm:$0xff] }
 0x27c   : > { %9847 = vmatmul.mubr.msk.f32.gmra.mxu1 %vm384_vm1, %v12383_v55  ;;  %9931 = vmatmul.mubr.msk.f32.gmra.mxu0 %vm384_vm1, %v12393_v4 }
 0x27d   : > { %9890 = vmatpush3.msra.mxu1 %v8255_v34  ;;  %v9412_v10 = vpop.f32.mrf.mxu1  ;;  %9973 = vmatprep.subr.mxu0 %v8303_v8  ;;  %v12404_v9 = vpop.f32.mrf.mxu0 }
 0x27e   : > { %9891 = vmatprep.subr.mxu1 %v8254_v16  ;;  %v2026_v23 = vadd.f32 %v9412_v10, %v12293_v43  ;;  %9974 = vmatpush3.msra.mxu0 %v8303_v8  ;;  %v8341_v43 = vld [vmem:[%s13821_s5 + $0x1f8] sm:$0xff]  ;;  %v12419_v8 = vld [vmem:[#allocation3 + $0x22] sm:$0xff] }
 0x27f   : > { %9977 = vmatprep.mubr.msk.f32.mxu0 %vm384_vm1, %v5441_v3  ;;  %9892 = vmatpush3.msra.mxu1 %v8254_v16  ;;  %v12407_v34 = vpop.f32.mrf.mxu1  ;;  %v12409_v46 = vpop.f32.mrf.mxu0  ;;  %v8292_v16 = vld [vmem:[%s13821_s5 + $0x130] sm:$0xff] }
 0x280   : > { %9975 = vmatprep.subr.mxu0 %v8302_v54  ;;  %13849 = vst [vmem:[#allocation24_spill] sm:$0xff] %v12407_v34  ;;  %13850 = vst [vmem:[#allocation25_spill] sm:$0xff] %v12409_v46  ;;  %v12412_v33 = vadd.f32 %v12270_v49, %v2026_v23  ;;  %9893 = vmatprep.mubr.msk.f32.mxu1 %vm384_vm1, %v4979_v32  ;;  %v12428_v23 = vld [vmem:[#allocation3 + $0x32] sm:$0xff]  ;;  %v8291_v32 = vld [vmem:[%s13821_s5 + $0x128] sm:$0xff] }
 0x281   : > { %9933 = vmatprep.subr.mxu1 %v8293_v17  ;;  %9976 = vmatpush3.msra.mxu0 %v8302_v54  ;;  %v8340_v49 = vld [vmem:[%s13821_s5 + $0x1f0] sm:$0xff]  ;;  %v8339_v34 = vld [vmem:[%s13821_s5 + $0x1e8] sm:$0xff] }
 0x282   : > { %9894 = vmatmul.mubr.msk.f32.vlgmr.msra.gmra.mxu1 %vm384_vm1, %v5441_v3  ;;  %9978 = vmatmul.mubr.msk.f32.vlgmr.msra.gmra.mxu0 %vm384_vm1, %v12419_v8 }
 0x283   : > { %9934 = vmatpush3.msra.mxu1 %v8293_v17  ;;  %10017 = vmatprep.subr.mxu0 %v8341_v43  ;;  %v9451_v54 = vpop.f32.mrf.mxu1 }
 0x284   : > { %9896 = vmatprep.mubr.msk.f32.mxu1 %vm384_vm1, %v12419_v8  ;;  %v12436_v10 = vpop.f32.mrf.mxu0  ;;  %9935 = vmatprep.subr.mxu1 %v8292_v16  ;;  %v2324_v3 = vadd.f32 %v9451_v54, %v12323_v59  ;;  %v12453_v59 = vld [vmem:[#allocation3 + $0x42] sm:$0xff] }
 0x285   : > { %9980 = vmatprep.mubr.msk.f32.mxu0 %vm384_vm1, %v12428_v23  ;;  %10018 = vmatpush3.msra.mxu0 %v8341_v43  ;;  %v12441_v17 = vpop.f32.mrf.mxu1  ;;  %v8290_v43 = vld [vmem:[%s13821_s5 + $0x120] sm:$0xff] }
 0x286   : > { %9936 = vmatpush3.msra.mxu1 %v8292_v16  ;;  %13851 = vst [vmem:[#allocation26_spill] sm:$0xff] %v12441_v17  ;;  %v12443_v46 = vpop.f32.mrf.mxu0  ;;  %10019 = vmatprep.subr.mxu0 %v8340_v49  ;;  %v12449_v50 = vadd.f32 %v12306_v27, %v2324_v3  ;;  %v8338_v3 = vld [vmem:[%s13821_s5 + $0x1e0] sm:$0xff] }
 0x287   : > { %13852 = vst [vmem:[#allocation27_spill] sm:$0xff] %v12443_v46  ;;  %9937 = vmatprep.subr.mxu1 %v8291_v32  ;;  %10020 = vmatpush3.msra.mxu0 %v8340_v49  ;;  %v12465_v49 = vld [vmem:[#allocation3 + $0x52] sm:$0xff]  ;;  %v8286_v17 = vld [vmem:[%s13821_s5 + $0x100] sm:$0xff] }
 0x288   : > { %9897 = vmatmul.mubr.msk.f32.gmra.mxu1 %vm384_vm1, %v12428_v23  ;;  %v9454_v16 = vpop.f32.mrf.mxu1  ;;  %v12458_v54 = vpop.f32.mrf.mxu0  ;;  %9981 = vmatmul.mubr.msk.f32.gmra.mxu0 %vm384_vm1, %v12453_v59  ;;  %v8289_v46 = vld [vmem:[%s13821_s5 + $0x118] sm:$0xff] }
 0x289   : > { %9938 = vmatpush3.msra.mxu1 %v8291_v32  ;;  %v2326_v27 = vadd.f32 %v9454_v16, %v12352_v60  ;;  %10021 = vmatprep.subr.mxu0 %v8339_v34  ;;  %v8337_v16 = vld [vmem:[%s13821_s5 + $0x1d8] sm:$0xff] }
 0x28a   : > { %9899 = vmatprep.mubr.msk.f32.mxu1 %vm384_vm1, %v12453_v59  ;;  %v12473_v32 = vpop.f32.mrf.mxu1  ;;  %v12475_v1 = vpop.f32.mrf.mxu0  ;;  %9939 = vmatprep.subr.mxu1 %v8290_v43 }
 0x28b   : > { %13853 = vst [vmem:[#allocation28_spill] sm:$0xff] %v12473_v32  ;;  %13854 = vst [vmem:[#allocation29_spill] sm:$0xff] %v12475_v1  ;;  %9983 = vmatprep.mubr.msk.f32.mxu0 %vm384_vm1, %v12465_v49  ;;  %v12480_v60 = vadd.f32 %v12337_v57, %v2326_v27  ;;  %10022 = vmatpush3.msra.mxu0 %v8339_v34  ;;  %v12487_v1 = vld [vmem:[#allocation3 + $0x62] sm:$0xff]  ;;  %v8288_v57 = vld [vmem:[%s13821_s5 + $0x110] sm:$0xff] }
 0x28c   : > { %9940 = vmatpush3.msra.mxu1 %v8290_v43  ;;  %10023 = vmatprep.subr.mxu0 %v8338_v3  ;;  %v8336_v32 = vld [vmem:[%s13821_s5 + $0x1d0] sm:$0xff] }
 0x28d   : > { %9941 = vmatprep.subr.mxu1 %v8289_v46  ;;  %v9457_v7 = vpop.f32.mrf.mxu1  ;;  %10024 = vmatpush3.msra.mxu0 %v8338_v3  ;;  %v12493_v43 = vpop.f32.mrf.mxu0  ;;  %v12501_v3 = vld [vmem:[#allocation3 + $0x72] sm:$0xff] }
 0x28e   : > { %9900 = vmatmul.mubr.msk.f32.gmra.mxu1 %vm384_vm1, %v12465_v49  ;;  %v2328_v34 = vadd.f32 %v9457_v7, %v12381_v53  ;;  %9984 = vmatmul.mubr.msk.f32.gmra.mxu0 %vm384_vm1, %v12487_v1  ;;  %v8287_v7 = vld [vmem:[%s13821_s5 + $0x108] sm:$0xff] }
 0x28f   : > { %9942 = vmatpush3.msra.mxu1 %v8289_v46  ;;  %v12497_v27 = vpop.f32.mrf.mxu1  ;;  %10025 = vmatprep.subr.mxu0 %v8337_v16  ;;  %v12509_v46 = vpop.f32.mrf.mxu0 }
 0x290   : > { %13855 = vst [vmem:[#allocation30_spill] sm:$0xff] %v12497_v27  ;;  %9902 = vmatprep.mubr.msk.f32.mxu1 %vm384_vm1, %v12487_v1  ;;  %13856 = vst [vmem:[#allocation31_spill] sm:$0xff] %v12509_v46  ;;  %v12512_v53 = vadd.f32 %v12363_v31, %v2328_v34  ;;  %9943 = vmatprep.subr.mxu1 %v8288_v57  ;;  %v8335_v27 = vld [vmem:[%s13821_s5 + $0x1c8] sm:$0xff] }
 0x291   : > { %9986 = vmatprep.mubr.msk.f32.mxu0 %vm384_vm1, %v12501_v3  ;;  %10026 = vmatpush3.msra.mxu0 %v8337_v16  ;;  %v12526_v31 = vld [vmem:[#allocation3 + $0x82] sm:$0xff] }
 0x292   : > { %9944 = vmatpush3.msra.mxu1 %v8288_v57  ;;  %10027 = vmatprep.subr.mxu0 %v8336_v32  ;;  %v9460_v46 = vpop.f32.mrf.mxu1 }
 0x293   : > { %9945 = vmatprep.subr.mxu1 %v8287_v7  ;;  %v12522_v40 = vpop.f32.mrf.mxu0  ;;  %10028 = vmatpush3.msra.mxu0 %v8336_v32  ;;  %v2330_v16 = vadd.f32 %v9460_v46, %v12412_v33  ;;  %v8334_v32 = vld [vmem:[%s13821_s5 + $0x1c0] sm:$0xff]  ;;  %v8324_v46 = vld [vmem:[%s13821_s5 + $0x1b0] sm:$0xff] }
 0x294   : > { %9903 = vmatmul.mubr.msk.f32.gmra.mxu1 %vm384_vm1, %v12501_v3  ;;  %9987 = vmatmul.mubr.msk.f32.gmra.mxu0 %vm384_vm1, %v12526_v31  ;;  %v12531_v57 = vpop.f32.mrf.mxu1 }
 0x295   : > { %9946 = vmatpush3.msra.mxu1 %v8287_v7  ;;  %13857 = vst [vmem:[#allocation32_spill] sm:$0xff] %v12531_v57  ;;  %v12533_v34 = vpop.f32.mrf.mxu0  ;;  %10029 = vmatprep.subr.mxu0 %v8335_v27  ;;  %v12542_v33 = vadd.f32 %v12404_v9, %v2330_v16  ;;  %v8323_v9 = vld [vmem:[%s13821_s5 + $0x1a8] sm:$0xff] }
 0x296   : > { %13858 = vst [vmem:[#allocation33_spill] sm:$0xff] %v12533_v34  ;;  %9947 = vmatprep.subr.mxu1 %v8286_v17  ;;  %9949 = vmatprep.mubr.msk.f32.mxu1 %vm384_vm1, %v12273_v51 }
 0x297   : > { %10030 = vmatpush3.msra.mxu0 %v8335_v27  ;;  %10033 = vmatprep.mubr.msk.f32.mxu0 %vm384_vm1, %v12290_v63 }
 0x298   : > { %9948 = vmatpush3.msra.mxu1 %v8286_v17  ;;  %v9499_v7 = vpop.f32.mrf.mxu1  ;;  %10031 = vmatprep.subr.mxu0 %v8334_v32  ;;  %v12552_v57 = vpop.f32.mrf.mxu0 }
 0x299   : > { %9989 = vmatprep.subr.mxu1 %v8325_v15  ;;  %v2628_v34 = vadd.f32 %v9499_v7, %v12449_v50  ;;  %10032 = vmatpush3.msra.mxu0 %v8334_v32 }
 0x29a   : > { %9950 = vmatmul.mubr.msk.f32.vlgmr.msra.gmra.mxu1 %vm384_vm1, %v12290_v63  ;;  %v12556_v51 = vpop.f32.mrf.mxu1  ;;  %10034 = vmatmul.mubr.msk.f32.vlgmr.msra.gmra.mxu0 %vm384_vm1, %v12308_v12  ;;  %v12563_v17 = vpop.f32.mrf.mxu0 }
 0x29b   : > { %9990 = vmatpush3.msra.mxu1 %v8325_v15  ;;  %v12566_v50 = vadd.f32 %v12436_v10, %v2628_v34  ;;  %9952 = vmatprep.mubr.msk.f32.mxu1 %vm384_vm1, %v12308_v12  ;;  %v8322_v15 = vld [vmem:[%s13821_s5 + $0x1a0] sm:$0xff]  ;;  %v8321_v12 = vld [vmem:[%s13821_s5 + $0x198] sm:$0xff] }
 0x29c   : > { %9991 = vmatprep.subr.mxu1 %v8324_v46  ;;  %10036 = vmatprep.mubr.msk.f32.mxu0 %vm384_vm1, %v12327_v61  ;;  %v9502_v63 = vpop.f32.mrf.mxu1 }
 0x29d   : > { %9992 = vmatpush3.msra.mxu1 %v8324_v46  ;;  %v12575_v27 = vpop.f32.mrf.mxu0  ;;  %v2630_v10 = vadd.f32 %v9502_v63, %v12480_v60  ;;  %v8320_v60 = vld [vmem:[%s13821_s5 + $0x190] sm:$0xff] }
 0x29e   : > { %9993 = vmatprep.subr.mxu1 %v8323_v9  ;;  %9953 = vmatmul.mubr.msk.f32.gmra.mxu1 %vm384_vm1, %v12327_v61  ;;  %v12585_v16 = vpop.f32.mrf.mxu1  ;;  %v5757_v63 = vld [vmem:[#allocation3 + $0x91] sm:$0xff] }
 0x29f   : > { %9994 = vmatpush3.msra.mxu1 %v8323_v9  ;;  %10037 = vmatmul.mubr.msk.f32.gmra.mxu0 %vm384_vm1, %v12346_v2  ;;  %v12587_v34 = vpop.f32.mrf.mxu0  ;;  %v12592_v61 = vadd.f32 %v12458_v54, %v2630_v10  ;;  %v8319_v54 = vld [vmem:[%s13821_s5 + $0x188] sm:$0xff] }
 0x2a0   : > { %9955 = vmatprep.mubr.msk.f32.mxu1 %vm384_vm1, %v12346_v2  ;;  %9995 = vmatprep.subr.mxu1 %v8322_v15  ;;  %v5756_v9 = vld [vmem:[#allocation3 + $0x81] sm:$0xff] }
 0x2a1   : > { %10039 = vmatprep.mubr.msk.f32.mxu0 %vm384_vm1, %v12361_v56  ;;  %9996 = vmatpush3.msra.mxu1 %v8322_v15  ;;  %v9505_v32 = vpop.f32.mrf.mxu1  ;;  %v12602_v2 = vpop.f32.mrf.mxu0  ;;  %v8318_v15 = vld [vmem:[%s13821_s5 + $0x180] sm:$0xff] }
 0x2a2   : > { %9997 = vmatprep.subr.mxu1 %v8321_v12  ;;  %9956 = vmatmul.mubr.msk.f32.gmra.mxu1 %vm384_vm1, %v12361_v56  ;;  %v2632_v7 = vadd.f32 %v9505_v32, %v12512_v53 }
 0x2a3   : > { %9998 = vmatpush3.msra.mxu1 %v8321_v12  ;;  %10040 = vmatmul.mubr.msk.f32.gmra.mxu0 %vm384_vm1, %v12383_v55  ;;  %v12609_v46 = vpop.f32.mrf.mxu1  ;;  %v12613_v56 = vpop.f32.mrf.mxu0 }
 0x2a4   : > { %9958 = vmatprep.mubr.msk.f32.mxu1 %vm384_vm1, %v12383_v55  ;;  %9999 = vmatprep.subr.mxu1 %v8320_v60  ;;  %v2784_v53 = vadd.f32 %v12493_v43, %v2632_v7  ;;  %v8357_v55 = vld [vmem:[%s13821_s5 + $0x238] sm:$0xff] }
 0x2a5   : > { %10042 = vmatprep.mubr.msk.f32.mxu0 %vm384_vm1, %v5756_v9  ;;  %10000 = vmatpush3.msra.mxu1 %v8320_v60  ;;  %v8356_v60 = vld [vmem:[%s13821_s5 + $0x230] sm:$0xff] }
 0x2a6   : > { %10001 = vmatprep.subr.mxu1 %v8319_v54  ;;  %9959 = vmatmul.mubr.msk.f32.gmra.mxu1 %vm384_vm1, %v5756_v9  ;;  %v9508_v43 = vpop.f32.mrf.mxu1  ;;  %v8354_v9 = vld [vmem:[%s13821_s5 + $0x220] sm:$0xff] }
 0x2a7   : > { %10002 = vmatpush3.msra.mxu1 %v8319_v54  ;;  %10005 = vmatprep.mubr.msk.f32.mxu1 %vm384_vm1, %v12154_v35  ;;  %v9580_v10 = vpop.f32.mrf.mxu0  ;;  %v2634_v12 = vadd.f32 %v9508_v43, %v12542_v33  ;;  %v8355_v33 = vld [vmem:[%s13821_s5 + $0x228] sm:$0xff]  ;;  %v5603_v43 = vld [vmem:[#allocation3 + $0x90] sm:$0xff] }
 0x2a8   : > { %10003 = vmatprep.subr.mxu1 %v8318_v15  ;;  %10043 = vmatmul.mubr.msk.f32.gmra.mxu0 %vm384_vm1, %v5757_v63  ;;  %v12631_v32 = vpop.f32.mrf.mxu1  ;;  %v8352_v63 = vld [vmem:[%s13821_s5 + $0x210] sm:$0xff] }
 0x2a9   : > { %10004 = vmatpush3.msra.mxu1 %v8318_v15  ;;  %v12633_v7 = vpop.f32.mrf.mxu0  ;;  %v2786_v35 = vadd.f32 %v12522_v40, %v2634_v12 }
 0x2aa   : > { %13859 = vst [vmem:[#allocation34_spill] sm:$0xff] %v12633_v7  ;;  %10045 = vmatprep.subr.mxu1 %v8357_v55  ;;  %10006 = vmatmul.mubr.msk.f32.vlgmr.msra.gmra.mxu1 %vm384_vm1, %v12179_v42 }
 0x2ab   : > { %10046 = vmatpush3.msra.mxu1 %v8357_v55  ;;  %10008 = vmatprep.mubr.msk.f32.mxu1 %vm384_vm1, %v12187_v25  ;;  %v8353_v25 = vld [vmem:[%s13821_s5 + $0x218] sm:$0xff] }
 0x2ac   : > { %10047 = vmatprep.subr.mxu1 %v8356_v60  ;;  %v12643_v54 = vpop.f32.mrf.mxu1  ;;  %v12648_v15 = vpop.f32.mrf.mxu0 }
 0x2ad   : > { %10048 = vmatpush3.msra.mxu1 %v8356_v60 }
 0x2ae   : > { %10049 = vmatprep.subr.mxu1 %v8355_v33  ;;  %10009 = vmatmul.mubr.msk.f32.gmra.mxu1 %vm384_vm1, %v12215_v58  ;;  %v12652_v42 = vpop.f32.mrf.mxu1  ;;  %v12659_v40 = vpop.f32.mrf.mxu0 }
 0x2af   : > { %10050 = vmatpush3.msra.mxu1 %v8355_v33  ;;  %10011 = vmatprep.mubr.msk.f32.mxu1 %vm384_vm1, %v12225_v38  ;;  %v8351_v38 = vld [vmem:[%s13821_s5 + $0x208] sm:$0xff]  ;;  %v8350_v33 = vld [vmem:[%s13821_s5 + $0x200] sm:$0xff] }
 0x2b0   : > { %10051 = vmatprep.subr.mxu1 %v8354_v9  ;;  %v12664_v55 = vpop.f32.mrf.mxu1 }
 0x2b1   : > { %10052 = vmatpush3.msra.mxu1 %v8354_v9  ;;  %v12666_v58 = vpop.f32.mrf.mxu0 }
 0x2b2   : > { %10053 = vmatprep.subr.mxu1 %v8353_v25  ;;  %10012 = vmatmul.mubr.msk.f32.gmra.mxu1 %vm384_vm1, %v12251_v19  ;;  %v12675_v12 = vpop.f32.mrf.mxu1 }
 0x2b3   : > { %10054 = vmatpush3.msra.mxu1 %v8353_v25  ;;  %10014 = vmatprep.mubr.msk.f32.mxu1 %vm384_vm1, %v12393_v4  ;;  %v12677_v60 = vpop.f32.mrf.mxu0 }
 0x2b4   : > { %10055 = vmatprep.subr.mxu1 %v8352_v63 }
 0x2b5   : > { %10056 = vmatpush3.msra.mxu1 %v8352_v63  ;;  %v9553_v19 = vpop.f32.mrf.mxu1  ;;  %v12683_v9 = vpop.f32.mrf.mxu0 }
 0x2b6   : > { %10057 = vmatprep.subr.mxu1 %v8351_v38  ;;  %10015 = vmatmul.mubr.msk.f32.gmra.mxu1 %vm384_vm1, %v5603_v43  ;;  %v2936_v4 = vadd.f32 %v9553_v19, %v2784_v53  ;;  %13860 = vst [vmem:[#allocation35_spill] sm:$0xff] %v12683_v9 }
 0x2b7   : > { %10058 = vmatpush3.msra.mxu1 %v8351_v38  ;;  %10061 = vmatprep.mubr.msk.f32.mxu1 %vm384_vm1, %v12419_v8  ;;  %v12687_v25 = vpop.f32.mrf.mxu1  ;;  %v12689_v7 = vpop.f32.mrf.mxu0 }
 0x2b8   : > { %10059 = vmatprep.subr.mxu1 %v8350_v33  ;;  %13861 = vst [vmem:[#allocation36_spill] sm:$0xff] %v12689_v7  ;;  %v12692_v63 = vadd.f32 %v12602_v2, %v2936_v4 }
 0x2b9   : > { %10060 = vmatpush3.msra.mxu1 %v8350_v33 }
 0x2ba   : > { %10062 = vmatmul.mubr.msk.f32.vlgmr.msra.gmra.mxu1 %vm384_vm1, %v12428_v23  ;;  %v9556_v53 = vpop.f32.mrf.mxu1 }
 0x2bb   : > { %10064 = vmatprep.mubr.msk.f32.mxu1 %vm384_vm1, %v12453_v59  ;;  %v12698_v38 = vpop.f32.mrf.mxu0  ;;  %v2938_v43 = vadd.f32 %v9556_v53, %v2786_v35  ;;  %v5911_v35 = vld [vmem:[#allocation3 + $0x92] sm:$0xff] }
 0x2bc   : > { %13862 = vst [vmem:[#allocation37_spill] sm:$0xff] %v12698_v38  ;;  %v12700_v8 = vpop.f32.mrf.mxu1 }
 0x2bd   : > { %v12702_v19 = vpop.f32.mrf.mxu0  ;;  %v12706_v2 = vadd.f32 %v9580_v10, %v2938_v43 }
 0x2be   : > { %13863 = vst [vmem:[#allocation38_spill] sm:$0xff] %v12702_v19  ;;  %10065 = vmatmul.mubr.msk.f32.gmra.mxu1 %vm384_vm1, %v12465_v49 }
 0x2bf   : > { %13864 = vst [vmem:[#allocation39_spill] sm:$0xff] %v12706_v2  ;;  %10067 = vmatprep.mubr.msk.f32.mxu1 %vm384_vm1, %v12487_v1 }
 0x2c0   : > { %v12710_v23 = vpop.f32.mrf.mxu1  ;;  %v12712_v33 = vpop.f32.mrf.mxu0 }
 0x2c2   : > { %10068 = vmatmul.mubr.msk.f32.gmra.mxu1 %vm384_vm1, %v12501_v3  ;;  %v12716_v59 = vpop.f32.mrf.mxu1  ;;  %v12720_v4 = vpop.f32.mrf.mxu0 }
 0x2c3   : > { %10070 = vmatprep.mubr.msk.f32.mxu1 %vm384_vm1, %v12526_v31  ;;  %13865 = vst [vmem:[#allocation40_spill] sm:$0xff] %v12720_v4 }
 0x2c4   : > { %v12722_v49 = vpop.f32.mrf.mxu1 }
 0x2c5   : > { %v12724_v10 = vpop.f32.mrf.mxu0 }
 0x2c6   : > { %13866 = vst [vmem:[#allocation41_spill] sm:$0xff] %v12724_v10  ;;  %10071 = vmatmul.mubr.msk.f32.gmra.mxu1 %vm384_vm1, %v5911_v35  ;;  %v12727_v1 = vpop.f32.mrf.mxu1  ;;  %v1076_v35 = vadd.f32 %v11984_v39, %v11883_v48 }
 0x2c7   : > { %v12729_v53 = vpop.f32.mrf.mxu0 }
 0x2c8   : > { %13867 = vst [vmem:[#allocation42_spill] sm:$0xff] %v12729_v53 }
 0x2c9   : > { %v12731_v43 = vpop.f32.mrf.mxu1  ;;  %v12733_v3 = vpop.f32.mrf.mxu0 }
 0x2ca   : > { %13868 = vst [vmem:[#allocation43_spill] sm:$0xff] %v12733_v3  ;;  %v1258_v3 = vadd.f32 %v11885_v28, %v1076_v35  ;;  %v1096_v28 = vadd.f32 %v12027_v29, %v11939_v30  ;;  %v1106_v30 = vadd.f32 %v12060_v24, %v11964_v5 }
 0x2cb   : > { %v12735_v19 = vpop.f32.mrf.mxu1  ;;  %v12737_v31 = vpop.f32.mrf.mxu0 }
 0x2cc   : > { %13869 = vst [vmem:[#allocation44_spill] sm:$0xff] %v12737_v31 }
 0x2ce   : > { %v12739_v38 = vpop.f32.mrf.mxu1 }
 0x2cf   : > { %13870 = vst [vmem:[#allocation45_spill] sm:$0xff] %v12739_v38  ;;  %v12741_v2 = vpop.f32.mrf.mxu0 }
 0x2d0   : > { %13871 = vst [vmem:[#allocation46_spill] sm:$0xff] %v12741_v2  ;;  %v12743_v7 = vpop.f32.mrf.mxu1  ;;  %v1086_v2 = vadd.f32 %v12008_v11, %v11914_v20 }
 0x2d1   : > { %13872 = vst [vmem:[#allocation47_spill] sm:$0xff] %v12743_v7  ;;  %v12745_v10 = vpop.f32.mrf.mxu0  ;;  %v1410_v7 = vadd.f32 %v12087_v26, %v1258_v3 }
 0x2d2   : > { %13873 = vst [vmem:[#allocation48_spill] sm:$0xff] %v12745_v10  ;;  %v1260_v35 = vadd.f32 %v11916_v21, %v1086_v2 }
 0x2d4   : > { %v12749_v53 = vpop.f32.mrf.mxu1  ;;  %v12751_v9 = vpop.f32.mrf.mxu0  ;;  %v1412_v20 = vadd.f32 %v12112_v13, %v1260_v35 }
 0x2d5   : > { %13874 = vst [vmem:[#allocation49_spill] sm:$0xff] %v12751_v9 }
 0x2d6   : > { %v12754_v4 = vpop.f32.mrf.mxu1  ;;  %v12756_v31 = vpop.f32.mrf.mxu0 }
 0x2d7   : > { %13875 = vst [vmem:[#allocation50_spill] sm:$0xff] %v12756_v31  ;;  %v1562_v31 = vadd.f32 %v11994_v62, %v1410_v7  ;;  %v1564_v62 = vadd.f32 %v12017_v36, %v1412_v20  ;;  %v13884_v20 = vld [vmem:[#allocation26_spill] sm:$0xff] }
 0x2d8   : > { %v12761_v38 = vpop.f32.mrf.mxu1 }
 0x2d9   : > { %v12763_v10 = vpop.f32.mrf.mxu0  ;;  %v1715_v11 = vadd.f32 %v12200_v45, %v1562_v31  ;;  %v1717_v7 = vadd.f32 %v12230_v44, %v1564_v62  ;;  %v13885_v62 = vld [vmem:[#allocation11_spill] sm:$0xff] }
 0x2da   : > { %13876 = vst [vmem:[#allocation51_spill] sm:$0xff] %v12763_v10  ;;  %v12765_v48 = vpop.f32.mrf.mxu1  ;;  %v1262_v10 = vadd.f32 %v11941_v41, %v1096_v28  ;;  %v1264_v41 = vadd.f32 %v11971_v22, %v1106_v30 }
 0x2db   : > { %v12767_v39 = vpop.f32.mrf.mxu0  ;;  %v1867_v29 = vadd.f32 %v12094_v14, %v1715_v11  ;;  %v1869_v14 = vadd.f32 %v12114_v47, %v1717_v7 }
 0x2dc   : > { %13877 = vst [vmem:[#allocation52_spill] sm:$0xff] %v12767_v39  ;;  %v1414_v21 = vadd.f32 %v12132_v0, %v1262_v10  ;;  %v1416_v36 = vadd.f32 %v12167_v52, %v1264_v41  ;;  %v13882_v0 = vld [vmem:[#allocation14_spill] sm:$0xff]  ;;  %v13886_v52 = vld [vmem:[#allocation12_spill] sm:$0xff] }
 0x2dd   : > { %v12773_v9 = vpop.f32.mrf.mxu1  ;;  %v12777_v26 = vpop.f32.mrf.mxu0  ;;  %v2019_v2 = vadd.f32 %v12313_v6, %v1867_v29  ;;  %v13883_v6 = vld [vmem:[#allocation20_spill] sm:$0xff]  ;;  %v13887_v29 = vld [vmem:[#allocation17_spill] sm:$0xff]  ;;  %v13889_v41 = vld [vmem:[#allocation22_spill] sm:$0xff] }
 0x2de   : > { %13878 = vst [vmem:[#allocation53_spill] sm:$0xff] %v12777_v26  ;;  %v1566_v5 = vadd.f32 %v12042_v37, %v1414_v21  ;;  %v2021_v22 = vadd.f32 %v13883_v6, %v1869_v14  ;;  %v1568_v37 = vadd.f32 %v13885_v62, %v1416_v36  ;;  %v13891_v6 = vld [vmem:[#allocation19_spill] sm:$0xff]  ;;  %v13893_v36 = vld [vmem:[#allocation28_spill] sm:$0xff] }
 0x2df   : > { %v12779_v3 = vpop.f32.mrf.mxu1  ;;  %v12782_v39 = vpop.f32.mrf.mxu0  ;;  %v2171_v10 = vadd.f32 %v13882_v0, %v2019_v2  ;;  %v13890_v0 = vld [vmem:[#allocation15_spill] sm:$0xff] }
 0x2e0   : > { %13879 = vst [vmem:[#allocation54_spill] sm:$0xff] %v12782_v39  ;;  %v1719_v24 = vadd.f32 %v12253_v18, %v1566_v5  ;;  %v1721_v47 = vadd.f32 %v13887_v29, %v1568_v37  ;;  %v2173_v14 = vadd.f32 %v13890_v0, %v2021_v22  ;;  %v13899_v26 = vld [vmem:[#allocation27_spill] sm:$0xff] }
 0x2e1   : > { %v2323_v11 = vadd.f32 %v13884_v20, %v2171_v10 }
 0x2e2   : > { %v12789_v13 = vpop.f32.mrf.mxu1  ;;  %v1871_v18 = vadd.f32 %v13886_v52, %v1719_v24  ;;  %v2325_v62 = vadd.f32 %v13893_v36, %v2173_v14  ;;  %v13894_v52 = vld [vmem:[#allocation13_spill] sm:$0xff] }
 0x2e3   : > { %v12791_v45 = vpop.f32.mrf.mxu0  ;;  %v2475_v10 = vadd.f32 %v13891_v6, %v2323_v11  ;;  %v1873_v37 = vadd.f32 %v13894_v52, %v1721_v47  ;;  %v13897_v11 = vld [vmem:[#allocation30_spill] sm:$0xff]  ;;  %v13898_v6 = vld [vmem:[#allocation21_spill] sm:$0xff]  ;;  %v6120_v47 = vld [vmem:[%s13823_s7 + $0x58] sm:$0xff] }
 0x2e4   : > { %13880 = vst [vmem:[#allocation55_spill] sm:$0xff] %v12791_v45  ;;  %v12796_v31 = vpop.f32.mrf.mxu1  ;;  %v2023_v5 = vadd.f32 %v13889_v41, %v1871_v18  ;;  %v13895_v45 = vld [vmem:[#allocation16_spill] sm:$0xff]  ;;  %10109 = vmatprep.subr.mxu1 %v6120_v47 }
 0x2e5   : > { %v12798_v28 = vpop.f32.mrf.mxu0  ;;  %v2627_v24 = vadd.f32 %v12556_v51, %v2475_v10  ;;  %v13896_v18 = vld [vmem:[#allocation24_spill] sm:$0xff]  ;;  %v2932_v51 = vadd.f32 %v12643_v54, %v12566_v50  ;;  %10110 = vmatpush3.msra.mxu1 %v6120_v47  ;;  %v8378_v50 = vld [vmem:[%s13823_s7 + $0xb0] sm:$0xff] }
 0x2e6   : > { %13881 = vst [vmem:[#allocation56_spill] sm:$0xff] %v12798_v28  ;;  %v2175_v39 = vadd.f32 %v13895_v45, %v2023_v5  ;;  %v2025_v22 = vadd.f32 %v13896_v18, %v1873_v37  ;;  %v8379_v45 = vld [vmem:[%s13823_s7 + $0xb8] sm:$0xff]  ;;  %v13901_v54 = vld [vmem:[#allocation23_spill] sm:$0xff] }
 0x2e7   : > { %v2779_v14 = vadd.f32 %v13899_v26, %v2627_v24  ;;  %10073 = vmatprep.subr.mxu0 %v8379_v45  ;;  %v13900_v26 = vld [vmem:[#allocation18_spill] sm:$0xff]  ;;  %v3084_v37 = vadd.f32 %v12552_v57, %v2932_v51  ;;  %v2934_v51 = vadd.f32 %v12664_v55, %v12592_v61  ;;  %v13905_v61 = vld [vmem:[#allocation25_spill] sm:$0xff] }
 0x2e8   : > { %v12805_v35 = vpop.f32.mrf.mxu1  ;;  %v12807_v44 = vpop.f32.mrf.mxu0  ;;  %v2327_v0 = vadd.f32 %v13897_v11, %v2175_v39  ;;  %v2177_v10 = vadd.f32 %v13900_v26, %v2025_v22  ;;  %10074 = vmatpush3.msra.mxu0 %v8379_v45  ;;  %v8377_v11 = vld [vmem:[%s13823_s7 + $0xa8] sm:$0xff]  ;;  %v8376_v26 = vld [vmem:[%s13823_s7 + $0xa0] sm:$0xff] }
 0x2e9   : > { %v2931_v39 = vadd.f32 %v12652_v42, %v2779_v14  ;;  %10075 = vmatprep.subr.mxu0 %v8378_v50  ;;  %v13903_v14 = vld [vmem:[#allocation29_spill] sm:$0xff]  ;;  %v3237_v47 = vadd.f32 %v12710_v23, %v3084_v37 }
 0x2ea   : > { %v12811_v30 = vpop.f32.mrf.mxu1  ;;  %v12814_v21 = vpop.f32.mrf.mxu0  ;;  %v2479_v42 = vadd.f32 %v13901_v54, %v2327_v0  ;;  %10076 = vmatpush3.msra.mxu0 %v8378_v50  ;;  %v6118_v0 = vld [vmem:[%s13823_s7 + $0x48] sm:$0xff]  ;;  %v6116_v50 = vld [vmem:[%s13823_s7 + $0x38] sm:$0xff] }
 0x2eb   : > { %v3083_v57 = vadd.f32 %v12563_v17, %v2931_v39  ;;  %10077 = vmatprep.subr.mxu0 %v8377_v11  ;;  %v13904_v39 = vmov 0.0  }
 0x2ec   : > { %v12818_v7 = vpop.f32.mrf.mxu1  ;;  %10078 = vmatpush3.msra.mxu0 %v8377_v11  ;;  %412 = vst.msk [vmem:[#allocation4 + $0x20] sm:$0xff] %vm406_vm10, %v13904_v39  ;;  %407 = vst.msk [vmem:[#allocation4] sm:$0xff] %vm406_vm10, %v13904_v39  ;;  %v8374_v11 = vld [vmem:[%s13823_s7 + $0x90] sm:$0xff] }
 0x2ed   : > { %v12820_v2 = vpop.f32.mrf.mxu0  ;;  %413 = vst.msk [vmem:[#allocation4 + $0x28] sm:$0x3] %vm408_vm11, %v13904_v39  ;;  %409 = vst.msk [vmem:[#allocation4 + $0x8] sm:$0x3] %vm408_vm11, %v13904_v39  ;;  %10079 = vmatprep.subr.mxu0 %v8376_v26 }
 0x2ee   : > { %13888 = vst [vmem:[#allocation14_spill] sm:$0xff] %v12820_v2  ;;  %v12825_v20 = vpop.f32.mrf.mxu1  ;;  %410 = vst.msk [vmem:[#allocation4 + $0x10] sm:$0xff] %vm406_vm10, %v13904_v39  ;;  %10080 = vmatpush3.msra.mxu0 %v8376_v26 }
 0x2ef   : > { %v12827_v28 = vpop.f32.mrf.mxu0  ;;  %411 = vst.msk [vmem:[#allocation4 + $0x18] sm:$0x3] %vm408_vm11, %v13904_v39  ;;  %415 = vst.msk [vmem:[#allocation4 + $0x38] sm:$0x3] %vm408_vm11, %v13904_v39 }
 0x2f0   : > { %13892 = vst [vmem:[#allocation20_spill] sm:$0xff] %v12827_v28  ;;  %v2477_v28 = vadd.f32 %v13898_v6, %v2325_v62  ;;  %v2631_v6 = vadd.f32 %v12609_v46, %v2479_v42  ;;  %v6117_v46 = vld [vmem:[%s13823_s7 + $0x40] sm:$0xff]  ;;  %414 = vst.msk [vmem:[#allocation4 + $0x30] sm:$0xff] %vm406_vm10, %v13904_v39 }
 0x2f1   : > { %v12832_v29 = vpop.f32.mrf.mxu1  ;;  %v12835_v2 = vpop.f32.mrf.mxu0  ;;  %416 = vst.msk [vmem:[#allocation4 + $0x40] sm:$0xff] %vm406_vm10, %v13904_v39  ;;  %418 = vst.msk [vmem:[#allocation4 + $0x50] sm:$0xff] %vm406_vm10, %v13904_v39 }
 0x2f2   : > { %v2629_v5 = vadd.f32 %v12585_v16, %v2477_v28  ;;  %v6119_v16 = vld [vmem:[%s13823_s7 + $0x50] sm:$0xff]  ;;  %v13902_v28 = vld [vmem:[#allocation32_spill] sm:$0xff]  ;;  %417 = vst.msk [vmem:[#allocation4 + $0x48] sm:$0x3] %vm408_vm11, %v13904_v39  ;;  %419 = vst.msk [vmem:[#allocation4 + $0x58] sm:$0x3] %vm408_vm11, %v13904_v39 }
 0x2f3   : > { %v12838_v41 = vpop.f32.mrf.mxu1  ;;  %v12843_v36 = vpop.f32.mrf.mxu0  ;;  %10111 = vmatprep.subr.mxu1 %v6119_v16  ;;  %v2329_v52 = vadd.f32 %v13902_v28, %v2177_v10  ;;  %420 = vst.msk [vmem:[#allocation4 + $0x60] sm:$0xff] %vm406_vm10, %v13904_v39  ;;  %422 = vst.msk [vmem:[#allocation4 + $0x70] sm:$0xff] %vm406_vm10, %v13904_v39  ;;  %v8375_v10 = vld [vmem:[%s13823_s7 + $0x98] sm:$0xff]  ;;  %v3086_v28 = vadd.f32 %v12575_v27, %v2934_v51 }
 0x2f4   : > { %10112 = vmatpush3.msra.mxu1 %v6119_v16  ;;  %v2781_v45 = vadd.f32 %v13903_v14, %v2629_v5  ;;  %421 = vst.msk [vmem:[#allocation4 + $0x68] sm:$0x3] %vm408_vm11, %v13904_v39  ;;  %423 = vst.msk [vmem:[#allocation4 + $0x78] sm:$0x3] %vm408_vm11, %v13904_v39  ;;  %v13906_v16 = vld [vmem:[#allocation31_spill] sm:$0xff]  ;;  %10081 = vmatprep.subr.mxu0 %v8375_v10 }
 0x2f5   : > { %10113 = vmatprep.subr.mxu1 %v6118_v0  ;;  %424 = vst.msk [vmem:[#allocation4 + $0x80] sm:$0xff] %vm406_vm10, %v13904_v39  ;;  %426 = vst.msk [vmem:[#allocation4 + $0x90] sm:$0xff] %vm406_vm10, %v13904_v39  ;;  %v2481_v55 = vadd.f32 %v13905_v61, %v2329_v52  ;;  %v2783_v54 = vadd.f32 %v13906_v16, %v2631_v6  ;;  %v3389_v52 = vadd.f32 %v12648_v15, %v3237_v47  ;;  %v8372_v47 = vld [vmem:[%s13823_s7 + $0x80] sm:$0xff] }
 0x2f6   : > { %v12856_v62 = vpop.f32.mrf.mxu1  ;;  %10114 = vmatpush3.msra.mxu1 %v6118_v0  ;;  %v2933_v17 = vadd.f32 %v12675_v12, %v2781_v45  ;;  %425 = vst.msk [vmem:[#allocation4 + $0x88] sm:$0x3] %vm408_vm11, %v13904_v39  ;;  %427 = vst.msk [vmem:[#allocation4 + $0x98] sm:$0x3] %vm408_vm11, %v13904_v39  ;;  %v3236_v12 = vadd.f32 %v12716_v59, %v3083_v57  ;;  %10082 = vmatpush3.msra.mxu0 %v8375_v10  ;;  %v6115_v0 = vld [vmem:[%s13823_s7 + $0x30] sm:$0xff]  ;;  %v8373_v45 = vld [vmem:[%s13823_s7 + $0x88] sm:$0xff] }
 0x2f7   : > { %v12858_v24 = vpop.f32.mrf.mxu0  ;;  %10115 = vmatprep.subr.mxu1 %v6117_v46  ;;  %v2633_v59 = vadd.f32 %v12631_v32, %v2481_v55  ;;  %v2935_v6 = vadd.f32 %v12687_v25, %v2783_v54  ;;  %10083 = vmatprep.subr.mxu0 %v8374_v11  ;;  %v3239_v27 = vadd.f32 %v12722_v49, %v3086_v28  ;;  %v6114_v25 = vld [vmem:[%s13823_s7 + $0x28] sm:$0xff]  ;;  %v13907_v49 = vld [vmem:[#allocation33_spill] sm:$0xff]  ;;  %v8371_v55 = vld [vmem:[%s13823_s7 + $0x78] sm:$0xff] }
 0x2f8   : > { %v12869_v18 = vpop.f32.mrf.mxu1  ;;  %10116 = vmatpush3.msra.mxu1 %v6117_v46  ;;  %v3085_v32 = vadd.f32 %v12587_v34, %v2933_v17  ;;  %v3541_v15 = vadd.f32 %v12749_v53, %v3389_v52  ;;  %v3388_v14 = vadd.f32 %v12659_v40, %v3236_v12  ;;  %10084 = vmatpush3.msra.mxu0 %v8374_v11  ;;  %v6110_v28 = vld [vmem:[%s13823_s7 + $0x8] sm:$0xff]  ;;  %v13910_v11 = vld [vmem:[#allocation35_spill] sm:$0xff] }
 0x2f9   : > { %v12871_v22 = vpop.f32.mrf.mxu0  ;;  %10117 = vmatprep.subr.mxu1 %v6116_v50  ;;  %10085 = vmatprep.subr.mxu0 %v8373_v45  ;;  %v2785_v40 = vadd.f32 %v13907_v49, %v2633_v59  ;;  %v3087_v26 = vadd.f32 %v12613_v56, %v2935_v6  ;;  %v3391_v39 = vadd.f32 %v12666_v58, %v3239_v27  ;;  %v6112_v56 = vld [vmem:[%s13823_s7 + $0x18] sm:$0xff]  ;;  %v8369_v59 = vld [vmem:[%s13823_s7 + $0x68] sm:$0xff]  ;;  %v13912_v27 = vld [vmem:[#allocation41_spill] sm:$0xff] }
 0x2fa   : > { %10118 = vmatpush3.msra.mxu1 %v6116_v50  ;;  %v3238_v34 = vadd.f32 %v12727_v1, %v3085_v32  ;;  %v3540_v53 = vadd.f32 %v12754_v4, %v3388_v14  ;;  %10086 = vmatpush3.msra.mxu0 %v8373_v45  ;;  %v6113_v1 = vld [vmem:[%s13823_s7 + $0x20] sm:$0xff]  ;;  %v3693_v61 = vadd.f32 %v12712_v33, %v3541_v15  ;;  %v13908_v50 = vld [vmem:[#allocation40_spill] sm:$0xff]  ;;  %v13909_v52 = vld [vmem:[#allocation34_spill] sm:$0xff] }
 0x2fb   : > { %10119 = vmatprep.subr.mxu1 %v6115_v0  ;;  %10087 = vmatprep.subr.mxu0 %v8372_v47  ;;  %v2937_v4 = vadd.f32 %v12700_v8, %v2785_v40  ;;  %v3241_v12 = vadd.f32 %v12731_v43, %v12692_v63  ;;  %v3240_v10 = vadd.f32 %v12735_v19, %v3087_v26  ;;  %v8370_v63 = vld [vmem:[%s13823_s7 + $0x70] sm:$0xff]  ;;  %v13913_v14 = vld [vmem:[#allocation49_spill] sm:$0xff] }
 0x2fc   : > { %v12892_v5 = vpop.f32.mrf.mxu1  ;;  %v12936_v23 = vpop.f32.mrf.mxu0  ;;  %10120 = vmatpush3.msra.mxu1 %v6115_v0  ;;  %10088 = vmatpush3.msra.mxu0 %v8372_v47  ;;  %v3390_v8 = vadd.f32 %v12677_v60, %v3238_v34  ;;  %v3543_v58 = vadd.f32 %v12761_v38, %v3391_v39  ;;  %v3845_v33 = vadd.f32 %v12805_v35, %v3693_v61  ;;  %v6111_v60 = vld [vmem:[%s13823_s7 + $0x10] sm:$0xff]  ;;  %v6109_v34 = vld [vmem:[%s13823_s7] sm:$0xff]  ;;  %v13917_v61 = vld [vmem:[#allocation50_spill] sm:$0xff] }
 0x2fd   : > { %10121 = vmatprep.subr.mxu1 %v6114_v25  ;;  %10089 = vmatprep.subr.mxu0 %v8371_v55  ;;  %v3692_v16 = vadd.f32 %v13908_v50, %v3540_v53  ;;  %v3393_v0 = vadd.f32 %v13910_v11, %v3241_v12  ;;  %v13914_v49 = vld [vmem:[#allocation39_spill] sm:$0xff]  ;;  %v13915_v40 = vld [vmem:[#allocation45_spill] sm:$0xff]  ;;  %v13060_v50 = vld [vmem:[%s13823_s7 + $0x178] sm:$0xff] }
 0x2fe   : > { %v12945_v42 = vpop.f32.mrf.mxu1  ;;  %v12950_v37 = vpop.f32.mrf.mxu0  ;;  %10122 = vmatpush3.msra.mxu1 %v6114_v25  ;;  %10090 = vmatpush3.msra.mxu0 %v8371_v55  ;;  %v3542_v19 = vadd.f32 %v12765_v48, %v3390_v8  ;;  %v3089_v48 = vadd.f32 %v13909_v52, %v2937_v4  ;;  %v3695_v15 = vadd.f32 %v13912_v27, %v3543_v58  ;;  %v8368_v25 = vld [vmem:[%s13823_s7 + $0x60] sm:$0xff]  ;;  %v13919_v58 = vld [vmem:[#allocation47_spill] sm:$0xff]  ;;  %v13924_v11 = vld [vmem:[#allocation38_spill] sm:$0xff] }
 0x2ff   : > { %10123 = vmatprep.subr.mxu1 %v6113_v1  ;;  %10091 = vmatprep.subr.mxu0 %v8370_v63  ;;  %v3844_v38 = vadd.f32 %v12811_v30, %v3692_v16  ;;  %v13911_v30 = vld [vmem:[#allocation36_spill] sm:$0xff]  ;;  %v3998_v45 = vadd.f32 %v13913_v14, %v3845_v33  ;;  %v3243_v53 = vadd.f32 %v13915_v40, %v13914_v49  ;;  %v6101_v8 = vld [vmem:[#allocation4] sm:$0xff] }
 0x300   : > { %10124 = vmatpush3.msra.mxu1 %v6113_v1  ;;  %10092 = vmatpush3.msra.mxu0 %v8370_v63  ;;  %v3392_v32 = vadd.f32 %v13911_v30, %v3240_v10  ;;  %v3545_v47 = vadd.f32 %v12773_v9, %v3393_v0  ;;  %v13916_v1 = vld [vmem:[#allocation42_spill] sm:$0xff]  ;;  %v3847_v4 = vadd.f32 %v12818_v7, %v3695_v15  ;;  %v13050_v9 = vld [vmem:[%s13823_s7 + $0x118] sm:$0xff] }
 0x301   : > { %v12970_v57 = vpop.f32.mrf.mxu1  ;;  %10125 = vmatprep.subr.mxu1 %v6112_v56  ;;  %10093 = vmatprep.subr.mxu0 %v8369_v59  ;;  %v3694_v26 = vadd.f32 %v13916_v1, %v3542_v19  ;;  %v4150_v39 = vadd.f32 %v12892_v5, %v3998_v45  ;;  %v3997_v55 = vadd.f32 %v13917_v61, %v3844_v38  ;;  %v6121_v10 = vld [vmem:[#allocation4 + $0x1] sm:$0xff]  ;;  %v13922_v19 = vld [vmem:[#allocation43_spill] sm:$0xff]  ;;  %v13925_v0 = vld [vmem:[#allocation44_spill] sm:$0xff] }
 0x302   : > { %v12972_v51 = vpop.f32.mrf.mxu0  ;;  %10126 = vmatpush3.msra.mxu1 %v6112_v56  ;;  %10094 = vmatpush3.msra.mxu0 %v8369_v59  ;;  %13918 = vst [vmem:[#allocation26_spill] sm:$0xff] %v13050_v9  ;;  %v3242_v33 = vadd.f32 %v13919_v58, %v3089_v48  ;;  %v3544_v7 = vadd.f32 %v12779_v3, %v3392_v32  ;;  %13920 = vst [vmem:[#allocation11_spill] sm:$0xff] %v13060_v50  ;;  %v13921_v3 = vld [vmem:[#allocation37_spill] sm:$0xff]  ;;  %v13923_v59 = vld [vmem:[#allocation51_spill] sm:$0xff] }
 0x303   : > { %v12983_v46 = vpop.f32.mrf.mxu1  ;;  %10127 = vmatprep.subr.mxu1 %v6111_v60  ;;  %10095 = vmatprep.subr.mxu0 %v8368_v25  ;;  %v3846_v5 = vadd.f32 %v12825_v20, %v3694_v26  ;;  %v4149_v16 = vadd.f32 %v12945_v42, %v3997_v55  ;;  %v3395_v20 = vadd.f32 %v13921_v3, %v3243_v53  ;;  %v13926_v32 = vld [vmem:[#allocation52_spill] sm:$0xff]  ;;  %v13088_v53 = vld [vmem:[%s13820_s4] ss:$0 sm:$0xff]  ;;  %v13927_v26 = vld [vmem:[#allocation46_spill] sm:$0xff] }
 0x304   : > { %v12985_v17 = vpop.f32.mrf.mxu0  ;;  %10128 = vmatpush3.msra.mxu1 %v6111_v60  ;;  %10096 = vmatpush3.msra.mxu0 %v8368_v25  ;;  %v3697_v38 = vadd.f32 %v13922_v19, %v3545_v47  ;;  %v4302_v52 = vadd.f32 %v12807_v44, %v4150_v39  ;;  %v3394_v42 = vadd.f32 %v13924_v11, %v3242_v33  ;;  %v13929_v61 = vld [vmem:[#allocation14_spill] sm:$0xff] }
 0x305   : > { %10129 = vmatprep.subr.mxu1 %v6110_v28  ;;  %10097 = vmatprep.mubr.msk.f32.mxu0 %vm406_vm10, %v6121_v10  ;;  %v3547_v48 = vadd.f32 %v12789_v13, %v3395_v20  ;;  %v3696_v30 = vadd.f32 %v13925_v0, %v3544_v7  ;;  %v3999_v27 = vadd.f32 %v13926_v32, %v3846_v5  ;;  %v13930_v10 = vld [vmem:[#allocation48_spill] sm:$0xff]  ;;  %v13931_v58 = vld [vmem:[#allocation54_spill] sm:$0xff]  ;;  %v13933_v0 = vld [vmem:[#allocation55_spill] sm:$0xff] }
 0x306   : > { %10130 = vmatpush3.msra.mxu1 %v6110_v28  ;;  %10133 = vmatprep.mubr.msk.f32.mxu1 %vm406_vm10, %v6101_v8  ;;  %v4000_v28 = vadd.f32 %v13923_v59, %v3847_v4  ;;  %v3849_v14 = vadd.f32 %v12832_v29, %v3697_v38  ;;  %v4301_v49 = vadd.f32 %v12814_v21, %v4149_v16  ;;  %v13928_v21 = vld [vmem:[#allocation53_spill] sm:$0xff]  ;;  %v13932_v5 = vld [vmem:[#allocation20_spill] sm:$0xff] }
 0x307   : > { %v13003_v54 = vpop.f32.mrf.mxu1  ;;  %v13012_v43 = vpop.f32.mrf.mxu0  ;;  %10131 = vmatprep.subr.mxu1 %v6109_v34  ;;  %10145 = vmatprep.subr.mxu0 %v13050_v9  ;;  %v3546_v44 = vadd.f32 %v12796_v31, %v3394_v42  ;;  %v3848_v13 = vadd.f32 %v12838_v41, %v3696_v30  ;;  %v4151_v40 = vadd.f32 %v12983_v46, %v3999_v27  ;;  %v13097_v31 = vld [vmem:[%s13820_s4 + $0x1] ss:$0 sm:$0xff] }
 0x308   : > { %10132 = vmatpush3.msra.mxu1 %v6109_v34  ;;  %v4152_v45 = vadd.f32 %v12970_v57, %v4000_v28  ;;  %v3699_v4 = vadd.f32 %v13927_v26, %v3547_v48  ;;  %v4002_v41 = vadd.f32 %v13928_v21, %v3849_v14 }
 0x309   : > { %v13015_v35 = vpop.f32.mrf.mxu1  ;;  %v13025_v6 = vpop.f32.mrf.mxu0  ;;  %10181 = vmatprep.subr.mxu1 %v13060_v50  ;;  %v3698_v8 = vadd.f32 %v13930_v10, %v3546_v44  ;;  %v4001_v33 = vadd.f32 %v13931_v58, %v3848_v13  ;;  %v4303_v16 = vadd.f32 %v13932_v5, %v4151_v40 }
 0x30a   : > { %v4304_v55 = vadd.f32 %v13929_v61, %v4152_v45  ;;  %v4154_v3 = vadd.f32 %v13003_v54, %v4002_v41 }
 0x30b   : > { %v3850_v59 = vadd.f32 %v12869_v18, %v3698_v8 }
 0x30c   : > { %v13043_v56 = vpop.f32.mrf.mxu1 }
 0x30d   : > { %v13045_v12 = vpop.f32.mrf.mxu0 }
 0x30e   : > { %v13063_v63 = vpop.f32.mrf.mxu1 }
 0x30f   : > { %v13065_v60 = vpop.f32.mrf.mxu0 }
 0x312   : > { %v9787_v15 = vpop.f32.mrf.mxu1  ;;  %v13079_v34 = vpop.f32.mrf.mxu0 }
 0x313   : > { %v4454_v25 = vadd.f32 %v9787_v15, %v4302_v52  ;;  %v4306_v15 = vadd.f32 %v12835_v2, %v4154_v3 }
 0x314   : > { %v4414_v47 = vpop.f32.mrf.mxu1  ;;  %v13091_v1 = vpop.f32.mrf.mxu0 }
 0x315   : > { %v4606_v29 = vadd.f32 %v12936_v23, %v4454_v25  ;;  %v4453_v57 = vadd.f32 %v4414_v47, %v4301_v49  ;;  %v3851_v23 = vadd.f32 %v12856_v62, %v3699_v4  ;;  %v4153_v62 = vadd.f32 %v13015_v35, %v4001_v33  ;;  %v13934_v35 = vld [vmem:[#allocation56_spill] sm:$0xff] }
 0x316   : > { %v4003_v14 = vadd.f32 %v13934_v35, %v3850_v59 }
 0x317   : > { %v4619_v46 = vmul.f32 %v13088_v53, %v4606_v29  ;;  %v4605_v39 = vadd.f32 %v12950_v37, %v4453_v57  ;;  %v4004_v30 = vadd.f32 %v13933_v0, %v3851_v23  ;;  %v4305_v45 = vadd.f32 %v12843_v36, %v4153_v62 }
 0x318   : > { %v9790_v7 = vpop.f32.mrf.mxu1  ;;  %v13109_v38 = vpop.f32.mrf.mxu0  ;;  %v4155_v2 = vadd.f32 %v13063_v63, %v4003_v14 }
 0x319   : > { %v4618_v20 = vmul.f32 %v13088_v53, %v4605_v39  ;;  %v4456_v19 = vadd.f32 %v9790_v7, %v4304_v55  ;;  %v4632_v37 = vadd.f32 %v13097_v31, %v4619_v46  ;;  %v4156_v25 = vadd.f32 %v13043_v56, %v4004_v30 }
 0x31a   : > { %v4424_v28 = vpop.f32.mrf.mxu1  ;;  %v13115_v11 = vpop.f32.mrf.mxu0  ;;  %v4307_v61 = vadd.f32 %v12871_v22, %v4155_v2 }
 0x31b   : > { %v4608_v52 = vadd.f32 %v12972_v51, %v4456_v19  ;;  %v4455_v48 = vadd.f32 %v4424_v28, %v4303_v16  ;;  %v4640_v42 = vmax.f32 %v4632_v37, 0.0  ;;  %v4631_v54 = vadd.f32 %v13097_v31, %v4618_v20 }
 0x31c   : > { %v4308_v21 = vadd.f32 %v12858_v24, %v4156_v25 }
 0x31d   : > { %v4621_v32 = vmul.f32 %v13088_v53, %v4608_v52  ;;  %v4607_v27 = vadd.f32 %v12985_v17, %v4455_v48  ;;  %4657 = vrot.lane.b32.xlu1 %v4640_v42, %s10512_s21  ;;  %v4639_v18 = vmax.f32 %v4631_v54, 0.0  ;;  %v13935_v52 = vld [vmem:[#allocation9_spill] sm:$0xff]  ;;  %v13936_v42 = vld [vmem:[#allocation10_spill] sm:$0xff] }
 0x31e   : > { %v9793_v51 = vpop.f32.mrf.mxu1  ;;  %v13127_v13 = vpop.f32.mrf.mxu0  ;;  %v7750_v48 = vmax.f32 %v13935_v52, 0.0  ;;  %v7749_v54 = vmax.f32 %v13936_v42, 0.0 }
 0x31f   : > { %v4620_v49 = vmul.f32 %v13088_v53, %v4607_v27  ;;  %v4458_v44 = vadd.f32 %v9793_v51, %v4306_v15  ;;  %4655 = vrot.lane.b32.xlu0 %v4639_v18, %s10512_s21  ;;  %v4634_v17 = vadd.f32 %v13097_v31, %v4621_v32 }
 0x320   : > { %v4434_v40 = vpop.f32.mrf.mxu1  ;;  %v13133_v57 = vpop.f32.mrf.mxu0 }
 0x321   : > { %v4610_v47 = vadd.f32 %v13012_v43, %v4458_v44  ;;  %v4457_v29 = vadd.f32 %v4434_v40, %v4305_v45  ;;  %v4642_v36 = vmax.f32 %v4634_v17, 0.0  ;;  %v4633_v56 = vadd.f32 %v13097_v31, %v4620_v49 }
 0x323   : > { %v4623_v26 = vmul.f32 %v13088_v53, %v4610_v47  ;;  %v4609_v4 = vadd.f32 %v13025_v6, %v4457_v29  ;;  %4661 = vrot.lane.b32.xlu1 %v4642_v36, %s10512_s21  ;;  %v4641_v41 = vmax.f32 %v4633_v56, 0.0 }
 0x324   : > { %v9796_v46 = vpop.f32.mrf.mxu1  ;;  %v13141_v43 = vpop.f32.mrf.mxu0 }
 0x325   : > { %v4622_v63 = vmul.f32 %v13088_v53, %v4609_v4  ;;  %v4460_v39 = vadd.f32 %v9796_v46, %v4308_v21  ;;  %4659 = vrot.lane.b32.xlu0 %v4641_v41, %s10512_s21  ;;  %v4636_v55 = vadd.f32 %v13097_v31, %v4623_v26 }
 0x326   : > { %v4444_v23 = vpop.f32.mrf.mxu1  ;;  %v13147_v24 = vpop.f32.mrf.mxu0 }
 0x327   : > { %v4612_v6 = vadd.f32 %v13045_v12, %v4460_v39  ;;  %v4459_v10 = vadd.f32 %v4444_v23, %v4307_v61  ;;  %v4644_v8 = vmax.f32 %v4636_v55, 0.0  ;;  %v4635_v58 = vadd.f32 %v13097_v31, %v4622_v63 }
 0x329   : > { %v4625_v33 = vmul.f32 %v13088_v53, %v4612_v6  ;;  %v4611_v7 = vadd.f32 %v13065_v60, %v4459_v10  ;;  %4665 = vrot.lane.b32.xlu1 %v4644_v8, %s10512_s21  ;;  %v4643_v22 = vmax.f32 %v4635_v58, 0.0 }
 0x32a   : > { %v9839_v5 = vpop.f32.mrf.mxu1  ;;  %v9923_v3 = vpop.f32.mrf.mxu0 }
 0x32b   : > { %v4624_v16 = vmul.f32 %v13088_v53, %v4611_v7  ;;  %4663 = vrot.lane.b32.xlu0 %v4643_v22, %s10512_s21  ;;  %v4638_v12 = vadd.f32 %v13097_v31, %v4625_v33  ;;  %v4946_v10 = vadd.f32 %v13079_v34, %v9839_v5 }
 0x32c   : > { %v4811_v20 = vpop.f32.mrf.mxu1  ;;  %v5240_v19 = vpop.f32.mrf.mxu0 }
 0x32d   : > { %v4646_v37 = vmax.f32 %v4638_v12, 0.0  ;;  %v4637_v59 = vadd.f32 %v13097_v31, %v4624_v16  ;;  %v4941_v58 = vadd.f32 %v13091_v1, %v4811_v20 }
 0x32f   : > { %4669 = vrot.lane.b32.xlu1 %v4646_v37, %s10512_s21  ;;  %v4645_v62 = vmax.f32 %v4637_v59, 0.0 }
 0x330   : > { %v9842_v60 = vpop.f32.mrf.mxu1  ;;  %v9926_v28 = vpop.f32.mrf.mxu0 }
 0x331   : > { %4667 = vrot.lane.b32.xlu0 %v4645_v62, %s10512_s21  ;;  %v4956_v16 = vadd.f32 %v13109_v38, %v9842_v60  ;;  %s10455_s21 = scalar_lea.vmem %s10454_s28, 4096 }
 0x332   : > { %v4821_v53 = vpop.f32.mrf.mxu1  ;;  %v5250_v0 = vpop.f32.mrf.mxu0  ;;  %p10457_p1 = scmp.lt.s32.totalorder %s10455_s21, %s10449_s20 }
 0x333   : > { %7773 = vrot.lane.b32.xlu1 %v7750_v48, %s10515_s26  ;;  %v4951_v59 = vadd.f32 %v13115_v11, %v4821_v53 }
 0x334   : > { %p10458_p2 = por %p10457_p1, %p10456_p0 }
 0x335   : > { %7771 = vrot.lane.b32.xlu0 %v7749_v54, %s10515_s26  ;;  %s8546_s26 = sshll.u32 %s10594_s17, 11  ;;  %s13775_s17 = scalar_lea.sflag [#allocation7], %s350_s29 }
 0x336   : > { %v9845_v30 = vpop.f32.mrf.mxu1  ;;  %v9929_v31 = vpop.f32.mrf.mxu0  ;;  %s13763_s18 = scalar_lea.hbm %s13826_s10, %s8546_s26  ;;  %p10459_p3 = pnand %p10458_p2, %p10452_p13 }
 0x337   : > { %v4966_v42 = vadd.f32 %v13127_v13, %v9845_v30 }
 0x338   : > { %v4831_v32 = vpop.f32.mrf.mxu1  ;;  %v13163_v15 = vpop.f32.mrf.mxu0 }
 0x339   : > { %v4961_v1 = vadd.f32 %v13133_v57, %v4831_v32 }
 0x33c   : > { %v9848_v27 = vpop.f32.mrf.mxu1  ;;  %v13165_v35 = vpop.f32.mrf.mxu0 }
 0x33d   : > { %v4976_v60 = vadd.f32 %v13141_v43, %v9848_v27 }
 0x33e   : > { %v4841_v18 = vpop.f32.mrf.mxu1  ;;  %v13167_v45 = vpop.f32.mrf.mxu0 }
 0x33f   : > { %v4971_v13 = vadd.f32 %v13147_v24, %v4841_v18 }
 0x342   : > { %v9895_v14 = vpop.f32.mrf.mxu1  ;;  %v9979_v49 = vpop.f32.mrf.mxu0 }
 0x343   : > { %v5126_v33 = vadd.f32 %v9895_v14, %v4946_v10 }
 0x344   : > { %v5086_v51 = vpop.f32.mrf.mxu1  ;;  %v5548_v17 = vpop.f32.mrf.mxu0 }
 0x345   : > { %v5125_v12 = vadd.f32 %v5086_v51, %v4941_v58  ;;  %v5280_v52 = vadd.f32 %v9923_v3, %v5126_v33 }
 0x347   : > { %v5279_v5 = vadd.f32 %v5240_v19, %v5125_v12 }
 0x348   : > { %v9898_v25 = vpop.f32.mrf.mxu1  ;;  %v9982_v47 = vpop.f32.mrf.mxu0 }
 0x349   : > { %v5128_v62 = vadd.f32 %v9898_v25, %v4956_v16 }
 0x34a   : > { %v5096_v44 = vpop.f32.mrf.mxu1  ;;  %v5558_v36 = vpop.f32.mrf.mxu0 }
 0x34b   : > { %v5127_v50 = vadd.f32 %v5096_v44, %v4951_v59  ;;  %v5282_v9 = vadd.f32 %v9926_v28, %v5128_v62  ;;  %v13202_v59 = vpop.permute.xlu1 %7761 }
 0x34c   : > { %13937 = vst [vmem:[#allocation12_spill] sm:$0xff] %v13202_v59 }
 0x34d   : > { %v5281_v3 = vadd.f32 %v5250_v0, %v5127_v50 }
 0x34e   : > { %v9901_v2 = vpop.f32.mrf.mxu1  ;;  %v13169_v26 = vpop.f32.mrf.mxu0 }
 0x34f   : > { %v5130_v20 = vadd.f32 %v9901_v2, %v4966_v42 }
 0x350   : > { %v5106_v40 = vpop.f32.mrf.mxu1  ;;  %v13171_v41 = vpop.f32.mrf.mxu0 }
 0x351   : > { %v5129_v51 = vadd.f32 %v5106_v40, %v4961_v1  ;;  %v5284_v44 = vadd.f32 %v9929_v31, %v5130_v20  ;;  %v13207_v1 = vpop.permute.xlu0 %7759 }
 0x352   : > { %13938 = vst [vmem:[#allocation17_spill] sm:$0xff] %v13207_v1 }
 0x353   : > { %v5283_v28 = vadd.f32 %v13163_v15, %v5129_v51  ;;  %v13192_v15 = vld [vmem:[%s13822_s6] ss:$0 sm:$0xff] }
 0x354   : > { %v9904_v29 = vpop.f32.mrf.mxu1  ;;  %v13173_v39 = vpop.f32.mrf.mxu0 }
 0x355   : > { %v5132_v30 = vadd.f32 %v9904_v29, %v4976_v60 }
 0x356   : > { %v5116_v56 = vpop.f32.mrf.mxu1  ;;  %v13175_v23 = vpop.f32.mrf.mxu0 }
 0x357   : > { %v5131_v2 = vadd.f32 %v5116_v56, %v4971_v13 }
 0x359   : > { %v5285_v29 = vadd.f32 %v13167_v45, %v5131_v2 }
 0x35a   : > { %v9951_v4 = vpop.f32.mrf.mxu1  ;;  %v10035_v7 = vpop.f32.mrf.mxu0 }
 0x35b   : > { %v5434_v34 = vadd.f32 %v9951_v4, %v5280_v52 }
 0x35c   : > { %v5394_v21 = vpop.f32.mrf.mxu1  ;;  %v5857_v48 = vpop.f32.mrf.mxu0 }
 0x35d   : > { %v5433_v10 = vadd.f32 %v5394_v21, %v5279_v5  ;;  %v5588_v25 = vadd.f32 %v9979_v49, %v5434_v34 }
 0x35e   : > { %v9954_v46 = vpop.f32.mrf.mxu1 }
 0x35f   : > { %v10038_v38 = vpop.f32.mrf.mxu0  ;;  %v5436_v53 = vadd.f32 %v9954_v46, %v5282_v9  ;;  %v5587_v32 = vadd.f32 %v5548_v17, %v5433_v10  ;;  %v5286_v9 = vadd.f32 %v13165_v35, %v5132_v30 }
 0x360   : > { %v5404_v63 = vpop.f32.mrf.mxu1 }
 0x361   : > { %v5435_v19 = vadd.f32 %v5404_v63, %v5281_v3  ;;  %v5867_v58 = vpop.f32.mrf.mxu0  ;;  %v5590_v27 = vadd.f32 %v9982_v47, %v5436_v53 }
 0x362   : > { %v9957_v61 = vpop.f32.mrf.mxu1 }
 0x363   : > { %v5438_v21 = vadd.f32 %v9957_v61, %v5284_v44  ;;  %v10041_v0 = vpop.f32.mrf.mxu0  ;;  %v5589_v18 = vadd.f32 %v5558_v36, %v5435_v19  ;;  %v13198_v36 = vld [vmem:[%s13822_s6 + $0x1] ss:$0 sm:$0xff]  ;;  %v13214_v44 = vpop.permute.xlu1 %7765 }
 0x364   : > { %v5414_v55 = vpop.f32.mrf.mxu1  ;;  %13939 = vst [vmem:[#allocation22_spill] sm:$0xff] %v13214_v44 }
 0x365   : > { %v5437_v40 = vadd.f32 %v5414_v55, %v5283_v28  ;;  %v5592_v17 = vadd.f32 %v13169_v26, %v5438_v21  ;;  %v5877_v26 = vpop.f32.mrf.mxu0  ;;  %v13219_v21 = vpop.permute.xlu0 %7763 }
 0x366   : > { %v9960_v6 = vpop.f32.mrf.mxu1  ;;  %13940 = vst [vmem:[#allocation15_spill] sm:$0xff] %v13219_v21 }
 0x367   : > { %v5440_v49 = vadd.f32 %v9960_v6, %v5286_v9  ;;  %v5591_v55 = vadd.f32 %v13171_v41, %v5437_v40 }
 0x368   : > { %v5424_v8 = vpop.f32.mrf.mxu1 }
 0x369   : > { %v5439_v35 = vadd.f32 %v5424_v8, %v5285_v29  ;;  %v5594_v12 = vadd.f32 %v13173_v39, %v5440_v49  ;;  %v10044_v8 = vpop.f32.mrf.mxu0 }
 0x36a   : > { %v10007_v22 = vpop.f32.mrf.mxu1 }
 0x36b   : > { %v5743_v57 = vadd.f32 %v10007_v22, %v5588_v25 }
 0x36c   : > { %v5703_v37 = vpop.f32.mrf.mxu1 }
 0x36d   : > { %v5742_v43 = vadd.f32 %v5703_v37, %v5587_v32  ;;  %v5897_v31 = vadd.f32 %v10035_v7, %v5743_v57 }
 0x36e   : > { %v10010_v54 = vpop.f32.mrf.mxu1 }
 0x36f   : > { %v5745_v24 = vadd.f32 %v10010_v54, %v5590_v27  ;;  %v5896_v63 = vadd.f32 %v5857_v48, %v5742_v43  ;;  %v5593_v54 = vadd.f32 %v13175_v23, %v5439_v35  ;;  %v8426_v35 = vld [vmem:[%s13823_s7 + $0x170] sm:$0xff] }
 0x370   : > { %v5713_v14 = vpop.f32.mrf.mxu1 }
 0x371   : > { %v5744_v47 = vadd.f32 %v5713_v14, %v5589_v18  ;;  %v5899_v22 = vadd.f32 %v10038_v38, %v5745_v24  ;;  %v13227_v18 = vpop.permute.xlu1 %7769 }
 0x372   : > { %v10013_v11 = vpop.f32.mrf.mxu1  ;;  %13941 = vst [vmem:[#allocation19_spill] sm:$0xff] %v13227_v18 }
 0x373   : > { %v5747_v61 = vadd.f32 %v10013_v11, %v5592_v17  ;;  %v5898_v48 = vadd.f32 %v5867_v58, %v5744_v47  ;;  %v5887_v11 = vpop.f32.mrf.mxu0  ;;  %v13236_v47 = vpop.permute.xlu0 %7767 }
 0x374   : > { %v5723_v4 = vpop.f32.mrf.mxu1  ;;  %13942 = vst [vmem:[#allocation28_spill] sm:$0xff] %v13236_v47 }
 0x375   : > { %v5746_v16 = vadd.f32 %v5723_v4, %v5591_v55  ;;  %v5901_v5 = vadd.f32 %v10041_v0, %v5747_v61  ;;  %v13943_v61 = vld [vmem:[#allocation26_spill] sm:$0xff]  ;;  %v13944_v55 = vld [vmem:[#allocation11_spill] sm:$0xff] }
 0x376   : > { %v10016_v33 = vpop.f32.mrf.mxu1 }
 0x377   : > { %v5749_v42 = vadd.f32 %v10016_v33, %v5594_v12  ;;  %v5900_v51 = vadd.f32 %v5877_v26, %v5746_v16 }
 0x378   : > { %v5733_v50 = vpop.f32.mrf.mxu1 }
 0x379   : > { %v5748_v38 = vadd.f32 %v5733_v50, %v5593_v54  ;;  %v5903_v13 = vadd.f32 %v10044_v8, %v5749_v42  ;;  %v8404_v8 = vld [vmem:[%s13823_s7 + $0x100] sm:$0xff]  ;;  %v8423_v42 = vld [vmem:[%s13823_s7 + $0x158] sm:$0xff] }
 0x37a   : > { %v10063_v56 = vpop.f32.mrf.mxu1 }
 0x37b   : > { %v6051_v46 = vadd.f32 %v10063_v56, %v5897_v31  ;;  %v5902_v32 = vadd.f32 %v5887_v11, %v5748_v38 }
 0x37c   : > { %v6011_v45 = vpop.f32.mrf.mxu1 }
 0x37d   : > { %v6064_v6 = vmul.f32 %v13192_v15, %v6051_v46  ;;  %v6050_v7 = vadd.f32 %v6011_v45, %v5896_v63 }
 0x37e   : > { %v10066_v37 = vpop.f32.mrf.mxu1 }
 0x37f   : > { %v6077_v41 = vadd.f32 %v13198_v36, %v6064_v6  ;;  %v6063_v62 = vmul.f32 %v13192_v15, %v6050_v7  ;;  %v6053_v52 = vadd.f32 %v10066_v37, %v5899_v22  ;;  %v8405_v6 = vld [vmem:[%s13823_s7 + $0x108] sm:$0xff] }
 0x380   : > { %v6021_v34 = vpop.f32.mrf.mxu1  ;;  %v8425_v7 = vld [vmem:[%s13823_s7 + $0x168] sm:$0xff] }
 0x381   : > { %v6085_v20 = vmax.f32 %v6077_v41, 0.0  ;;  %v6076_v39 = vadd.f32 %v13198_v36, %v6063_v62  ;;  %v6066_v14 = vmul.f32 %v13192_v15, %v6053_v52  ;;  %v6052_v10 = vadd.f32 %v6021_v34, %v5898_v48  ;;  %v8424_v41 = vld [vmem:[%s13823_s7 + $0x160] sm:$0xff]  ;;  %v8403_v48 = vld [vmem:[%s13823_s7 + $0xf8] sm:$0xff] }
 0x382   : > { %v10069_v60 = vpop.f32.mrf.mxu1 }
 0x383   : > { %6094 = vst.msk [vmem:[#allocation4 + $0x21] sm:$0xff] %vm406_vm10, %v6085_v20  ;;  %v6084_v53 = vmax.f32 %v6076_v39, 0.0  ;;  %v6079_v3 = vadd.f32 %v13198_v36, %v6066_v14  ;;  %v6065_v23 = vmul.f32 %v13192_v15, %v6052_v10  ;;  %v6055_v25 = vadd.f32 %v10069_v60, %v5901_v5  ;;  %v8402_v39 = vld [vmem:[%s13823_s7 + $0xf0] sm:$0xff]  ;;  %v8401_v60 = vld [vmem:[%s13823_s7 + $0xe8] sm:$0xff] }
 0x384   : > { %v6031_v30 = vpop.f32.mrf.mxu1  ;;  %v8422_v14 = vld [vmem:[%s13823_s7 + $0x150] sm:$0xff] }
 0x385   : > { %6093 = vst.msk [vmem:[#allocation4 + $0x11] sm:$0xff] %vm406_vm10, %v6084_v53  ;;  %v6087_v4 = vmax.f32 %v6079_v3, 0.0  ;;  %v6078_v19 = vadd.f32 %v13198_v36, %v6065_v23  ;;  %v6068_v58 = vmul.f32 %v13192_v15, %v6055_v25  ;;  %v6054_v57 = vadd.f32 %v6031_v30, %v5900_v51  ;;  %v8421_v51 = vld [vmem:[%s13823_s7 + $0x148] sm:$0xff]  ;;  %v8400_v25 = vld [vmem:[%s13823_s7 + $0xe0] sm:$0xff]  ;;  %v8399_v30 = vld [vmem:[%s13823_s7 + $0xd8] sm:$0xff] }
 0x386   : > { %v10072_v2 = vpop.f32.mrf.mxu1 }
 0x387   : > { %6096 = vst.msk [vmem:[#allocation4 + $0x41] sm:$0xff] %vm406_vm10, %v6087_v4  ;;  %v6086_v28 = vmax.f32 %v6078_v19, 0.0  ;;  %v6081_v33 = vadd.f32 %v13198_v36, %v6068_v58  ;;  %v6067_v43 = vmul.f32 %v13192_v15, %v6054_v57  ;;  %v6057_v27 = vadd.f32 %v10072_v2, %v5903_v13  ;;  %v8420_v13 = vld [vmem:[%s13823_s7 + $0x140] sm:$0xff]  ;;  %v8419_v4 = vld [vmem:[%s13823_s7 + $0x138] sm:$0xff]  ;;  %v8398_v58 = vld [vmem:[%s13823_s7 + $0xd0] sm:$0xff] }
 0x388   : > { %v6041_v40 = vpop.f32.mrf.mxu1  ;;  %v8418_v57 = vld [vmem:[%s13823_s7 + $0x130] sm:$0xff]  ;;  %v8397_v2 = vld [vmem:[%s13823_s7 + $0xc8] sm:$0xff] }
 0x389   : > { %6095 = vst.msk [vmem:[#allocation4 + $0x31] sm:$0xff] %vm406_vm10, %v6086_v28  ;;  %v6089_v9 = vmax.f32 %v6081_v33, 0.0  ;;  %v6080_v50 = vadd.f32 %v13198_v36, %v6067_v43  ;;  %v6070_v0 = vmul.f32 %v13192_v15, %v6057_v27  ;;  %v6056_v24 = vadd.f32 %v6041_v40, %v5902_v32  ;;  %v8417_v28 = vld [vmem:[%s13823_s7 + $0x128] sm:$0xff]  ;;  %v8396_v33 = vld [vmem:[%s13823_s7 + $0xc0] sm:$0xff]  ;;  %v8447_v40 = vld [vmem:[%s13823_s7 + $0x1d8] sm:$0xff] }
 0x38a   : > { %v13254_v45 = vld [vmem:[#allocation4 + $0x20] sm:$0xff] }
 0x38b   : > { %6098 = vst.msk [vmem:[#allocation4 + $0x61] sm:$0xff] %vm406_vm10, %v6089_v9  ;;  %v6088_v31 = vmax.f32 %v6080_v50, 0.0  ;;  %v6083_v49 = vadd.f32 %v13198_v36, %v6070_v0  ;;  %v6069_v29 = vmul.f32 %v13192_v15, %v6056_v24  ;;  %v8406_v15 = vld [vmem:[%s13823_s7 + $0x110] sm:$0xff]  ;;  %v8416_v43 = vld [vmem:[%s13823_s7 + $0x120] sm:$0xff]  ;;  %v8467_v9 = vld [vmem:[%s13823_s7 + $0x238] sm:$0xff] }
 0x38c   : > { %v13232_v17 = vld [vmem:[#allocation4 + $0x11] sm:$0xff]  ;;  %v6400_v27 = vld [vmem:[#allocation4 + $0x2] sm:$0xff] }
 0x38d   : > { %v13234_v56 = vld [vmem:[#allocation4 + $0x10] sm:$0xff]  ;;  %6097 = vst.msk [vmem:[#allocation4 + $0x51] sm:$0xff] %vm406_vm10, %v6088_v31  ;;  %v6091_v46 = vmax.f32 %v6083_v49, 0.0  ;;  %v6082_v63 = vadd.f32 %v13198_v36, %v6069_v29  ;;  %10098 = vmatmul.mubr.msk.f32.vlgmr.msra.gmra.mxu0 %vm406_vm10, %v13232_v17  ;;  %v13252_v36 = vld [vmem:[#allocation4 + $0x21] sm:$0xff] }
 0x38e   : > { %10134 = vmatmul.mubr.msk.f32.vlgmr.msra.gmra.mxu1 %vm406_vm10, %v13234_v56  ;;  %10146 = vmatpush3.msra.mxu0 %v13943_v61  ;;  %v13286_v62 = vld [vmem:[#allocation4 + $0x41] sm:$0xff]  ;;  %v13387_v50 = vld [vmem:[#allocation4 + $0x12] sm:$0xff] }
 0x38f   : > { %10182 = vmatpush3.msra.mxu1 %v13944_v55  ;;  %6100 = vst.msk [vmem:[#allocation4 + $0x81] sm:$0xff] %vm406_vm10, %v6091_v46  ;;  %v6090_v26 = vmax.f32 %v6082_v63, 0.0  ;;  %10100 = vmatprep.mubr.msk.f32.mxu0 %vm406_vm10, %v13252_v36  ;;  %v4658_v22 = vpop.permute.xlu1 %4657  ;;  %v13288_v52 = vld [vmem:[#allocation4 + $0x40] sm:$0xff]  ;;  %v8446_v24 = vld [vmem:[%s13823_s7 + $0x1d0] sm:$0xff]  ;;  %v8445_v49 = vld [vmem:[%s13823_s7 + $0x1c8] sm:$0xff] }
 0x390   : > { %10136 = vmatprep.mubr.msk.f32.mxu1 %vm406_vm10, %v13254_v45  ;;  %10147 = vmatprep.subr.mxu0 %v8406_v15  ;;  %v13267_v16 = vld [vmem:[#allocation4 + $0x31] sm:$0xff]  ;;  %4681 = vst.msk [vmem:[%s10808_s25 + $0x10] sm:$0xff] %vm4679_vm12, %v4658_v22  ;;  %v13393_v0 = vld [vmem:[#allocation4 + $0x22] sm:$0xff] }
 0x391   : > { %10183 = vmatprep.subr.mxu1 %v8426_v35  ;;  %v13269_v12 = vld [vmem:[#allocation4 + $0x30] sm:$0xff]  ;;  %6099 = vst.msk [vmem:[#allocation4 + $0x71] sm:$0xff] %vm406_vm10, %v6090_v26  ;;  %10148 = vmatpush3.msra.mxu0 %v8406_v15  ;;  %v4656_v37 = vpop.permute.xlu0 %4655  ;;  %v8465_v29 = vld [vmem:[%s13823_s7 + $0x228] sm:$0xff]  ;;  %v8444_v63 = vld [vmem:[%s13823_s7 + $0x1c0] sm:$0xff] }
 0x392   : > { %10184 = vmatpush3.msra.mxu1 %v8426_v35  ;;  %10149 = vmatprep.subr.mxu0 %v8405_v6  ;;  %4680 = vst.msk [vmem:[%s10808_s25] sm:$0xff] %vm4679_vm12, %v4656_v37  ;;  %v13318_v10 = vld [vmem:[#allocation4 + $0x61] sm:$0xff]  ;;  %v8466_v31 = vld [vmem:[%s13823_s7 + $0x230] sm:$0xff]  ;;  %v8443_v35 = vld [vmem:[%s13823_s7 + $0x1b8] sm:$0xff] }
 0x393   : > { %10185 = vmatprep.subr.mxu1 %v8425_v7  ;;  %10101 = vmatmul.mubr.msk.f32.gmra.mxu0 %vm406_vm10, %v13267_v16  ;;  %v13320_v38 = vld [vmem:[#allocation4 + $0x60] sm:$0xff]  ;;  %v8463_v61 = vld [vmem:[%s13823_s7 + $0x218] sm:$0xff]  ;;  %v8441_v22 = vld [vmem:[%s13823_s7 + $0x1a8] sm:$0xff] }
 0x394   : > { %10137 = vmatmul.mubr.msk.f32.gmra.mxu1 %vm406_vm10, %v13269_v12  ;;  %10150 = vmatpush3.msra.mxu0 %v8405_v6  ;;  %v13300_v34 = vld [vmem:[#allocation4 + $0x51] sm:$0xff]  ;;  %v13417_v46 = vld [vmem:[#allocation4 + $0x42] sm:$0xff] }
 0x395   : > { %10186 = vmatpush3.msra.mxu1 %v8425_v7  ;;  %10103 = vmatprep.mubr.msk.f32.mxu0 %vm406_vm10, %v13286_v62  ;;  %v4662_v54 = vpop.permute.xlu1 %4661  ;;  %v13302_v5 = vld [vmem:[#allocation4 + $0x50] sm:$0xff]  ;;  %v8464_v15 = vld [vmem:[%s13823_s7 + $0x220] sm:$0xff]  ;;  %v8461_v37 = vld [vmem:[%s13823_s7 + $0x208] sm:$0xff] }
 0x396   : > { %10139 = vmatprep.mubr.msk.f32.mxu1 %vm406_vm10, %v13288_v52  ;;  %10151 = vmatprep.subr.mxu0 %v8404_v8  ;;  %4683 = vst.msk [vmem:[%s10808_s25 + $0x30] sm:$0xff] %vm4679_vm12, %v4662_v54  ;;  %v13435_v55 = vld [vmem:[#allocation4 + $0x52] sm:$0xff]  ;;  %v13441_v26 = vld [vmem:[#allocation4 + $0x62] sm:$0xff] }
 0x397   : > { %10187 = vmatprep.subr.mxu1 %v8424_v41  ;;  %10152 = vmatpush3.msra.mxu0 %v8404_v8  ;;  %v4660_v20 = vpop.permute.xlu0 %4659  ;;  %v8442_v6 = vld [vmem:[%s13823_s7 + $0x1b0] sm:$0xff]  ;;  %v8439_v54 = vld [vmem:[%s13823_s7 + $0x198] sm:$0xff] }
 0x398   : > { %10188 = vmatpush3.msra.mxu1 %v8424_v41  ;;  %10153 = vmatprep.subr.mxu0 %v8403_v48  ;;  %4682 = vst.msk [vmem:[%s10808_s25 + $0x20] sm:$0xff] %vm4679_vm12, %v4660_v20  ;;  %v13332_v53 = vld [vmem:[#allocation4 + $0x71] sm:$0xff]  ;;  %v13461_v41 = vld [vmem:[#allocation4 + $0x80] sm:$0xff] }
 0x399   : > { %10189 = vmatprep.subr.mxu1 %v8423_v42  ;;  %10104 = vmatmul.mubr.msk.f32.gmra.mxu0 %vm406_vm10, %v13300_v34  ;;  %v13334_v3 = vld [vmem:[#allocation4 + $0x70] sm:$0xff]  ;;  %v8459_v20 = vld [vmem:[%s13823_s7 + $0x1f8] sm:$0xff] }
 0x39a   : > { %10140 = vmatmul.mubr.msk.f32.gmra.mxu1 %vm406_vm10, %v13302_v5  ;;  %10154 = vmatpush3.msra.mxu0 %v8403_v48  ;;  %v8462_v7 = vld [vmem:[%s13823_s7 + $0x210] sm:$0xff]  ;;  %v8440_v48 = vld [vmem:[%s13823_s7 + $0x1a0] sm:$0xff] }
 0x39b   : > { %10190 = vmatpush3.msra.mxu1 %v8423_v42  ;;  %10106 = vmatprep.mubr.msk.f32.mxu0 %vm406_vm10, %v13318_v10  ;;  %v4666_v11 = vpop.permute.xlu1 %4665  ;;  %v13459_v8 = vld [vmem:[#allocation4 + $0x72] sm:$0xff]  ;;  %v8460_v42 = vld [vmem:[%s13823_s7 + $0x200] sm:$0xff] }
 0x39c   : > { %10142 = vmatprep.mubr.msk.f32.mxu1 %vm406_vm10, %v13320_v38  ;;  %10155 = vmatprep.subr.mxu0 %v8402_v39  ;;  %4685 = vst.msk [vmem:[%s10808_s25 + $0x50] sm:$0xff] %vm4679_vm12, %v4666_v11  ;;  %v8456_v11 = vld [vmem:[%s13823_s7 + $0x1e0] sm:$0xff] }
 0x39d   : > { %10191 = vmatprep.subr.mxu1 %v8422_v14  ;;  %10156 = vmatpush3.msra.mxu0 %v8402_v39  ;;  %v4664_v23 = vpop.permute.xlu0 %4663  ;;  %v8458_v39 = vld [vmem:[%s13823_s7 + $0x1f0] sm:$0xff] }
 0x39e   : > { %10192 = vmatpush3.msra.mxu1 %v8422_v14  ;;  %10157 = vmatprep.subr.mxu0 %v8401_v60  ;;  %4684 = vst.msk [vmem:[%s10808_s25 + $0x40] sm:$0xff] %vm4679_vm12, %v4664_v23  ;;  %v8437_v14 = vld [vmem:[%s13823_s7 + $0x188] sm:$0xff]  ;;  %v8487_v23 = vld [vmem:[%s13823_s7 + $0x298] sm:$0xff] }
 0x39f   : > { %10193 = vmatprep.subr.mxu1 %v8421_v51  ;;  %10107 = vmatmul.mubr.msk.f32.gmra.mxu0 %vm406_vm10, %v13332_v53 }
 0x3a0   : > { %10143 = vmatmul.mubr.msk.f32.gmra.mxu1 %vm406_vm10, %v13334_v3  ;;  %10158 = vmatpush3.msra.mxu0 %v8401_v60  ;;  %v8457_v60 = vld [vmem:[%s13823_s7 + $0x1e8] sm:$0xff] }
 0x3a1   : > { %10194 = vmatpush3.msra.mxu1 %v8421_v51  ;;  %10159 = vmatprep.subr.mxu0 %v8400_v25  ;;  %v4670_v19 = vpop.permute.xlu1 %4669  ;;  %v8436_v51 = vld [vmem:[%s13823_s7 + $0x180] sm:$0xff] }
 0x3a2   : > { %10195 = vmatprep.subr.mxu1 %v8420_v13  ;;  %10205 = vmatprep.mubr.msk.f32.mxu1 %vm406_vm10, %v13234_v56  ;;  %4687 = vst.msk [vmem:[%s10808_s25 + $0x70] sm:$0xff] %vm4679_vm12, %v4670_v19  ;;  %v13411_v56 = vld [vmem:[#allocation4 + $0x32] sm:$0xff]  ;;  %v8505_v19 = vld [vmem:[%s13823_s7 + $0x2e8] sm:$0xff] }
 0x3a3   : > { %10160 = vmatpush3.msra.mxu0 %v8400_v25  ;;  %10196 = vmatpush3.msra.mxu1 %v8420_v13  ;;  %v4668_v32 = vpop.permute.xlu0 %4667  ;;  %v8507_v25 = vld [vmem:[%s13823_s7 + $0x2f8] sm:$0xff]  ;;  %v8486_v13 = vld [vmem:[%s13823_s7 + $0x290] sm:$0xff] }
 0x3a4   : > { %10161 = vmatprep.subr.mxu0 %v8399_v30  ;;  %10197 = vmatprep.subr.mxu1 %v8419_v4  ;;  %4686 = vst.msk [vmem:[%s10808_s25 + $0x60] sm:$0xff] %vm4679_vm12, %v4668_v32  ;;  %v8483_v32 = vld [vmem:[%s13823_s7 + $0x278] sm:$0xff] }
 0x3a5   : > { %10162 = vmatpush3.msra.mxu0 %v8399_v30  ;;  %10198 = vmatpush3.msra.mxu1 %v8419_v4  ;;  %v8506_v30 = vld [vmem:[%s13823_s7 + $0x2f0] sm:$0xff]  ;;  %v8485_v4 = vld [vmem:[%s13823_s7 + $0x288] sm:$0xff] }
 0x3a6   : > { %10163 = vmatprep.subr.mxu0 %v8398_v58  ;;  %10199 = vmatprep.subr.mxu1 %v8418_v57 }
 0x3a7   : > { %10164 = vmatpush3.msra.mxu0 %v8398_v58  ;;  %10200 = vmatpush3.msra.mxu1 %v8418_v57  ;;  %v8484_v58 = vld [vmem:[%s13823_s7 + $0x280] sm:$0xff] }
 0x3a8   : > { %10165 = vmatprep.subr.mxu0 %v8397_v2  ;;  %10201 = vmatprep.subr.mxu1 %v8417_v28  ;;  %v8504_v57 = vld [vmem:[%s13823_s7 + $0x2e0] sm:$0xff] }
 0x3a9   : > { %10166 = vmatpush3.msra.mxu0 %v8397_v2  ;;  %10202 = vmatpush3.msra.mxu1 %v8417_v28  ;;  %v8503_v2 = vld [vmem:[%s13823_s7 + $0x2d8] sm:$0xff]  ;;  %v8482_v28 = vld [vmem:[%s13823_s7 + $0x270] sm:$0xff] }
 0x3aa   : > { %10167 = vmatprep.subr.mxu0 %v8396_v33  ;;  %10203 = vmatprep.subr.mxu1 %v8416_v43 }
 0x3ab   : > { %10168 = vmatpush3.msra.mxu0 %v8396_v33  ;;  %10169 = vmatprep.mubr.msk.f32.mxu0 %vm406_vm10, %v6400_v27  ;;  %v8502_v33 = vld [vmem:[%s13823_s7 + $0x2d0] sm:$0xff]  ;;  %v8501_v27 = vld [vmem:[%s13823_s7 + $0x2c8] sm:$0xff] }
 0x3ac   : > { %10204 = vmatpush3.msra.mxu1 %v8416_v43  ;;  %10170 = vmatmul.mubr.msk.f32.vlgmr.msra.gmra.mxu0 %vm406_vm10, %v13387_v50  ;;  %v8481_v43 = vld [vmem:[%s13823_s7 + $0x268] sm:$0xff] }
 0x3ad   : > { %10206 = vmatmul.mubr.msk.f32.vlgmr.msra.gmra.mxu1 %vm406_vm10, %v13254_v45  ;;  %10217 = vmatprep.subr.mxu0 %v8447_v40 }
 0x3ae   : > { %10253 = vmatprep.subr.mxu1 %v8467_v9  ;;  %10172 = vmatprep.mubr.msk.f32.mxu0 %vm406_vm10, %v13393_v0 }
 0x3af   : > { %10208 = vmatprep.mubr.msk.f32.mxu1 %vm406_vm10, %v13269_v12  ;;  %10218 = vmatpush3.msra.mxu0 %v8447_v40  ;;  %v6723_v40 = vld [vmem:[#allocation4 + $0x81] sm:$0xff] }
 0x3b0   : > { %10254 = vmatpush3.msra.mxu1 %v8467_v9  ;;  %10219 = vmatprep.subr.mxu0 %v8446_v24  ;;  %v13567_v9 = vld [vmem:[#allocation4 + $0x82] sm:$0xff] }
 0x3b1   : > { %10255 = vmatprep.subr.mxu1 %v8466_v31  ;;  %10220 = vmatpush3.msra.mxu0 %v8446_v24  ;;  %v8500_v24 = vld [vmem:[%s13823_s7 + $0x2c0] sm:$0xff] }
 0x3b2   : > { %10256 = vmatpush3.msra.mxu1 %v8466_v31  ;;  %10173 = vmatmul.mubr.msk.f32.gmra.mxu0 %vm406_vm10, %v13411_v56  ;;  %v8479_v31 = vld [vmem:[%s13823_s7 + $0x258] sm:$0xff] }
 0x3b3   : > { %10209 = vmatmul.mubr.msk.f32.gmra.mxu1 %vm406_vm10, %v13288_v52  ;;  %10221 = vmatprep.subr.mxu0 %v8445_v49 }
 0x3b4   : > { %10257 = vmatprep.subr.mxu1 %v8465_v29  ;;  %10175 = vmatprep.mubr.msk.f32.mxu0 %vm406_vm10, %v13417_v46 }
 0x3b5   : > { %10211 = vmatprep.mubr.msk.f32.mxu1 %vm406_vm10, %v13302_v5  ;;  %10222 = vmatpush3.msra.mxu0 %v8445_v49  ;;  %v8499_v49 = vld [vmem:[%s13823_s7 + $0x2b8] sm:$0xff] }
 0x3b6   : > { %10258 = vmatpush3.msra.mxu1 %v8465_v29  ;;  %10223 = vmatprep.subr.mxu0 %v8444_v63  ;;  %v8477_v29 = vld [vmem:[%s13823_s7 + $0x248] sm:$0xff] }
 0x3b7   : > { %10259 = vmatprep.subr.mxu1 %v8464_v15  ;;  %10224 = vmatpush3.msra.mxu0 %v8444_v63  ;;  %v8497_v63 = vld [vmem:[%s13823_s7 + $0x2a8] sm:$0xff] }
 0x3b8   : > { %10260 = vmatpush3.msra.mxu1 %v8464_v15  ;;  %10176 = vmatmul.mubr.msk.f32.gmra.mxu0 %vm406_vm10, %v13435_v55  ;;  %v8476_v15 = vld [vmem:[%s13823_s7 + $0x240] sm:$0xff] }
 0x3b9   : > { %10212 = vmatmul.mubr.msk.f32.gmra.mxu1 %vm406_vm10, %v13320_v38  ;;  %10225 = vmatprep.subr.mxu0 %v8443_v35 }
 0x3ba   : > { %10261 = vmatprep.subr.mxu1 %v8463_v61  ;;  %10178 = vmatprep.mubr.msk.f32.mxu0 %vm406_vm10, %v13441_v26 }
 0x3bb   : > { %10214 = vmatprep.mubr.msk.f32.mxu1 %vm406_vm10, %v13334_v3  ;;  %10226 = vmatpush3.msra.mxu0 %v8443_v35  ;;  %v8496_v35 = vld [vmem:[%s13823_s7 + $0x2a0] sm:$0xff] }
 0x3bc   : > { %10262 = vmatpush3.msra.mxu1 %v8463_v61  ;;  %10227 = vmatprep.subr.mxu0 %v8442_v6  ;;  %v8527_v61 = vld [vmem:[%s13823_s7 + $0x358] sm:$0xff] }
 0x3bd   : > { %10263 = vmatprep.subr.mxu1 %v8462_v7  ;;  %10228 = vmatpush3.msra.mxu0 %v8442_v6  ;;  %v8526_v6 = vld [vmem:[%s13823_s7 + $0x350] sm:$0xff] }
 0x3be   : > { %10264 = vmatpush3.msra.mxu1 %v8462_v7  ;;  %10179 = vmatmul.mubr.msk.f32.gmra.mxu0 %vm406_vm10, %v13459_v8  ;;  %v8525_v7 = vld [vmem:[%s13823_s7 + $0x348] sm:$0xff] }
 0x3bf   : > { %10215 = vmatmul.mubr.msk.f32.gmra.mxu1 %vm406_vm10, %v13461_v41  ;;  %10229 = vmatprep.subr.mxu0 %v8441_v22 }
 0x3c0   : > { %10265 = vmatprep.subr.mxu1 %v8461_v37  ;;  %10230 = vmatpush3.msra.mxu0 %v8441_v22  ;;  %v7356_v22 = vld [vmem:[#allocation4 + $0x92] sm:$0xff] }
 0x3c1   : > { %10241 = vmatprep.mubr.msk.f32.mxu0 %vm406_vm10, %v13232_v17  ;;  %10266 = vmatpush3.msra.mxu1 %v8461_v37  ;;  %v8438_v17 = vld [vmem:[%s13823_s7 + $0x190] sm:$0xff] }
 0x3c2   : > { %10277 = vmatprep.mubr.msk.f32.mxu1 %vm406_vm10, %v13387_v50  ;;  %10231 = vmatprep.subr.mxu0 %v8440_v48  ;;  %v8480_v50 = vld [vmem:[%s13823_s7 + $0x260] sm:$0xff] }
 0x3c3   : > { %10267 = vmatprep.subr.mxu1 %v8460_v42  ;;  %10232 = vmatpush3.msra.mxu0 %v8440_v48 }
 0x3c4   : > { %10268 = vmatpush3.msra.mxu1 %v8460_v42  ;;  %10233 = vmatprep.subr.mxu0 %v8439_v54 }
 0x3c5   : > { %10269 = vmatprep.subr.mxu1 %v8459_v20  ;;  %10234 = vmatpush3.msra.mxu0 %v8439_v54 }
 0x3c6   : > { %10270 = vmatpush3.msra.mxu1 %v8459_v20  ;;  %10235 = vmatprep.subr.mxu0 %v8438_v17 }
 0x3c7   : > { %10271 = vmatprep.subr.mxu1 %v8458_v39  ;;  %10236 = vmatpush3.msra.mxu0 %v8438_v17 }
 0x3c8   : > { %10272 = vmatpush3.msra.mxu1 %v8458_v39  ;;  %10237 = vmatprep.subr.mxu0 %v8437_v14 }
 0x3c9   : > { %10273 = vmatprep.subr.mxu1 %v8457_v60  ;;  %10238 = vmatpush3.msra.mxu0 %v8437_v14 }
 0x3ca   : > { %10274 = vmatpush3.msra.mxu1 %v8457_v60  ;;  %10239 = vmatprep.subr.mxu0 %v8436_v51 }
 0x3cb   : > { %10275 = vmatprep.subr.mxu1 %v8456_v11  ;;  %10240 = vmatpush3.msra.mxu0 %v8436_v51 }
 0x3cc   : > { %10276 = vmatpush3.msra.mxu1 %v8456_v11  ;;  %10242 = vmatmul.mubr.msk.f32.vlgmr.msra.gmra.mxu0 %vm406_vm10, %v13252_v36 }
 0x3cd   : > { %10278 = vmatmul.mubr.msk.f32.vlgmr.msra.gmra.mxu1 %vm406_vm10, %v13393_v0  ;;  %10289 = vmatprep.subr.mxu0 %v8487_v23 }
 0x3ce   : > { %10325 = vmatprep.subr.mxu1 %v8507_v25  ;;  %10244 = vmatprep.mubr.msk.f32.mxu0 %vm406_vm10, %v13267_v16 }
 0x3cf   : > { %10280 = vmatprep.mubr.msk.f32.mxu1 %vm406_vm10, %v13411_v56  ;;  %10290 = vmatpush3.msra.mxu0 %v8487_v23 }
 0x3d0   : > { %10326 = vmatpush3.msra.mxu1 %v8507_v25  ;;  %10291 = vmatprep.subr.mxu0 %v8486_v13 }
 0x3d1   : > { %10327 = vmatprep.subr.mxu1 %v8506_v30  ;;  %10292 = vmatpush3.msra.mxu0 %v8486_v13 }
 0x3d2   : > { %10328 = vmatpush3.msra.mxu1 %v8506_v30  ;;  %10245 = vmatmul.mubr.msk.f32.gmra.mxu0 %vm406_vm10, %v13286_v62 }
 0x3d3   : > { %10281 = vmatmul.mubr.msk.f32.gmra.mxu1 %vm406_vm10, %v13417_v46  ;;  %10293 = vmatprep.subr.mxu0 %v8485_v4 }
 0x3d4   : > { %10329 = vmatprep.subr.mxu1 %v8505_v19  ;;  %10247 = vmatprep.mubr.msk.f32.mxu0 %vm406_vm10, %v13300_v34 }
 0x3d5   : > { %10283 = vmatprep.mubr.msk.f32.mxu1 %vm406_vm10, %v13435_v55  ;;  %10294 = vmatpush3.msra.mxu0 %v8485_v4 }
 0x3d6   : > { %10330 = vmatpush3.msra.mxu1 %v8505_v19  ;;  %10295 = vmatprep.subr.mxu0 %v8484_v58 }
 0x3d7   : > { %10331 = vmatprep.subr.mxu1 %v8504_v57  ;;  %10296 = vmatpush3.msra.mxu0 %v8484_v58 }
 0x3d8   : > { %10332 = vmatpush3.msra.mxu1 %v8504_v57  ;;  %10248 = vmatmul.mubr.msk.f32.gmra.mxu0 %vm406_vm10, %v13318_v10 }
 0x3d9   : > { %10284 = vmatmul.mubr.msk.f32.gmra.mxu1 %vm406_vm10, %v13441_v26  ;;  %10297 = vmatprep.subr.mxu0 %v8483_v32 }
 0x3da   : > { %10333 = vmatprep.subr.mxu1 %v8503_v2  ;;  %10250 = vmatprep.mubr.msk.f32.mxu0 %vm406_vm10, %v13332_v53 }
 0x3db   : > { %10286 = vmatprep.mubr.msk.f32.mxu1 %vm406_vm10, %v13459_v8  ;;  %10298 = vmatpush3.msra.mxu0 %v8483_v32 }
 0x3dc   : > { %10334 = vmatpush3.msra.mxu1 %v8503_v2  ;;  %10299 = vmatprep.subr.mxu0 %v8482_v28 }
 0x3dd   : > { %10335 = vmatprep.subr.mxu1 %v8502_v33  ;;  %10300 = vmatpush3.msra.mxu0 %v8482_v28 }
 0x3de   : > { %10336 = vmatpush3.msra.mxu1 %v8502_v33  ;;  %10251 = vmatmul.mubr.msk.f32.gmra.mxu0 %vm406_vm10, %v6723_v40 }
 0x3df   : > { %10287 = vmatmul.mubr.msk.f32.gmra.mxu1 %vm406_vm10, %v13567_v9  ;;  %10301 = vmatprep.subr.mxu0 %v8481_v43 }
 0x3e0   : > { %10337 = vmatprep.subr.mxu1 %v8501_v27  ;;  %10302 = vmatpush3.msra.mxu0 %v8481_v43 }
 0x3e1   : > { %10313 = vmatprep.mubr.msk.f32.mxu0 %vm406_vm10, %v13254_v45  ;;  %10338 = vmatpush3.msra.mxu1 %v8501_v27  ;;  %v8478_v45 = vld [vmem:[%s13823_s7 + $0x250] sm:$0xff] }
 0x3e2   : > { %10349 = vmatprep.mubr.msk.f32.mxu1 %vm406_vm10, %v13252_v36  ;;  %10303 = vmatprep.subr.mxu0 %v8480_v50  ;;  %v8498_v36 = vld [vmem:[%s13823_s7 + $0x2b0] sm:$0xff] }
 0x3e3   : > { %10339 = vmatprep.subr.mxu1 %v8500_v24  ;;  %10304 = vmatpush3.msra.mxu0 %v8480_v50 }
 0x3e4   : > { %10340 = vmatpush3.msra.mxu1 %v8500_v24  ;;  %10305 = vmatprep.subr.mxu0 %v8479_v31 }
 0x3e5   : > { %10341 = vmatprep.subr.mxu1 %v8499_v49  ;;  %10306 = vmatpush3.msra.mxu0 %v8479_v31 }
 0x3e6   : > { %10342 = vmatpush3.msra.mxu1 %v8499_v49  ;;  %10307 = vmatprep.subr.mxu0 %v8478_v45 }
 0x3e7   : > { %10343 = vmatprep.subr.mxu1 %v8498_v36  ;;  %10308 = vmatpush3.msra.mxu0 %v8478_v45 }
 0x3e8   : > { %10344 = vmatpush3.msra.mxu1 %v8498_v36  ;;  %10309 = vmatprep.subr.mxu0 %v8477_v29 }
 0x3e9   : > { %10345 = vmatprep.subr.mxu1 %v8497_v63  ;;  %10310 = vmatpush3.msra.mxu0 %v8477_v29 }
 0x3ea   : > { %10346 = vmatpush3.msra.mxu1 %v8497_v63  ;;  %10311 = vmatprep.subr.mxu0 %v8476_v15 }
 0x3eb   : > { %10347 = vmatprep.subr.mxu1 %v8496_v35  ;;  %10312 = vmatpush3.msra.mxu0 %v8476_v15 }
 0x3ec   : > { %10348 = vmatpush3.msra.mxu1 %v8496_v35  ;;  %10314 = vmatmul.mubr.msk.f32.vlgmr.msra.gmra.mxu0 %vm406_vm10, %v13269_v12  ;;  %v8523_v12 = vld [vmem:[%s13823_s7 + $0x338] sm:$0xff] }
 0x3ed   : > { %10350 = vmatmul.mubr.msk.f32.vlgmr.msra.gmra.mxu1 %vm406_vm10, %v13267_v16  ;;  %10361 = vmatprep.subr.mxu0 %v8527_v61  ;;  %v8524_v16 = vld [vmem:[%s13823_s7 + $0x340] sm:$0xff] }
 0x3ee   : > { %10316 = vmatprep.mubr.msk.f32.mxu0 %vm406_vm10, %v13288_v52  ;;  %10352 = vmatprep.mubr.msk.f32.mxu1 %vm406_vm10, %v13286_v62  ;;  %v8522_v62 = vld [vmem:[%s13823_s7 + $0x330] sm:$0xff] }
 0x3ef   : > { %10362 = vmatpush3.msra.mxu0 %v8527_v61  ;;  %v7198_v52 = vld [vmem:[#allocation4 + $0x91] sm:$0xff] }
 0x3f0   : > { %10363 = vmatprep.subr.mxu0 %v8526_v6  ;;  %10317 = vmatmul.mubr.msk.f32.gmra.mxu0 %vm406_vm10, %v13302_v5  ;;  %v8521_v5 = vld [vmem:[%s13823_s7 + $0x328] sm:$0xff] }
 0x3f1   : > { %10364 = vmatpush3.msra.mxu0 %v8526_v6  ;;  %10353 = vmatmul.mubr.msk.f32.gmra.mxu1 %vm406_vm10, %v13300_v34  ;;  %v7040_v34 = vld [vmem:[#allocation4 + $0x90] sm:$0xff] }
 0x3f2   : > { %10365 = vmatprep.subr.mxu0 %v8525_v7  ;;  %10319 = vmatprep.mubr.msk.f32.mxu0 %vm406_vm10, %v13320_v38  ;;  %v8519_v38 = vld [vmem:[%s13823_s7 + $0x318] sm:$0xff] }
 0x3f3   : > { %10355 = vmatprep.mubr.msk.f32.mxu1 %vm406_vm10, %v13318_v10  ;;  %10366 = vmatpush3.msra.mxu0 %v8525_v7  ;;  %v8520_v10 = vld [vmem:[%s13823_s7 + $0x320] sm:$0xff] }
 0x3f4   : > { %10367 = vmatprep.subr.mxu0 %v8524_v16  ;;  %10320 = vmatmul.mubr.msk.f32.gmra.mxu0 %vm406_vm10, %v13334_v3  ;;  %v8517_v3 = vld [vmem:[%s13823_s7 + $0x308] sm:$0xff] }
 0x3f5   : > { %10356 = vmatmul.mubr.msk.f32.gmra.mxu1 %vm406_vm10, %v13332_v53  ;;  %10368 = vmatpush3.msra.mxu0 %v8524_v16  ;;  %v8518_v53 = vld [vmem:[%s13823_s7 + $0x310] sm:$0xff] }
 0x3f6   : > { %10358 = vmatprep.mubr.msk.f32.mxu1 %vm406_vm10, %v6723_v40  ;;  %10369 = vmatprep.subr.mxu0 %v8523_v12 }
 0x3f7   : > { %10322 = vmatprep.mubr.msk.f32.mxu0 %vm406_vm10, %v13461_v41  ;;  %10370 = vmatpush3.msra.mxu0 %v8523_v12 }
 0x3f8   : > { %10371 = vmatprep.subr.mxu0 %v8522_v62  ;;  %10323 = vmatmul.mubr.msk.f32.gmra.mxu0 %vm406_vm10, %v7040_v34 }
 0x3f9   : > { %10359 = vmatmul.mubr.msk.f32.gmra.mxu1 %vm406_vm10, %v7198_v52  ;;  %10372 = vmatpush3.msra.mxu0 %v8522_v62 }
 0x3fa   : > { %10373 = vmatprep.subr.mxu0 %v8521_v5  ;;  %10385 = vmatprep.mubr.msk.f32.mxu0 %vm406_vm10, %v13393_v0  ;;  %v8516_v0 = vld [vmem:[%s13823_s7 + $0x300] sm:$0xff] }
 0x3fb   : > { %10374 = vmatpush3.msra.mxu0 %v8521_v5 }
 0x3fc   : > { %10375 = vmatprep.subr.mxu0 %v8520_v10 }
 0x3fd   : > { %10376 = vmatpush3.msra.mxu0 %v8520_v10 }
 0x3fe   : > { %10377 = vmatprep.subr.mxu0 %v8519_v38 }
 0x3ff   : > { %10378 = vmatpush3.msra.mxu0 %v8519_v38 }
 0x400   : > { %10379 = vmatprep.subr.mxu0 %v8518_v53 }
 0x401   : > { %10380 = vmatpush3.msra.mxu0 %v8518_v53 }
 0x402   : > { %10381 = vmatprep.subr.mxu0 %v8517_v3 }
 0x403   : > { %10382 = vmatpush3.msra.mxu0 %v8517_v3 }
 0x404   : > { %10383 = vmatprep.subr.mxu0 %v8516_v0 }
 0x405   : > { %10384 = vmatpush3.msra.mxu0 %v8516_v0 }
 0x406   : > { %10386 = vmatmul.mubr.msk.f32.vlgmr.msra.gmra.mxu0 %vm406_vm10, %v13411_v56 }
 0x407   : > { %10388 = vmatprep.mubr.msk.f32.mxu0 %vm406_vm10, %v13417_v46 }
 0x40a   : > { %10389 = vmatmul.mubr.msk.f32.gmra.mxu0 %vm406_vm10, %v13435_v55 }
 0x40b   : > { %10391 = vmatprep.mubr.msk.f32.mxu0 %vm406_vm10, %v13441_v26 }
 0x40e   : > { %10392 = vmatmul.mubr.msk.f32.gmra.mxu0 %vm406_vm10, %v13459_v8 }
 0x40f   : > { %10394 = vmatprep.mubr.msk.f32.mxu0 %vm406_vm10, %v13567_v9 }
 0x412   : > { %10395 = vmatmul.mubr.msk.f32.gmra.mxu0 %vm406_vm10, %v7356_v22 }
 0x44d   : > { %v10099_v37 = vpop.f32.mrf.mxu0 }
 0x44e   : > { %v10135_v48 = vpop.f32.mrf.mxu1 }
 0x44f   : > { %v6232_v56 = vpop.f32.mrf.mxu0  ;;  %v6367_v34 = vadd.f32 %v10135_v48, %v10099_v37 }
 0x450   : > { %v6361_v42 = vpop.f32.mrf.mxu1 }
 0x451   : > { %v6362_v38 = vadd.f32 %v6361_v42, %v6232_v56 }
 0x453   : > { %v10102_v41 = vpop.f32.mrf.mxu0 }
 0x454   : > { %v10138_v55 = vpop.f32.mrf.mxu1 }
 0x455   : > { %v6242_v46 = vpop.f32.mrf.mxu0  ;;  %v6377_v0 = vadd.f32 %v10138_v55, %v10102_v41 }
 0x456   : > { %v6371_v17 = vpop.f32.mrf.mxu1 }
 0x457   : > { %v6372_v18 = vadd.f32 %v6371_v17, %v6242_v46 }
 0x459   : > { %v10105_v54 = vpop.f32.mrf.mxu0 }
 0x45a   : > { %v10141_v39 = vpop.f32.mrf.mxu1 }
 0x45b   : > { %v6252_v20 = vpop.f32.mrf.mxu0  ;;  %v6387_v59 = vadd.f32 %v10141_v39, %v10105_v54 }
 0x45c   : > { %v6381_v14 = vpop.f32.mrf.mxu1 }
 0x45f   : > { %v13682_v26 = vpop.f32.mrf.mxu0 }
 0x460   : > { %13945 = vst [vmem:[#allocation13_spill] sm:$0xff] %v13682_v26  ;;  %v10144_v51 = vpop.f32.mrf.mxu1 }
 0x461   : > { %v13684_v8 = vpop.f32.mrf.mxu0 }
 0x462   : > { %13946 = vst [vmem:[#allocation16_spill] sm:$0xff] %v13684_v8  ;;  %v6391_v23 = vpop.f32.mrf.mxu1 }
 0x467   : > { %v13951_v56 = vld [vmem:[#allocation13_spill] sm:$0xff] }
 0x469   : > { %v13952_v46 = vld [vmem:[#allocation16_spill] sm:$0xff] }
 0x46a   : > { %v6392_v17 = vadd.f32 %v6391_v23, %v13952_v46 }
 0x46c   : > { %v10171_v60 = vpop.f32.mrf.mxu0 }
 0x46d   : > { %v10207_v13 = vpop.f32.mrf.mxu1  ;;  %v6551_v53 = vadd.f32 %v10171_v60, %v6367_v34  ;;  %v6397_v60 = vadd.f32 %v10144_v51, %v13951_v56 }
 0x46e   : > { %v6511_v11 = vpop.f32.mrf.mxu0 }
 0x46f   : > { %v6669_v4 = vpop.f32.mrf.mxu1  ;;  %v6550_v22 = vadd.f32 %v6511_v11, %v6362_v38  ;;  %v6709_v21 = vadd.f32 %v10207_v13, %v6551_v53 }
 0x472   : > { %v10174_v25 = vpop.f32.mrf.mxu0 }
 0x473   : > { %v10210_v58 = vpop.f32.mrf.mxu1  ;;  %v6553_v44 = vadd.f32 %v10174_v25, %v6377_v0 }
 0x474   : > { %v6521_v30 = vpop.f32.mrf.mxu0 }
 0x475   : > { %v6679_v32 = vpop.f32.mrf.mxu1  ;;  %v6711_v48 = vadd.f32 %v10210_v58, %v6553_v44 }
 0x478   : > { %v10177_v19 = vpop.f32.mrf.mxu0 }
 0x479   : > { %v10213_v28 = vpop.f32.mrf.mxu1  ;;  %v6555_v26 = vadd.f32 %v10177_v19, %v6387_v59 }
 0x47a   : > { %v6531_v57 = vpop.f32.mrf.mxu0 }
 0x47b   : > { %v6689_v43 = vpop.f32.mrf.mxu1  ;;  %v6713_v25 = vadd.f32 %v10213_v28, %v6555_v26 }
 0x47e   : > { %v10180_v2 = vpop.f32.mrf.mxu0 }
 0x47f   : > { %v10216_v40 = vpop.f32.mrf.mxu1  ;;  %v6557_v13 = vadd.f32 %v10180_v2, %v6397_v60 }
 0x480   : > { %v6541_v33 = vpop.f32.mrf.mxu0 }
 0x481   : > { %v13686_v50 = vpop.f32.mrf.mxu1  ;;  %v6715_v19 = vadd.f32 %v10216_v40, %v6557_v13  ;;  %v13957_v13 = vld [vmem:[#allocation12_spill] sm:$0xff] }
 0x482   : > { %13947 = vst [vmem:[#allocation24_spill] sm:$0xff] %v13686_v50  ;;  %v6552_v50 = vadd.f32 %v6521_v30, %v6372_v18 }
 0x484   : > { %v6710_v41 = vadd.f32 %v6679_v32, %v6552_v50 }
 0x489   : > { %v13953_v23 = vld [vmem:[#allocation24_spill] sm:$0xff] }
 0x48c   : > { %v10243_v27 = vpop.f32.mrf.mxu0 }
 0x48d   : > { %v10279_v31 = vpop.f32.mrf.mxu1  ;;  %v6867_v8 = vadd.f32 %v10243_v27, %v6709_v21 }
 0x48e   : > { %v6827_v9 = vpop.f32.mrf.mxu0 }
 0x48f   : > { %v6985_v45 = vpop.f32.mrf.mxu1  ;;  %v7025_v55 = vadd.f32 %v10279_v31, %v6867_v8 }
 0x492   : > { %v10246_v24 = vpop.f32.mrf.mxu0 }
 0x493   : > { %v10282_v29 = vpop.f32.mrf.mxu1  ;;  %v6869_v11 = vadd.f32 %v10246_v24, %v6711_v48 }
 0x494   : > { %v6837_v49 = vpop.f32.mrf.mxu0 }
 0x495   : > { %v6995_v15 = vpop.f32.mrf.mxu1  ;;  %v6868_v18 = vadd.f32 %v6837_v49, %v6710_v41  ;;  %v7027_v30 = vadd.f32 %v10282_v29, %v6869_v11 }
 0x498   : > { %v10249_v36 = vpop.f32.mrf.mxu0 }
 0x499   : > { %v10285_v61 = vpop.f32.mrf.mxu1  ;;  %v6871_v44 = vadd.f32 %v10249_v36, %v6713_v25  ;;  %v13706_v36 = vld [vmem:[%s13824_s8 + $0x1] ss:$0 sm:$0xff] }
 0x49a   : > { %v6847_v63 = vpop.f32.mrf.mxu0 }
 0x49b   : > { %v7005_v7 = vpop.f32.mrf.mxu1  ;;  %v7029_v2 = vadd.f32 %v10285_v61, %v6871_v44 }
 0x49e   : > { %v10252_v35 = vpop.f32.mrf.mxu0 }
 0x49f   : > { %v13690_v62 = vpop.f32.mrf.mxu1  ;;  %v6873_v28 = vadd.f32 %v10252_v35, %v6715_v19 }
 0x4a0   : > { %v13688_v6 = vpop.f32.mrf.mxu0  ;;  %13949 = vst [vmem:[#allocation21_spill] sm:$0xff] %v13690_v62  ;;  %v6382_v62 = vadd.f32 %v6381_v14, %v6252_v20  ;;  %v6556_v14 = vadd.f32 %v6541_v33, %v6392_v17 }
 0x4a1   : > { %13948 = vst [vmem:[#allocation30_spill] sm:$0xff] %v13688_v6  ;;  %v13692_v5 = vpop.f32.mrf.mxu1  ;;  %v6708_v6 = vadd.f32 %v6669_v4, %v6550_v22 }
 0x4a2   : > { %13950 = vst [vmem:[#allocation27_spill] sm:$0xff] %v13692_v5  ;;  %v6554_v34 = vadd.f32 %v6531_v57, %v6382_v62  ;;  %v7026_v57 = vadd.f32 %v6995_v15, %v6868_v18  ;;  %v6714_v26 = vadd.f32 %v13953_v23, %v6556_v14  ;;  %v13958_v14 = vld [vmem:[#allocation17_spill] sm:$0xff] }
 0x4a3   : > { %v6866_v5 = vadd.f32 %v6827_v9, %v6708_v6 }
 0x4a4   : > { %v6712_v59 = vadd.f32 %v6689_v43, %v6554_v34  ;;  %v13700_v43 = vld [vmem:[%s13824_s8] ss:$0 sm:$0xff] }
 0x4a5   : > { %v7024_v39 = vadd.f32 %v6985_v45, %v6866_v5 }
 0x4a6   : > { %v6870_v51 = vadd.f32 %v6847_v63, %v6712_v59 }
 0x4a7   : > { %v13955_v6 = vld [vmem:[#allocation21_spill] sm:$0xff] }
 0x4a8   : > { %v7028_v40 = vadd.f32 %v7005_v7, %v6870_v51  ;;  %v13954_v31 = vld [vmem:[#allocation30_spill] sm:$0xff] }
 0x4a9   : > { %v6872_v49 = vadd.f32 %v13954_v31, %v6714_v26  ;;  %v13960_v26 = vld [vmem:[#allocation15_spill] sm:$0xff]  ;;  %v7774_v31 = vpop.permute.xlu1 %7773 }
 0x4ac   : > { %v10315_v16 = vpop.f32.mrf.mxu0 }
 0x4ad   : > { %v10351_v3 = vpop.f32.mrf.mxu1  ;;  %v7184_v21 = vadd.f32 %v10315_v16, %v7025_v55  ;;  %v7031_v16 = vadd.f32 %v13955_v6, %v6873_v28 }
 0x4ae   : > { %v7144_v12 = vpop.f32.mrf.mxu0 }
 0x4af   : > { %v7302_v1 = vpop.f32.mrf.mxu1  ;;  %v7183_v4 = vadd.f32 %v7144_v12, %v7024_v39  ;;  %v7342_v8 = vadd.f32 %v10351_v3, %v7184_v21 }
 0x4b0   : > { %v10318_v52 = vpop.f32.mrf.mxu0 }
 0x4b1   : > { %v10354_v42 = vpop.f32.mrf.mxu1  ;;  %v7186_v32 = vadd.f32 %v10318_v52, %v7027_v30  ;;  %v7341_v33 = vadd.f32 %v7302_v1, %v7183_v4 }
 0x4b2   : > { %v7154_v10 = vpop.f32.mrf.mxu0 }
 0x4b3   : > { %v7312_v20 = vpop.f32.mrf.mxu1  ;;  %v7185_v50 = vadd.f32 %v7154_v10, %v7026_v57  ;;  %v7344_v63 = vadd.f32 %v10354_v42, %v7186_v32  ;;  %v13956_v10 = vld [vmem:[#allocation27_spill] sm:$0xff] }
 0x4b4   : > { %v10321_v47 = vpop.f32.mrf.mxu0  ;;  %v7030_v38 = vadd.f32 %v13956_v10, %v6872_v49  ;;  %v7772_v49 = vpop.permute.xlu0 %7771 }
 0x4b5   : > { %v10357_v27 = vpop.f32.mrf.mxu1  ;;  %v7188_v45 = vadd.f32 %v10321_v47, %v7029_v2  ;;  %v7343_v62 = vadd.f32 %v7312_v20, %v7185_v50 }
 0x4b6   : > { %v7164_v37 = vpop.f32.mrf.mxu0 }
 0x4b7   : > { %v7322_v15 = vpop.f32.mrf.mxu1  ;;  %v7187_v1 = vadd.f32 %v7164_v37, %v7028_v40  ;;  %v7346_v53 = vadd.f32 %v10357_v27, %v7188_v45  ;;  %v13962_v40 = vld [vmem:[#allocation28_spill] sm:$0xff] }
 0x4b8   : > { %v10324_v54 = vpop.f32.mrf.mxu0 }
 0x4b9   : > { %v10360_v7 = vpop.f32.mrf.mxu1  ;;  %v7190_v3 = vadd.f32 %v10324_v54, %v7031_v16  ;;  %v7345_v56 = vadd.f32 %v7322_v15, %v7187_v1 }
 0x4ba   : > { %v7174_v58 = vpop.f32.mrf.mxu0 }
 0x4bb   : > { %v7189_v60 = vadd.f32 %v7174_v58, %v7030_v38  ;;  %v7332_v41 = vpop.f32.mrf.mxu1  ;;  %v7348_v25 = vadd.f32 %v10360_v7, %v7190_v3  ;;  %v13959_v58 = vld [vmem:[#allocation22_spill] sm:$0xff] }
 0x4bd   : > { %v7347_v59 = vadd.f32 %v7332_v41, %v7189_v60 }
 0x4c6   : > { %v10387_v9 = vpop.f32.mrf.mxu0 }
 0x4c7   : > { %v7500_v24 = vadd.f32 %v10387_v9, %v7342_v8 }
 0x4c8   : > { %v7460_v29 = vpop.f32.mrf.mxu0 }
 0x4c9   : > { %v7513_v35 = vmul.f32 %v13700_v43, %v7500_v24  ;;  %v7499_v61 = vadd.f32 %v7460_v29, %v7341_v33  ;;  %v13961_v33 = vld [vmem:[#allocation19_spill] sm:$0xff] }
 0x4ca   : > { %v10390_v12 = vpop.f32.mrf.mxu0 }
 0x4cb   : > { %v7526_v52 = vadd.f32 %v13706_v36, %v7513_v35  ;;  %v7512_v47 = vmul.f32 %v13700_v43, %v7499_v61  ;;  %v7502_v5 = vadd.f32 %v10390_v12, %v7344_v63 }
 0x4cc   : > { %v7470_v0 = vpop.f32.mrf.mxu0 }
 0x4cd   : > { %v7534_v22 = vmax.f32 %v7526_v52, 0.0  ;;  %v7525_v37 = vadd.f32 %v13706_v36, %v7512_v47  ;;  %v7515_v48 = vmul.f32 %v13700_v43, %v7502_v5  ;;  %v7501_v42 = vadd.f32 %v7470_v0, %v7343_v62 }
 0x4ce   : > { %v10393_v34 = vpop.f32.mrf.mxu0 }
 0x4cf   : > { %7542 = vst.msk [vmem:[%s10808_s25 + $0x18] sm:$0xff] %vm406_vm10, %v7534_v22  ;;  %v7533_v55 = vmax.f32 %v7525_v37, 0.0  ;;  %v7528_v11 = vadd.f32 %v13706_v36, %v7515_v48  ;;  %v7514_v46 = vmul.f32 %v13700_v43, %v7501_v42  ;;  %v7504_v17 = vadd.f32 %v10393_v34, %v7346_v53 }
 0x4d0   : > { %7785 = vst.msk [vmem:[%s10808_s25 + $0x18] sm:$0xff] %vm7783_vm13, %v13957_v13  ;;  %v7480_v54 = vpop.f32.mrf.mxu0 }
 0x4d1   : > { %7541 = vst.msk [vmem:[%s10808_s25 + $0x8] sm:$0xff] %vm406_vm10, %v7533_v55  ;;  %v7536_v39 = vmax.f32 %v7528_v11, 0.0  ;;  %v7527_v18 = vadd.f32 %v13706_v36, %v7514_v46  ;;  %v7517_v21 = vmul.f32 %v13700_v43, %v7504_v17  ;;  %v7503_v20 = vadd.f32 %v7480_v54, %v7345_v56 }
 0x4d2   : > { %7784 = vst.msk [vmem:[%s10808_s25 + $0x8] sm:$0xff] %vm7783_vm13, %v13958_v14  ;;  %v10396_v44 = vpop.f32.mrf.mxu0 }
 0x4d3   : > { %7544 = vst.msk [vmem:[%s10808_s25 + $0x38] sm:$0xff] %vm406_vm10, %v7536_v39  ;;  %v7535_v30 = vmax.f32 %v7527_v18, 0.0  ;;  %v7530_v4 = vadd.f32 %v13706_v36, %v7517_v21  ;;  %v7516_v19 = vmul.f32 %v13700_v43, %v7503_v20  ;;  %v7506_v51 = vadd.f32 %v10396_v44, %v7348_v25 }
 0x4d4   : > { %7787 = vst.msk [vmem:[%s10808_s25 + $0x38] sm:$0xff] %vm7783_vm13, %v13959_v58  ;;  %v7490_v57 = vpop.f32.mrf.mxu0 }
 0x4d5   : > { %7543 = vst.msk [vmem:[%s10808_s25 + $0x28] sm:$0xff] %vm406_vm10, %v7535_v30  ;;  %v7538_v8 = vmax.f32 %v7530_v4, 0.0  ;;  %v7529_v32 = vadd.f32 %v13706_v36, %v7516_v19  ;;  %v7519_v27 = vmul.f32 %v13700_v43, %v7506_v51  ;;  %v7505_v23 = vadd.f32 %v7490_v57, %v7347_v59 }
 0x4d6   : > { %7786 = vst.msk [vmem:[%s10808_s25 + $0x28] sm:$0xff] %vm7783_vm13, %v13960_v26 }
 0x4d7   : > { %7546 = vst.msk [vmem:[%s10808_s25 + $0x58] sm:$0xff] %vm406_vm10, %v7538_v8  ;;  %v7537_v2 = vmax.f32 %v7529_v32, 0.0  ;;  %v7532_v28 = vadd.f32 %v13706_v36, %v7519_v27  ;;  %v7518_v9 = vmul.f32 %v13700_v43, %v7505_v23 }
 0x4d8   : > { %7789 = vst.msk [vmem:[%s10808_s25 + $0x58] sm:$0xff] %vm7783_vm13, %v13961_v33 }
 0x4d9   : > { %7545 = vst.msk [vmem:[%s10808_s25 + $0x48] sm:$0xff] %vm406_vm10, %v7537_v2  ;;  %v7540_v50 = vmax.f32 %v7532_v28, 0.0  ;;  %v7531_v24 = vadd.f32 %v13706_v36, %v7518_v9 }
 0x4da   : > { %7788 = vst.msk [vmem:[%s10808_s25 + $0x48] sm:$0xff] %vm7783_vm13, %v13962_v40 }
 0x4db   : > { %7548 = vst.msk [vmem:[%s10808_s25 + $0x78] sm:$0xff] %vm406_vm10, %v7540_v50  ;;  %v7539_v43 = vmax.f32 %v7531_v24, 0.0 }
 0x4dc   : > { %7791 = vst.msk [vmem:[%s10808_s25 + $0x78] sm:$0xff] %vm7783_vm13, %v7774_v31 }
 0x4dd   : > { %7547 = vst.msk [vmem:[%s10808_s25 + $0x68] sm:$0xff] %vm406_vm10, %v7539_v43 }
 0x4de   : > { %7790 = vst.msk [vmem:[%s10808_s25 + $0x68] sm:$0xff] %vm7783_vm13, %v7772_v49 }
 0x4df   : > { %10462 = shalt.err (!%p10459_p3)
}
 0x4e0   : > { %s10463_s29 = scalar_lea.hbm %s13763_s18, 2048  ;;  %s10467_s11 = scalar_lea.hbm %s13826_s10, 4096 }
 0x4e1   : > { %p10464_p4 = scmp.ne.s32.totalorder %s13763_s18, %s10463_s29  ;;  %p10468_p9 = scmp.lt.s32.totalorder %s13763_s18, %s13826_s10 }
 0x4e2   : > { %p10469_p10 = scmp.lt.s32.totalorder %s10467_s11, %s10463_s29 }
 0x4e3   : > { %p10465_p7 = pnand %p10464_p4, %p10611_p5 }
 0x4e4   : > { %p10470_p11 = por %p10469_p10, %p10468_p9 }
 0x4e5   : > { %p10466_p8 = pneg %p10465_p7 }
 0x4e7   : > { %p10471_p12 = pnand %p10470_p11, %p10466_p8 }
 0x4e9   : > { %10474 = shalt.err (!%p10471_p12)
}
 0x4ea   : > { %s10517_s20 = smov 256   ;;  %s13963_s28 = smov 16  }
 0x4eb   : > { %10399 = dma.vmem_to_hbm [thread:$0]  (%p10611_p5), %s13767_s30, 2048, %s13763_s18, %s13775_s17, %s10517_s20, %s10517_s20, %s13963_s28  }
 0x4ec PF: > { %p10405_p13 = scmp.ge.s32.totalorder %s10509_s16, 2  ;;  %s7821_s21 = sand.u32 1, %s10497_s13  }
 0x4ed   : > { %s7822_s29 = scalar_lea.sflag [#allocation7], %s7821_s21 }
 0x4ee   : > { %p10402_p0 = pnand %p10405_p13, %p10615_p6 }
 0x4f0   : > { %p10403_p1 = pneg %p10402_p0 }
 0x4f2   : > { %10492 = dma.done.wait (%p10403_p1), %s7822_s29, 2048  }
 0x4f3   : > { %10494 = vsyncadd (%p10403_p1), %s7822_s29, 4294965248  ;;  %p20_p2 = scmp.ge.s32.totalorder %s10598_s19, 4   ;;  %s13964_s13 = smov %s10501_s14 }
 0x4f4   : > { %s13965_s14 = smov %s10505_s15  ;;  %s13966_s15 = smov %s10609_s22 }
 0x4f5   : > { %s13967_s16 = smov %s10598_s19  ;;  %22 = sbr.rel (!%p20_p2) target bundleno = 3 (0x3), region = 146 }
 0x4fa   :  { %7827 = vsyncpa [#allocation7], 1 }
 0x4fb   :  { %7829 = vsyncpa [#allocation7 + $0x1], 1 }

</bundles_post_ra>
